<compile_context>
chip_gen: v5e
topology: v5e:2x2
jax: 0.10.0
libtpu: 0.0.40
codegen_flags: <defaults>
</compile_context>

<pallas_src>
import numpy as np
import jax
import jax.numpy as jnp
from jax.experimental import pallas as pl
from jax.experimental.pallas import tpu as pltpu

K = 5        # conv kernel size
PAD = 2      # conv padding
EPS = 1e-5   # BatchNorm eps
HALO = 8     # depth-halo block rows (min sublane-aligned block, >= 2*PAD)


def _conv_stats_kernel(xa_ref, xb_ref, w_ref, y_ref, stats_ref):
    """Conv3d(k=5, pad=2) for one (batch, depth-tile) block + BN partial sums.

    xa_ref   : (1, TD, Hp*Wp*C)    f32  padded-depth rows [i*TD, (i+1)*TD)
    xb_ref   : (1, 8,  Hp*Wp*C)    f32  padded-depth rows [(i+1)*TD, (i+1)*TD+8)
                                        (only the first 2*PAD rows are used)
    w_ref    : (5, Hp*Wp*C, H*W*C) bf16 per-kd banded weights (kh, kw, ci folded
                                        into the contraction dim)
    y_ref    : (1, TD, H*W*C)      f32  conv output, lane-dense last dim
    stats_ref: (1, 1, 2, H*W*C)    f32  row 0: sum, row 1: sum of squares
    """
    TD = xa_ref.shape[1]
    HWC = y_ref.shape[2]

    # xin[m] == padded depth row i*TD + m for m in [0, TD+8); the conv taps only
    # read rows [0, TD + 2*PAD).  Concat offset (TD) is sublane-aligned (f32).
    xin = jnp.concatenate([xa_ref[0], xb_ref[0]], axis=0)   # (TD+8, Hp*Wp*C)

    # 5 dots per tile: contraction dim Hp*Wp*C, output dim H*W*C (lane-dense).
    # Only leading-dim slices of xin -> no strided per-tap copies.
    acc = jnp.zeros((TD, HWC), jnp.float32)
    for kd in range(K):
        lhs = xin[kd:kd + TD].astype(jnp.bfloat16)
        acc = acc + jnp.dot(lhs, w_ref[kd], preferred_element_type=jnp.float32)

    y_ref[0] = acc

    # Per-tile BatchNorm partial statistics (reduced over the depth rows).
    cs = jnp.sum(acc, axis=0, keepdims=True)
    sq = jnp.sum(acc * acc, axis=0, keepdims=True)
    stats_ref[0, 0] = jnp.concatenate([cs, sq], axis=0)


def _bn_elu_nchw_kernel(y_ref, scale_ref, shift_ref, eye_ref, o_ref):
    """Folded BN (y*scale + shift) + ELU, written out channels-first.

    y_ref    : (1, TR, C) f32  rows = flattened (d, h, w), cols = channels
    scale_ref: (1, C)     f32
    shift_ref: (1, C)     f32
    eye_ref  : (C, C)     f32  identity
    o_ref    : (1, C, TR) f32  channels-first, lane-dense (TR >= 128 lanes)
    """
    z = y_ref[0] * scale_ref[...] + shift_ref[...]                 # (TR, C)
    z = jnp.where(z > 0, z, jnp.exp(jnp.minimum(z, 0.0)) - 1.0)    # ELU
    # Channels-last -> channels-first via an identity contraction on the MXU
    # (A @ B^T pattern): no in-kernel reshape/transpose relayouts needed.
    o_ref[0] = jax.lax.dot_general(
        eye_ref[...], z, (((1,), (1,)), ((), ())),
        preferred_element_type=jnp.float32)


def _pick_depth_tile(D):
    for td in (32, 16, 8):
        if D % td == 0:
            return td
    raise ValueError("depth must be a multiple of 8 for this kernel")


def _pick_row_tile(M):
    # Epilogue row tile over flattened d*h*w: whole per-batch slab when small,
    # otherwise the largest 128-multiple divisor (keeps stores lane-dense).
    if M <= 8192:
        return M
    for t in range(8192, 0, -128):
        if M % t == 0:
            return t
    return M


def luconv_forward(x_ncdhw, w_oidhw, bias, gamma, beta):
    """LUConv forward: (N, C, D, H, W) f32 -> (N, C, D, H, W) f32.

    The Conv3d bias cancels exactly under training-mode BatchNorm (removed by
    the mean subtraction), so it is intentionally not applied.
    """
    del bias
    N, C, D, H, W = x_ncdhw.shape
    TD = _pick_depth_tile(D)
    gD = D // TD
    Hp, Wp = H + 2 * PAD, W + 2 * PAD
    HWC = H * W * C
    HpWpC = Hp * Wp * C
    DHW = D * H * W

    # NCDHW -> NDHWC, zero pad (depth back-padded only by HALO - PAD rows so the
    # last tile's 8-row halo block stays in bounds), merge (Hp, Wp, C) into one
    # lane axis (free relabel of the contiguous NDHWC layout).
    x = jnp.transpose(x_ncdhw, (0, 2, 3, 4, 1))
    xp = jnp.pad(x, ((0, 0), (PAD, HALO - PAD), (PAD, PAD), (PAD, PAD), (0, 0)))
    xp = xp.reshape(N, D + HALO, HpWpC)

    # Banded per-kd weight with kh, kw, ci folded into the contraction dim:
    # band[kd, (q*Wp+r)*C+ci, (h*W+w)*C+co] = w[co, ci, kd, q-h, r-w]
    #   if 0 <= q-h < 5 and 0 <= r-w < 5 else 0.
    wt = jnp.transpose(w_oidhw, (2, 3, 4, 1, 0)).astype(jnp.float32)  # kd,kh,kw,ci,co
    selh = np.zeros((K, Hp, H), np.float32)
    selw = np.zeros((K, Wp, W), np.float32)
    for k in range(K):
        selh[k, np.arange(H) + k, np.arange(H)] = 1.0
        selw[k, np.arange(W) + k, np.arange(W)] = 1.0
    band = jnp.einsum("bqh,krw,abkco->aqrchwo",
                      jnp.asarray(selh), jnp.asarray(selw), wt)
    band = band.reshape(K, HpWpC, HWC).astype(jnp.bfloat16)

    conv, stats = pl.pallas_call(
        _conv_stats_kernel,
        out_shape=(
            jax.ShapeDtypeStruct((N, D, HWC), jnp.float32),
            jax.ShapeDtypeStruct((N, gD, 2, HWC), jnp.float32),
        ),
        grid=(N, gD),
        in_specs=[
            pl.BlockSpec((1, TD, HpWpC), lambda n, i: (n, i, 0)),
            pl.BlockSpec((1, HALO, HpWpC),
                         lambda n, i: (n, (i + 1) * (TD // HALO), 0)),
            pl.BlockSpec((K, HpWpC, HWC), lambda n, i: (0, 0, 0)),
        ],
        out_specs=(
            pl.BlockSpec((1, TD, HWC), lambda n, i: (n, i, 0)),
            pl.BlockSpec((1, 1, 2, HWC), lambda n, i: (n, i, 0, 0)),
        ),
        compiler_params=pltpu.CompilerParams(
            dimension_semantics=("parallel", "parallel")),
    )(xp, xp, band)

    # Finalize BN statistics (tiny) and fold gamma/beta/mean/var into one
    # per-channel scale & shift.  Note: E[x^2]-E[x]^2 in f32 (fine at these
    # magnitudes, clamped >= 0).
    tot = jnp.sum(stats.reshape(N, gD, 2, H * W, C), axis=(0, 1, 3))   # (2, C)
    cnt = jnp.float32(N * D * H * W)
    mean = tot[0] / cnt
    var = jnp.maximum(tot[1] / cnt - mean * mean, 0.0)
    scale = gamma * jax.lax.rsqrt(var + EPS)
    shift = beta - mean * scale

    TR = _pick_row_tile(DHW)
    nblk = DHW // TR
    conv2 = conv.reshape(N, DHW, C)          # free relabel of contiguous layout
    scale_row = scale.reshape(1, C)
    shift_row = shift.reshape(1, C)
    eye_c = jnp.eye(C, dtype=jnp.float32)

    out = pl.pallas_call(
        _bn_elu_nchw_kernel,
        out_shape=jax.ShapeDtypeStruct((N, C, DHW), jnp.float32),
        grid=(N, nblk),
        in_specs=[
            pl.BlockSpec((1, TR, C), lambda n, j: (n, j, 0)),
            pl.BlockSpec((1, C), lambda n, j: (0, 0)),
            pl.BlockSpec((1, C), lambda n, j: (0, 0)),
            pl.BlockSpec((C, C), lambda n, j: (0, 0)),
        ],
        out_specs=pl.BlockSpec((1, C, TR), lambda n, j: (n, 0, j)),
        compiler_params=pltpu.CompilerParams(
            dimension_semantics=("parallel", "parallel")),
    )(conv2, scale_row, shift_row, eye_c)

    # Free relabel -> NCDHW (no extra XLA transpose pass).
    return out.reshape(N, C, D, H, W)


def reference_forward(x, w, bias, gamma, beta):
    """Pure-JAX reference (conv3d + bias + train-mode BN + ELU), NCDHW, f32."""
    conv = jax.lax.conv_general_dilated(
        x, w, window_strides=(1, 1, 1),
        padding=[(PAD, PAD)] * 3,
        dimension_numbers=("NCDHW", "OIDHW", "NCDHW"),
        precision=jax.lax.Precision.HIGHEST,
    ) + bias.reshape(1, -1, 1, 1, 1)
    mean = jnp.mean(conv, axis=(0, 2, 3, 4), keepdims=True)
    var = jnp.mean((conv - mean) ** 2, axis=(0, 2, 3, 4), keepdims=True)
    xhat = (conv - mean) * jax.lax.rsqrt(var + EPS)
    y = xhat * gamma.reshape(1, -1, 1, 1, 1) + beta.reshape(1, -1, 1, 1, 1)
    return jnp.where(y > 0, y, jnp.exp(y) - 1.0)


if __name__ == "__main__":
    # small shapes consistent with LUConv(nchan=4, elu=True) on a 3D volume
    N, C, D, H, W = 2, 4, 8, 8, 8

    key = jax.random.PRNGKey(0)
    kx, kw_, kb, kg, kbe = jax.random.split(key, 5)
    x = jax.random.normal(kx, (N, C, D, H, W), dtype=jnp.float32)
    w = jax.random.normal(kw_, (C, C, K, K, K), dtype=jnp.float32) * 0.05
    bias = jax.random.normal(kb, (C,), dtype=jnp.float32) * 0.1
    gamma = 1.0 + 0.1 * jax.random.normal(kg, (C,), dtype=jnp.float32)
    beta = 0.1 * jax.random.normal(kbe, (C,), dtype=jnp.float32)

    out = luconv_forward(x, w, bias, gamma, beta)
    jax.block_until_ready(out)

    ref = reference_forward(x, w, bias, gamma, beta)
    assert out.shape == (N, C, D, H, W)
    # bf16 MXU operands (f32 accumulation) -> slightly looser tolerance than a
    # pure-f32 implementation.
    assert jnp.allclose(out, ref, atol=2e-2, rtol=2e-2), "mismatch vs reference"

    print("KERNEL_OK")
</pallas_src>

<mosaic_0001>
module attributes {stable_mosaic.version = 11 : i64} {
  func.func @_conv_stats_kernel(%arg0: i32, %arg1: i32, %arg2: memref<1x8x576xf32, #tpu.memory_space<vmem>>, %arg3: memref<1x8x576xf32, #tpu.memory_space<vmem>>, %arg4: memref<5x576x256xbf16, #tpu.memory_space<vmem>>, %arg5: memref<1x8x256xf32, #tpu.memory_space<vmem>>, %arg6: memref<1x1x2x256xf32, #tpu.memory_space<vmem>>) attributes {dimension_semantics = [#tpu.dimension_semantics<parallel>, #tpu.dimension_semantics<parallel>], iteration_bounds = array<i64: 2, 1>, scalar_prefetch = 0 : i64, scratch_operands = 0 : i64, tpu.core_type = #tpu.core_type<tc>, window_params = [{transform_indices = @transform_0, window_bounds = array<i64: 1, 8, 576>}, {transform_indices = @transform_1, window_bounds = array<i64: 1, 8, 576>}, {pipeline_mode = #tpu.pipeline_mode<synchronous>, transform_indices = @transform_2, window_bounds = array<i64: 5, 576, 256>}, {transform_indices = @transform_3, window_bounds = array<i64: 1, 8, 256>}, {transform_indices = @transform_4, window_bounds = array<i64: 1, 1, 2, 256>}]} {
    %c0 = arith.constant 0 : index
    %c0_0 = arith.constant 0 : index
    %c0_1 = arith.constant 0 : index
    %0 = vector.load %arg2[%c0, %c0_0, %c0_1] : memref<1x8x576xf32, #tpu.memory_space<vmem>>, vector<1x8x576xf32>
    %1 = vector.shape_cast %0 : vector<1x8x576xf32> to vector<8x576xf32>
    %c0_2 = arith.constant 0 : index
    %c0_3 = arith.constant 0 : index
    %c0_4 = arith.constant 0 : index
    %2 = vector.load %arg3[%c0_2, %c0_3, %c0_4] : memref<1x8x576xf32, #tpu.memory_space<vmem>>, vector<1x8x576xf32>
    %3 = vector.shape_cast %2 : vector<1x8x576xf32> to vector<8x576xf32>
    %4 = tpu.concatenate %1, %3 in 0 : vector<8x576xf32>, vector<8x576xf32> -> vector<16x576xf32>
    %cst = arith.constant 0.000000e+00 : f32
    %5 = vector.broadcast %cst : f32 to vector<8x256xf32>
    %6 = vector.extract_strided_slice %4 {offsets = [0, 0], sizes = [8, 576], strides = [1, 1]} : vector<16x576xf32> to vector<8x576xf32>
    %7 = arith.truncf %6 : vector<8x576xf32> to vector<8x576xbf16>
    %c0_5 = arith.constant 0 : index
    %c0_6 = arith.constant 0 : index
    %c0_7 = arith.constant 0 : index
    %8 = vector.load %arg4[%c0_5, %c0_6, %c0_7] : memref<5x576x256xbf16, #tpu.memory_space<vmem>>, vector<1x576x256xbf16>
    %9 = vector.shape_cast %8 : vector<1x576x256xbf16> to vector<576x256xbf16>
    %cst_8 = arith.constant dense<0.000000e+00> : vector<8x256xf32>
    %10 = tpu.matmul %7, %9, %cst_8 {dimension_numbers = #tpu.dot_dimension_numbers<[1], [0], [0], [1], [0, 0, 1, 1], [], []>} : vector<8x576xbf16>, vector<576x256xbf16>, vector<8x256xf32> -> vector<8x256xf32>
    %11 = arith.addf %5, %10 : vector<8x256xf32>
    %12 = vector.extract_strided_slice %4 {offsets = [1, 0], sizes = [8, 576], strides = [1, 1]} : vector<16x576xf32> to vector<8x576xf32>
    %13 = arith.truncf %12 : vector<8x576xf32> to vector<8x576xbf16>
    %c1 = arith.constant 1 : index
    %c0_9 = arith.constant 0 : index
    %c0_10 = arith.constant 0 : index
    %14 = vector.load %arg4[%c1, %c0_9, %c0_10] : memref<5x576x256xbf16, #tpu.memory_space<vmem>>, vector<1x576x256xbf16>
    %15 = vector.shape_cast %14 : vector<1x576x256xbf16> to vector<576x256xbf16>
    %cst_11 = arith.constant dense<0.000000e+00> : vector<8x256xf32>
    %16 = tpu.matmul %13, %15, %cst_11 {dimension_numbers = #tpu.dot_dimension_numbers<[1], [0], [0], [1], [0, 0, 1, 1], [], []>} : vector<8x576xbf16>, vector<576x256xbf16>, vector<8x256xf32> -> vector<8x256xf32>
    %17 = arith.addf %11, %16 : vector<8x256xf32>
    %18 = vector.extract_strided_slice %4 {offsets = [2, 0], sizes = [8, 576], strides = [1, 1]} : vector<16x576xf32> to vector<8x576xf32>
    %19 = arith.truncf %18 : vector<8x576xf32> to vector<8x576xbf16>
    %c2 = arith.constant 2 : index
    %c0_12 = arith.constant 0 : index
    %c0_13 = arith.constant 0 : index
    %20 = vector.load %arg4[%c2, %c0_12, %c0_13] : memref<5x576x256xbf16, #tpu.memory_space<vmem>>, vector<1x576x256xbf16>
    %21 = vector.shape_cast %20 : vector<1x576x256xbf16> to vector<576x256xbf16>
    %cst_14 = arith.constant dense<0.000000e+00> : vector<8x256xf32>
    %22 = tpu.matmul %19, %21, %cst_14 {dimension_numbers = #tpu.dot_dimension_numbers<[1], [0], [0], [1], [0, 0, 1, 1], [], []>} : vector<8x576xbf16>, vector<576x256xbf16>, vector<8x256xf32> -> vector<8x256xf32>
    %23 = arith.addf %17, %22 : vector<8x256xf32>
    %24 = vector.extract_strided_slice %4 {offsets = [3, 0], sizes = [8, 576], strides = [1, 1]} : vector<16x576xf32> to vector<8x576xf32>
    %25 = arith.truncf %24 : vector<8x576xf32> to vector<8x576xbf16>
    %c3 = arith.constant 3 : index
    %c0_15 = arith.constant 0 : index
    %c0_16 = arith.constant 0 : index
    %26 = vector.load %arg4[%c3, %c0_15, %c0_16] : memref<5x576x256xbf16, #tpu.memory_space<vmem>>, vector<1x576x256xbf16>
    %27 = vector.shape_cast %26 : vector<1x576x256xbf16> to vector<576x256xbf16>
    %cst_17 = arith.constant dense<0.000000e+00> : vector<8x256xf32>
    %28 = tpu.matmul %25, %27, %cst_17 {dimension_numbers = #tpu.dot_dimension_numbers<[1], [0], [0], [1], [0, 0, 1, 1], [], []>} : vector<8x576xbf16>, vector<576x256xbf16>, vector<8x256xf32> -> vector<8x256xf32>
    %29 = arith.addf %23, %28 : vector<8x256xf32>
    %30 = vector.extract_strided_slice %4 {offsets = [4, 0], sizes = [8, 576], strides = [1, 1]} : vector<16x576xf32> to vector<8x576xf32>
    %31 = arith.truncf %30 : vector<8x576xf32> to vector<8x576xbf16>
    %c4 = arith.constant 4 : index
    %c0_18 = arith.constant 0 : index
    %c0_19 = arith.constant 0 : index
    %32 = vector.load %arg4[%c4, %c0_18, %c0_19] : memref<5x576x256xbf16, #tpu.memory_space<vmem>>, vector<1x576x256xbf16>
    %33 = vector.shape_cast %32 : vector<1x576x256xbf16> to vector<576x256xbf16>
    %cst_20 = arith.constant dense<0.000000e+00> : vector<8x256xf32>
    %34 = tpu.matmul %31, %33, %cst_20 {dimension_numbers = #tpu.dot_dimension_numbers<[1], [0], [0], [1], [0, 0, 1, 1], [], []>} : vector<8x576xbf16>, vector<576x256xbf16>, vector<8x256xf32> -> vector<8x256xf32>
    %35 = arith.addf %29, %34 : vector<8x256xf32>
    %c0_21 = arith.constant 0 : index
    %c0_22 = arith.constant 0 : index
    %c0_23 = arith.constant 0 : index
    %36 = vector.load %arg5[%c0_21, %c0_22, %c0_23] : memref<1x8x256xf32, #tpu.memory_space<vmem>>, vector<1x8x256xf32>
    %37 = vector.shape_cast %36 : vector<1x8x256xf32> to vector<8x256xf32>
    %38 = vector.shape_cast %35 : vector<8x256xf32> to vector<1x8x256xf32>
    tpu.vector_store %arg5[%c0_21, %c0_22, %c0_23], %38 {strides = array<i32>} : memref<1x8x256xf32, #tpu.memory_space<vmem>>, vector<1x8x256xf32>,
    %cst_24 = arith.constant dense<0.000000e+00> : vector<256xf32>
    %39 = vector.multi_reduction <add>, %35, %cst_24 [0] : vector<8x256xf32> to vector<256xf32>
    %40 = vector.shape_cast %39 : vector<256xf32> to vector<1x256xf32>
    %41 = arith.mulf %35, %35 : vector<8x256xf32>
    %cst_25 = arith.constant dense<0.000000e+00> : vector<256xf32>
    %42 = vector.multi_reduction <add>, %41, %cst_25 [0] : vector<8x256xf32> to vector<256xf32>
    %43 = vector.shape_cast %42 : vector<256xf32> to vector<1x256xf32>
    %44 = tpu.concatenate %40, %43 in 0 : vector<1x256xf32>, vector<1x256xf32> -> vector<2x256xf32>
    %c0_26 = arith.constant 0 : index
    %c0_27 = arith.constant 0 : index
    %c0_28 = arith.constant 0 : index
    %c0_29 = arith.constant 0 : index
    %45 = vector.load %arg6[%c0_26, %c0_27, %c0_28, %c0_29] : memref<1x1x2x256xf32, #tpu.memory_space<vmem>>, vector<1x1x2x256xf32>
    %46 = vector.shape_cast %45 : vector<1x1x2x256xf32> to vector<2x256xf32>
    %47 = vector.shape_cast %44 : vector<2x256xf32> to vector<1x1x2x256xf32>
    tpu.vector_store %arg6[%c0_26, %c0_27, %c0_28, %c0_29], %47 {strides = array<i32>} : memref<1x1x2x256xf32, #tpu.memory_space<vmem>>, vector<1x1x2x256xf32>,
    return
  }
  func.func @transform_0(%arg0: i32, %arg1: i32) -> (i32, i32, i32) {
    %c0_i32 = arith.constant 0 : i32
    %c0_i32_0 = arith.constant 0 : i32
    return %arg0, %arg1, %c0_i32 : i32, i32, i32
  }
  func.func @transform_1(%arg0: i32, %arg1: i32) -> (i32, i32, i32) {
    %c1_i32 = arith.constant 1 : i32
    %0 = arith.addi %arg1, %c1_i32 : i32
    %c1_i32_0 = arith.constant 1 : i32
    %1 = arith.muli %0, %c1_i32_0 : i32
    %c0_i32 = arith.constant 0 : i32
    %c0_i32_1 = arith.constant 0 : i32
    return %arg0, %1, %c0_i32 : i32, i32, i32
  }
  func.func @transform_2(%arg0: i32, %arg1: i32) -> (i32, i32, i32) {
    %c0_i32 = arith.constant 0 : i32
    %c0_i32_0 = arith.constant 0 : i32
    %c0_i32_1 = arith.constant 0 : i32
    %c0_i32_2 = arith.constant 0 : i32
    return %c0_i32, %c0_i32_0, %c0_i32_1 : i32, i32, i32
  }
  func.func @transform_3(%arg0: i32, %arg1: i32) -> (i32, i32, i32) {
    %c0_i32 = arith.constant 0 : i32
    %c0_i32_0 = arith.constant 0 : i32
    return %arg0, %arg1, %c0_i32 : i32, i32, i32
  }
  func.func @transform_4(%arg0: i32, %arg1: i32) -> (i32, i32, i32, i32) {
    %c0_i32 = arith.constant 0 : i32
    %c0_i32_0 = arith.constant 0 : i32
    %c0_i32_1 = arith.constant 0 : i32
    return %arg0, %arg1, %c0_i32, %c0_i32_0 : i32, i32, i32, i32
  }
}

</mosaic_0001>

<bundles_post_ra>
// kernel: tpu_custom_call.1
= control target key start
LH: loop header
LB: loop body
LE: loop exit
PB: predicated region body
PF: predicated region fallthrough
CT: control target
= control target key end

     0   :  { %s6065_s0 = inlined_call_operand.hbm [shape: f32[2,16,576], index: 0, kind: input, shape index: {}]   ;;  %s6066_s1 = inlined_call_operand.hbm [shape: f32[2,16,576], index: 1, kind: input, shape index: {}]   ;;  %s6067_s2 = inlined_call_operand.hbm [shape: bf16[5,576,256], index: 2, kind: input, shape index: {}]   ;;  %s6068_s3 = inlined_call_operand.hbm [shape: f32[2,8,256], index: 3, kind: output, shape index: {0}]   ;;  %s6069_s4 = inlined_call_operand.hbm [shape: f32[2,1,2,256], index: 4, kind: output, shape index: {1}]  }
   0x1   :  { %6075 = sst [smem:[#allocation21_spill]] %s6067_s2 }
   0x2   :  { %10 = vsyncpa [#allocation3], 0 }
   0x3   :  { %12 = vsyncpa [#allocation3 + $0x1], 0 }
   0x4   :  { %13 = vsyncpa [#allocation6], 0 }
   0x5   :  { %15 = vsyncpa [#allocation6 + $0x1], 0 }
   0x6   :  { %16 = vsyncpa [#allocation4], 0 }
   0x7   :  { %18 = vsyncpa [#allocation4 + $0x1], 0 }
   0x8   :  { %19 = vsyncpa [#allocation10], 0 }
   0x9   :  { %21 = vsyncpa [#allocation10 + $0x1], 0  ;;  %s5646_s15 = smov 0   ;;  %s5648_s16 = smov 0  }
   0xa   :  { %s5650_s17 = smov 0   ;;  %s5652_s18 = smov 0  }
   0xb   :  { %s5654_s19 = smov 0   ;;  %s5656_s20 = smov 0  }
   0xc LB: > { %6076 = sst [smem:[#allocation16_spill]] %s5604_s17  ;;  %s5677_s21 = sadd.s32 4294967295, %s5616_s20   ;;  %s5616_s20 = sphi %s5656_s20, %s27_s20   ;;  %s5612_s19 = sphi %s5654_s19, %s6092_s19   ;;  %s5608_s18 = sphi %s5652_s18, %s6091_s18   ;;  %s5604_s17 = sphi %s5650_s17, %s6090_s17   ;;  %s5600_s16 = sphi %s5648_s16, %s6094_s16   ;;  %s5596_s15 = sphi %s5646_s15, %s6093_s15  }
   0xd   : > { %6077 = sst [smem:[#allocation17_spill]] %s5612_s19  ;;  %p3486_p0 = scmp.ge.s32.totalorder %s5616_s20, 1 }
   0xe   : > { %6078 = sst [smem:[#allocation18_spill]] %s5616_s20  ;;  %p62_p1 = scmp.eq.s32.totalorder %s5677_s21, 0 }
   0xf   : > { %p179_p2 = scmp.lt.s32.totalorder %s5616_s20, 3  ;;  %s6079_s2 = sld [smem:[#allocation21_spill]] }
  0x10   : > { %s5618_s26 = smov [#allocation7]   ;;  %p3488_p6 = scmp.ge.s32.totalorder %s5616_s20, 2 }
  0x11   : > { %p5685_p3 = pnand %p3486_p0, %p179_p2  ;;  %s192_s27 = sshll.u32 %s5618_s26, 4  ;;  %s193_s27 = int_to_ptr.vmem [resolvable:$true] %s192_s27 }
  0x12   : > { %s5619_s28 = smov 128   ;;  %s5620_s29 = smov 8  }
  0x13   : > { %p5331_p4 = pneg %p5685_p3  ;;  %s3485_s30 = sadd.s32 4294967294, %s5616_s20  }
  0x14   : > { %s39_s5 = sadd.s32 1, %s5612_s19  ;;  %s48_s6 = sadd.s32 1, %s5604_s17 }
  0x15   : > { %s190_s24 = sshll.u32 %s6079_s2, 4  ;;  %p5332_p5 = pnand %p5331_p4, %p62_p1  ;;  %s191_s24 = int_to_ptr.hbm [resolvable:$true] %s190_s24 }
  0x16   : > { %p41_p7 = scmp.ge.s32.totalorder %s39_s5, 2  ;;  %p55_p8 = scmp.ne.s32.totalorder %s5604_s17, %s5600_s16 }
  0x17   : > { %5334 = dma.hbm_to_vmem [thread:$0]  (!%p5332_p5), %s191_s24, 46080, %s193_s27, [#allocation6], %s5619_s28, %s5619_s28, %s5620_s29  }
  0x18   : > { %p56_p9 = scmp.eq.s32.totalorder %s5616_s20, 0  ;;  %p61_p10 = scmp.ne.s32.totalorder %s5600_s16, %s5596_s15 }
  0x19   : > { %s6096_s5 = smov (%p41_p7, %s39_s5), 0  ;;  %p138_p13 = scmp.eq.s32.totalorder %s5677_s21, 1 }
  0x1a   : > { %6081 = sst [smem:[#allocation19_spill]] %s6096_s5  ;;  %p5704_p11 = por %p56_p9, %p55_p8 }
  0x1b   : > { %p5710_p12 = por %p62_p1, %p61_p10  ;;  %s43_s9 = ssub.s32 %s5612_s19, %s6096_s5 }
  0x1c   : > { %p46_p0 = scmp.eq.s32.totalorder %s43_s9, 0  ;;  %p144_p2 = scmp.eq.s32.totalorder %s3485_s30, 1 }
  0x1d   : > { %p5717_p4 = por %p138_p13, %p55_p8  ;;  %p5350_p5 = scmp.lt.s32.totalorder %s5616_s20, 2 }
  0x1e   : > { %s5723_s11 = scalar_select %p46_p0, %s5604_s17, %s48_s6  }
  0x1f   : > { %p5725_p7 = por %p144_p2, %p61_p10  ;;  %s206_s13 = sand.u32 1, %s5604_s17  }
  0x20   : > { %6085 = sst [smem:[#allocation20_spill]] %s5723_s11  ;;  %s5315_s14 = smul.u32 40, %s206_s13 }
  0x21   : > { %s5316_s22 = smul.u32 80, %s5612_s19  ;;  %p5733_p9 = pnand %p5350_p5, %p5704_p11 }
  0x22   : > { %s228_s24 = sand.u32 1, %s5616_s20   ;;  %s210_s29 = scalar_lea.vmem [#allocation2], %s5315_s14 }
  0x23   : > { %s217_s28 = scalar_lea.hbm %s6065_s0, %s5316_s22  ;;  %s221_s30 = sshll.u32 %s210_s29, 4  ;;  %s222_s30 = int_to_ptr.vmem [resolvable:$true] %s221_s30 }
  0x24   : > { %s219_s6 = sshll.u32 %s217_s28, 4  ;;  %s207_s9 = scalar_lea.sflag [#allocation3], %s206_s13  ;;  %s220_s6 = int_to_ptr.hbm [resolvable:$true] %s219_s6 }
  0x25   : > { %5338 = dma.hbm_to_vmem [thread:$0]  (!%p5733_p9), %s220_s6, 640, %s222_s30, %s207_s9  }
  0x26   : > { %s3383_s5 = scalar_lea.hbm %s6066_s1, %s5316_s22  ;;  %s232_s19 = scalar_lea.vmem [#allocation5], %s5315_s14 }
  0x27   : > { %s244_s11 = sshll.u32 %s232_s19, 4  ;;  %s3384_s17 = scalar_lea.hbm %s3383_s5, 40  ;;  %s245_s11 = int_to_ptr.vmem [resolvable:$true] %s244_s11 }
  0x28   : > { %s242_s20 = sshll.u32 %s3384_s17, 4  ;;  %s229_s26 = scalar_lea.sflag [#allocation6], %s228_s24  ;;  %s243_s20 = int_to_ptr.hbm [resolvable:$true] %s242_s20 }
  0x29   : > { %5341 = dma.hbm_to_vmem [thread:$0]  (!%p5733_p9), %s243_s20, 640, %s245_s11, %s229_s26  }
  0x2a   : > { %253 = sbr.rel (%p5685_p3) target bundleno = 577 (0x241), region = 32  ;;  %s5751_s13 = sand.u32 (!%p5685_p3), 1, %s5600_s16  }
  0x2b   : > { %s5318_s2 = smul.u32 (!%p5685_p3), 40, %s5751_s13  ;;  %s256_s22 = scalar_lea.sflag (!%p5685_p3), [#allocation3], %s5751_s13 }
  0x2d   : > { %s5755_s14 = scalar_lea.vmem (!%p5685_p3), [#allocation2], %s5318_s2 }
  0x2f   : > { %5575 = dma.done.wait (%p5710_p12), %s256_s22, 640  }
  0x30   : > { %5577 = vsyncadd (%p5710_p12), %s256_s22, 4294966656  ;;  %s265_s17 = sand.u32 1, %s5677_s21   ;;  %s5762_s20 = scalar_lea.vmem [#allocation5], %s5318_s2 }
  0x31   : > { %s266_s19 = scalar_lea.sflag [#allocation6], %s265_s17 }
  0x32   : > { %5579 = dma.done.wait (%p5710_p12), %s266_s19, 640  }
  0x33   : > { %5581 = vsyncadd (%p5710_p12), %s266_s19, 4294966656 }
  0x34   : > { %5583 = dma.done.wait (%p62_p1), [#allocation6], 46080  }
  0x35   : > { %5585 = vsyncadd (%p62_p1), [#allocation6], 4294921216  ;;  %v3553_v0 = vld [vmem:[#allocation7 + $0x2b0] sm:$0xf]  ;;  %v5040_v1 = vld [vmem:[#allocation7 + $0x2b4] sm:$0xf0] }
  0x36   : > { %v3617_v2 = vld [vmem:[#allocation7 + $0x330] sm:$0xf]  ;;  %v3554_v3 = vor.u32 %v5040_v1, %v3553_v0  ;;  %v5056_v4 = vld [vmem:[#allocation7 + $0x334] sm:$0xf0]  ;;  %v3545_v11 = vld [vmem:[#allocation7 + $0x2a0] sm:$0xf] }
  0x37   : > { %v3681_v5 = vld [vmem:[#allocation7 + $0x3b0] sm:$0xf]  ;;  %v5072_v6 = vld [vmem:[#allocation7 + $0x3b4] sm:$0xf0]  ;;  %v3618_v7 = vor.u32 %v5056_v4, %v3617_v2  ;;  %v5038_v13 = vld [vmem:[#allocation7 + $0x2a4] sm:$0xf0] }
  0x38   : > { %v3682_v8 = vor.u32 %v5072_v6, %v3681_v5  ;;  %v3745_v9 = vld [vmem:[#allocation7 + $0x430] sm:$0xf]  ;;  %v5088_v10 = vld [vmem:[#allocation7 + $0x434] sm:$0xf0]  ;;  %880 = vmatpush.bf16.msra.mxu0 %v3554_v3  ;;  %v3609_v14 = vld [vmem:[#allocation7 + $0x320] sm:$0xf]  ;;  %v3546_v16 = vor.u32 %v5038_v13, %v3545_v11 }
  0x39   : > { %v3746_v12 = vor.u32 %v5088_v10, %v3745_v9  ;;  %v5054_v15 = vld [vmem:[#allocation7 + $0x324] sm:$0xf0]  ;;  %893 = vmatpush.bf16.msra.mxu1 %v3618_v7  ;;  %v3673_v18 = vld [vmem:[#allocation7 + $0x3a0] sm:$0xf]  ;;  %v3537_v23 = vld [vmem:[#allocation7 + $0x290] sm:$0xf] }
  0x3a   : > { %906 = vmatpush.bf16.msra.mxu2 %v3682_v8  ;;  %v3610_v17 = vor.u32 %v5054_v15, %v3609_v14  ;;  %v5070_v19 = vld [vmem:[#allocation7 + $0x3a4] sm:$0xf0]  ;;  %v3737_v20 = vld [vmem:[#allocation7 + $0x420] sm:$0xf]  ;;  %v5036_v24 = vld [vmem:[#allocation7 + $0x294] sm:$0xf0] }
  0x3b   : > { %919 = vmatpush.bf16.msra.mxu3 %v3746_v12  ;;  %v3674_v21 = vor.u32 %v5070_v19, %v3673_v18  ;;  %v5086_v22 = vld [vmem:[#allocation7 + $0x424] sm:$0xf0]  ;;  %v3601_v26 = vld [vmem:[#allocation7 + $0x310] sm:$0xf]  ;;  %v5052_v27 = vld [vmem:[#allocation7 + $0x314] sm:$0xf0]  ;;  %v3538_v29 = vor.u32 %v5036_v24, %v3537_v23 }
  0x3c   : > { %v3738_v25 = vor.u32 %v5086_v22, %v3737_v20  ;;  %v3665_v28 = vld [vmem:[#allocation7 + $0x390] sm:$0xf]  ;;  %881 = vmatpush.bf16.msra.mxu0 %v3546_v16  ;;  %v5068_v30 = vld [vmem:[#allocation7 + $0x394] sm:$0xf0]  ;;  %v3602_v33 = vor.u32 %v5052_v27, %v3601_v26  ;;  %v3529_v35 = vld [vmem:[#allocation7 + $0x280] sm:$0xf] }
  0x3d   : > { %v3729_v31 = vld [vmem:[#allocation7 + $0x410] sm:$0xf]  ;;  %v5084_v32 = vld [vmem:[#allocation7 + $0x414] sm:$0xf0]  ;;  %894 = vmatpush.bf16.msra.mxu1 %v3610_v17  ;;  %v3666_v34 = vor.u32 %v5068_v30, %v3665_v28  ;;  %v5034_v36 = vld [vmem:[#allocation7 + $0x284] sm:$0xf0] }
  0x3e   : > { %907 = vmatpush.bf16.msra.mxu2 %v3674_v21  ;;  %v3593_v37 = vld [vmem:[#allocation7 + $0x300] sm:$0xf]  ;;  %v3730_v38 = vor.u32 %v5084_v32, %v3729_v31  ;;  %v5050_v39 = vld [vmem:[#allocation7 + $0x304] sm:$0xf0]  ;;  %v3530_v44 = vor.u32 %v5034_v36, %v3529_v35  ;;  %v3521_v47 = vld [vmem:[#allocation7 + $0x270] sm:$0xf] }
  0x3f   : > { %920 = vmatpush.bf16.msra.mxu3 %v3738_v25  ;;  %v3657_v40 = vld [vmem:[#allocation7 + $0x380] sm:$0xf]  ;;  %v5066_v41 = vld [vmem:[#allocation7 + $0x384] sm:$0xf0]  ;;  %v3594_v45 = vor.u32 %v5050_v39, %v3593_v37  ;;  %v5032_v48 = vld [vmem:[#allocation7 + $0x274] sm:$0xf0] }
  0x40   : > { %v3721_v42 = vld [vmem:[#allocation7 + $0x400] sm:$0xf]  ;;  %v5082_v43 = vld [vmem:[#allocation7 + $0x404] sm:$0xf0]  ;;  %882 = vmatpush.bf16.msra.mxu0 %v3538_v29  ;;  %v3658_v46 = vor.u32 %v5066_v41, %v3657_v40  ;;  %v3585_v49 = vld [vmem:[#allocation7 + $0x2f0] sm:$0xf]  ;;  %v3522_v56 = vor.u32 %v5032_v48, %v3521_v47 }
  0x41   : > { %895 = vmatpush.bf16.msra.mxu1 %v3602_v33  ;;  %v3722_v50 = vor.u32 %v5082_v43, %v3721_v42  ;;  %v5048_v51 = vld [vmem:[#allocation7 + $0x2f4] sm:$0xf0]  ;;  %v3649_v52 = vld [vmem:[#allocation7 + $0x370] sm:$0xf]  ;;  %v3513_v59 = vld [vmem:[#allocation7 + $0x260] sm:$0xf] }
  0x42   : > { %908 = vmatpush.bf16.msra.mxu2 %v3666_v34  ;;  %v5064_v53 = vld [vmem:[#allocation7 + $0x374] sm:$0xf0]  ;;  %v3713_v54 = vld [vmem:[#allocation7 + $0x3f0] sm:$0xf]  ;;  %v3586_v57 = vor.u32 %v5048_v51, %v3585_v49  ;;  %v5030_v60 = vld [vmem:[#allocation7 + $0x264] sm:$0xf0] }
  0x43   : > { %921 = vmatpush.bf16.msra.mxu3 %v3730_v38  ;;  %v5080_v55 = vld [vmem:[#allocation7 + $0x3f4] sm:$0xf0]  ;;  %v3650_v58 = vor.u32 %v5064_v53, %v3649_v52  ;;  %v3577_v61 = vld [vmem:[#allocation7 + $0x2e0] sm:$0xf]  ;;  %v5046_v63 = vld [vmem:[#allocation7 + $0x2e4] sm:$0xf0]  ;;  %v3514_v4 = vor.u32 %v5030_v60, %v3513_v59 }
  0x44   : > { %883 = vmatpush.bf16.msra.mxu0 %v3530_v44  ;;  %v3714_v62 = vor.u32 %v5080_v55, %v3713_v54  ;;  %v3641_v0 = vld [vmem:[#allocation7 + $0x360] sm:$0xf]  ;;  %v5062_v1 = vld [vmem:[#allocation7 + $0x364] sm:$0xf0]  ;;  %v3505_v5 = vld [vmem:[#allocation7 + $0x250] sm:$0xf]  ;;  %v3578_v6 = vor.u32 %v5046_v63, %v3577_v61 }
  0x45   : > { %896 = vmatpush.bf16.msra.mxu1 %v3594_v45  ;;  %v3705_v2 = vld [vmem:[#allocation7 + $0x3e0] sm:$0xf]  ;;  %v5078_v3 = vld [vmem:[#allocation7 + $0x3e4] sm:$0xf0]  ;;  %v3642_v7 = vor.u32 %v5062_v1, %v3641_v0  ;;  %v5028_v8 = vld [vmem:[#allocation7 + $0x254] sm:$0xf0] }
  0x46   : > { %909 = vmatpush.bf16.msra.mxu2 %v3658_v46  ;;  %v3569_v9 = vld [vmem:[#allocation7 + $0x2d0] sm:$0xf]  ;;  %v5044_v10 = vld [vmem:[#allocation7 + $0x2d4] sm:$0xf0]  ;;  %v3706_v11 = vor.u32 %v5078_v3, %v3705_v2  ;;  %v3497_v16 = vld [vmem:[#allocation7 + $0x240] sm:$0xf]  ;;  %v3506_v18 = vor.u32 %v5028_v8, %v3505_v5 }
  0x47   : > { %922 = vmatpush.bf16.msra.mxu3 %v3722_v50  ;;  %v3633_v12 = vld [vmem:[#allocation7 + $0x350] sm:$0xf]  ;;  %v5060_v13 = vld [vmem:[#allocation7 + $0x354] sm:$0xf0]  ;;  %v5026_v17 = vld [vmem:[#allocation7 + $0x244] sm:$0xf0]  ;;  %v3570_v23 = vor.u32 %v5044_v10, %v3569_v9 }
  0x48   : > { %884 = vmatpush.bf16.msra.mxu0 %v3522_v56  ;;  %v3697_v14 = vld [vmem:[#allocation7 + $0x3d0] sm:$0xf]  ;;  %v5076_v15 = vld [vmem:[#allocation7 + $0x3d4] sm:$0xf0]  ;;  %v3561_v19 = vld [vmem:[#allocation7 + $0x2c0] sm:$0xf]  ;;  %v3634_v24 = vor.u32 %v5060_v13, %v3633_v12  ;;  %v3498_v36 = vor.u32 %v5026_v17, %v3497_v16 }
  0x49   : > { %897 = vmatpush.bf16.msra.mxu1 %v3586_v57  ;;  %v5042_v20 = vld [vmem:[#allocation7 + $0x2c4] sm:$0xf0]  ;;  %v3625_v21 = vld [vmem:[#allocation7 + $0x340] sm:$0xf]  ;;  %v317_v27 = vld [vmem:[%s5762_s20] sm:$0xff]  ;;  %v3698_v28 = vor.u32 %v5076_v15, %v3697_v14  ;;  %vm876_vm0 = vcmask 523264  }
  0x4a   : > { %910 = vmatpush.bf16.msra.mxu2 %v3650_v58  ;;  %v5058_v22 = vld [vmem:[#allocation7 + $0x344] sm:$0xf0]  ;;  %v3689_v25 = vld [vmem:[#allocation7 + $0x3c0] sm:$0xf]  ;;  %v3777_v30 = vld [vmem:[#allocation7 + $0x470] sm:$0xf]  ;;  %v3562_v41 = vor.u32 %v5042_v20, %v3561_v19 }
  0x4b   : > { %923 = vmatpush.bf16.msra.mxu3 %v3714_v62  ;;  %v5773_v26 = vld [vmem:[%s5755_s14] sm:$0xff]  ;;  %v5096_v31 = vld [vmem:[#allocation7 + $0x474] sm:$0xf0]  ;;  %v5039_v33 = vld [vmem:[#allocation7 + $0x2b4] sm:$0xf]  ;;  %v3626_v42 = vor.u32 %v5058_v22, %v3625_v21  ;;  %s3493_s21 = sshll.u32 %s5751_s13, 4 }
  0x4c   : > { %885 = vmatpush.bf16.msra.mxu0 %v3514_v4  ;;  %v5074_v29 = vld [vmem:[#allocation7 + $0x3c4] sm:$0xf0]  ;;  %v5777_v32 = vpack.c.bf16 %v317_v27, %v5773_v26  ;;  %v3555_v34 = vld [vmem:[#allocation7 + $0x2b8] sm:$0xf0]  ;;  %v5055_v35 = vld [vmem:[#allocation7 + $0x334] sm:$0xf]  ;;  %v3778_v47 = vor.u32 %v5096_v31, %v3777_v30 }
  0x4d   : > { %898 = vmatpush.bf16.msra.mxu1 %v3578_v6  ;;  %v3619_v37 = vld [vmem:[#allocation7 + $0x338] sm:$0xf0]  ;;  %v5071_v38 = vld [vmem:[#allocation7 + $0x3b4] sm:$0xf]  ;;  %v3769_v44 = vld [vmem:[#allocation7 + $0x460] sm:$0xf]  ;;  %v3690_v46 = vor.u32 %v5074_v29, %v3689_v25  ;;  %v3558_v52 = vor.u32 %v5039_v33, %v3555_v34 }
  0x4e   : > { %911 = vmatpush.bf16.msra.mxu2 %v3642_v7  ;;  %v478_v39 = vshrl.u32 %v5777_v32, 16  ;;  %v480_v40 = vshll.u32 %v5777_v32, 16  ;;  %v3683_v43 = vld [vmem:[#allocation7 + $0x3b8] sm:$0xf0]  ;;  %v5094_v45 = vld [vmem:[#allocation7 + $0x464] sm:$0xf0]  ;;  %v3622_v53 = vor.u32 %v5055_v35, %v3619_v37 }
  0x4f   : > { %924 = vmatpush.bf16.msra.mxu3 %v3706_v11  ;;  %v5037_v49 = vld [vmem:[#allocation7 + $0x2a4] sm:$0xf]  ;;  %v3547_v50 = vld [vmem:[#allocation7 + $0x2a8] sm:$0xf0]  ;;  %v5784_v51 = vld [vmem:[%s5755_s14 + $0x10] sm:$0xff]  ;;  %v3686_v57 = vor.u32 %v5071_v38, %v3683_v43  ;;  %v3770_v3 = vor.u32 %v5094_v45, %v3769_v44  ;;  %s6006_s25 = scalar_lea.vmem [#allocation8], %s3493_s21 }
  0x50   : > { %886 = vmatpush.bf16.msra.mxu0 %v3506_v18  ;;  %v482_v48 = vrot.slane %v480_v40, 1  ;;  %v5053_v54 = vld [vmem:[#allocation7 + $0x324] sm:$0xf]  ;;  %v3611_v55 = vld [vmem:[#allocation7 + $0x328] sm:$0xf0]  ;;  %v3550_v4 = vor.u32 %v5037_v49, %v3547_v50  ;;  %v321_v45 = vld [vmem:[%s5762_s20 + $0x20] sm:$0xff] }
  0x51   : > { %899 = vmatpush.bf16.msra.mxu1 %v3570_v23  ;;  %v5069_v56 = vld [vmem:[#allocation7 + $0x3a4] sm:$0xf]  ;;  %v320_v61 = vld [vmem:[%s5762_s20 + $0x18] sm:$0xff]  ;;  %v5092_v0 = vld [vmem:[#allocation7 + $0x454] sm:$0xf0]  ;;  %v3614_v5 = vor.u32 %v5053_v54, %v3611_v55  ;;  %s5313_s5 = sshll.u32 %s5608_s18, 4 }
  0x52   : > { %912 = vmatpush.bf16.msra.mxu2 %v3634_v24  ;;  %v5788_v58 = vor.u32 %v482_v48, %v478_v39  ;;  %v319_v59 = vld [vmem:[%s5762_s20 + $0x10] sm:$0xff]  ;;  %v5792_v60 = vld [vmem:[%s5755_s14 + $0x18] sm:$0xff]  ;;  %v3761_v63 = vld [vmem:[#allocation7 + $0x450] sm:$0xf]  ;;  %s3306_s23 = scalar_lea.hbm %s6068_s3, %s5313_s5  ;;  %s3308_s24 = sshll.u32 %s6006_s25, 4  ;;  %s3309_s24 = int_to_ptr.vmem [resolvable:$true] %s3308_s24 }
  0x53   : > { %925 = vmatpush.bf16.msra.mxu3 %v3698_v28  ;;  %v3675_v62 = vld [vmem:[#allocation7 + $0x3a8] sm:$0xf0]  ;;  %v5796_v1 = vpack.c.bf16 %v319_v59, %v5784_v51  ;;  %v5799_v2 = vpack.c.bf16 %v320_v61, %v5792_v60  ;;  %v5035_v6 = vld [vmem:[#allocation7 + $0x294] sm:$0xf]  ;;  %v3539_v7 = vld [vmem:[#allocation7 + $0x298] sm:$0xf0]  ;;  %v3762_v21 = vor.u32 %v5092_v0, %v3761_v63 }
  0x54   : > { %887 = vmatpush.bf16.msra.mxu0 %v3498_v36  ;;  %v5051_v8 = vld [vmem:[#allocation7 + $0x314] sm:$0xf]  ;;  %v3603_v9 = vld [vmem:[#allocation7 + $0x318] sm:$0xf0]  ;;  %v3678_v14 = vor.u32 %v5069_v56, %v3675_v62  ;;  %v3542_v22 = vor.u32 %v5035_v6, %v3539_v7  ;;  %v3753_v24 = vld [vmem:[#allocation7 + $0x440] sm:$0xf] }
  0x55   : > { %900 = vmatpush.bf16.msra.mxu1 %v3562_v41  ;;  %v492_v10 = vshrl.u32 %v5796_v1, 16  ;;  %v494_v11 = vshll.u32 %v5796_v1, 16  ;;  %v499_v12 = vshrl.u32 %v5799_v2, 16  ;;  %v501_v13 = vshll.u32 %v5799_v2, 16  ;;  %v5067_v15 = vld [vmem:[#allocation7 + $0x394] sm:$0xf] }
  0x56   : > { %913 = vmatpush.bf16.msra.mxu2 %v3626_v42  ;;  %v3667_v16 = vld [vmem:[#allocation7 + $0x398] sm:$0xf0]  ;;  %v5811_v19 = vld [vmem:[%s5755_s14 + $0x8] sm:$0xff]  ;;  %v3606_v23 = vor.u32 %v5051_v8, %v3603_v9  ;;  %v5033_v27 = vld [vmem:[#allocation7 + $0x284] sm:$0xf]  ;;  %s3310_s27 = sshll.u32 %s3306_s23, 4  ;;  %s3311_s27 = int_to_ptr.hbm [resolvable:$true] %s3310_s27 }
  0x57   : > { %926 = vmatpush.bf16.msra.mxu3 %v3690_v46  ;;  %888 = vmatmul.bf16.vlgmr.msra.gmra.mxu0 %v5788_v58  ;;  %v496_v17 = vrot.slane %v494_v11, 1  ;;  %v503_v18 = vrot.slane %v501_v13, 1  ;;  %v318_v20 = vld [vmem:[%s5762_s20 + $0x8] sm:$0xff]  ;;  %v5090_v25 = vld [vmem:[#allocation7 + $0x444] sm:$0xf0]  ;;  %v3670_v35 = vor.u32 %v5067_v15, %v3667_v16  ;;  %s3288_s28 = scalar_lea.sflag [#allocation4], %s5751_s13 }
  0x58   : > { %936 = vmatpush.bf16.msrb.mxu0 %v3778_v47  ;;  %v3531_v30 = vld [vmem:[#allocation7 + $0x288] sm:$0xf0]  ;;  %v5049_v31 = vld [vmem:[#allocation7 + $0x304] sm:$0xf]  ;;  %v5823_v34 = vpack.c.bf16 %v318_v20, %v5811_v19  ;;  %v5087_v38 = vld [vmem:[#allocation7 + $0x434] sm:$0xf]  ;;  %v3754_v46 = vor.u32 %v5090_v25, %v3753_v24 }
  0x59   : > { %945 = vmatpush.bf16.msrb.mxu1 %v3558_v52  ;;  %v5816_v28 = vor.u32 %v496_v17, %v492_v10  ;;  %v5820_v29 = vor.u32 %v503_v18, %v499_v12  ;;  %v3595_v33 = vld [vmem:[#allocation7 + $0x308] sm:$0xf0]  ;;  %v5065_v36 = vld [vmem:[#allocation7 + $0x384] sm:$0xf]  ;;  %v3747_v41 = vld [vmem:[#allocation7 + $0x438] sm:$0xf0]  ;;  %v3534_v50 = vor.u32 %v5033_v27, %v3531_v30 }
  0x5a   : > { %958 = vmatpush.bf16.msrb.mxu2 %v3622_v53  ;;  %v3659_v37 = vld [vmem:[#allocation7 + $0x388] sm:$0xf0]  ;;  %v485_v42 = vshrl.u32 %v5823_v34, 16  ;;  %v487_v43 = vshll.u32 %v5823_v34, 16  ;;  %v5031_v47 = vld [vmem:[#allocation7 + $0x274] sm:$0xf]  ;;  %v3598_v52 = vor.u32 %v5049_v31, %v3595_v33 }
  0x5b   : > { %971 = vmatpush.bf16.msrb.mxu3 %v3686_v57  ;;  %914 = vmatmul.bf16.vlgmr.msra.gmra.mxu2 %v5816_v28  ;;  %v5830_v44 = vld [vmem:[%s5755_s14 + $0x20] sm:$0xff]  ;;  %v3523_v48 = vld [vmem:[#allocation7 + $0x278] sm:$0xf0]  ;;  %v5047_v54 = vld [vmem:[#allocation7 + $0x2f4] sm:$0xf]  ;;  %v3662_v56 = vor.u32 %v5065_v36, %v3659_v37  ;;  %v3750_v57 = vor.u32 %v5087_v38, %v3747_v41  ;;  %s5508_s29 = sshra.s32 %s3311_s27, 4  ;;  %s5509_s29 = int_to_ptr.hbm [resolvable:$true] %s5508_s29 }
  0x5c   : > { %937 = vmatpush.bf16.msrb.mxu0 %v3770_v3  ;;  %927 = vmatmul.bf16.vlgmr.msra.gmra.mxu3 %v5820_v29  ;;  %v5834_v49 = vpack.c.bf16 %v321_v45, %v5830_v44  ;;  %v489_v53 = vrot.slane %v487_v43, 1  ;;  %v3587_v55 = vld [vmem:[#allocation7 + $0x2f8] sm:$0xf0]  ;;  %v5063_v59 = vld [vmem:[#allocation7 + $0x374] sm:$0xf]  ;;  %v3526_v6 = vor.u32 %v5031_v47, %v3523_v48  ;;  %s5510_s30 = scalar_lea.hbm %s5509_s29, 16  ;;  %p5515_p10 = scmp.lt.s32.totalorder %s5509_s29, %s6068_s3 }
  0x5d   : > { %946 = vmatpush.bf16.msrb.mxu1 %v3550_v4  ;;  %v3651_v61 = vld [vmem:[#allocation7 + $0x378] sm:$0xf0]  ;;  %v5085_v0 = vld [vmem:[#allocation7 + $0x424] sm:$0xf]  ;;  %v3739_v3 = vld [vmem:[#allocation7 + $0x428] sm:$0xf0]  ;;  %v3590_v7 = vor.u32 %v5047_v54, %v3587_v55  ;;  %p5511_p1 = scmp.ne.s32.totalorder %s5509_s29, %s5510_s30 }
  0x5e   : > { %959 = vmatpush.bf16.msrb.mxu2 %v3614_v5  ;;  %v508_v62 = vshll.u32 %v5834_v49, 16  ;;  %v5841_v63 = vor.u32 %v489_v53, %v485_v42  ;;  %v506_v4 = vshrl.u32 %v5834_v49, 16  ;;  %v5029_v8 = vld [vmem:[#allocation7 + $0x264] sm:$0xf]  ;;  %v3515_v9 = vld [vmem:[#allocation7 + $0x268] sm:$0xf0]  ;;  %v3742_v15 = vor.u32 %v5085_v0, %v3739_v3 }
  0x5f   : > { %972 = vmatpush.bf16.msrb.mxu3 %v3678_v14  ;;  %v3654_v14 = vor.u32 %v5063_v59, %v3651_v61  ;;  %v5045_v16 = vld [vmem:[#allocation7 + $0x2e4] sm:$0xf]  ;;  %v3579_v17 = vld [vmem:[#allocation7 + $0x2e8] sm:$0xf0]  ;;  %v3518_v24 = vor.u32 %v5029_v8, %v3515_v9  ;;  %v5027_v27 = vld [vmem:[#allocation7 + $0x254] sm:$0xf]  ;;  %p5512_p3 = pnand %p5511_p1, %p5717_p4 }
  0x60   : > { %938 = vmatpush.bf16.msrb.mxu0 %v3762_v21  ;;  %v510_v5 = vrot.slane %v508_v62, 1  ;;  %v5061_v18 = vld [vmem:[#allocation7 + $0x364] sm:$0xf]  ;;  %901 = vmatmul.bf16.vlgmr.msra.gmra.mxu1 %v5841_v63  ;;  %v3643_v21 = vld [vmem:[#allocation7 + $0x368] sm:$0xf0]  ;;  %v3582_v25 = vor.u32 %v5045_v16, %v3579_v17  ;;  %s5514_s7 = scalar_lea.hbm %s6068_s3, 32 }
  0x61   : > { %947 = vmatpush.bf16.msrb.mxu1 %v3542_v22  ;;  %v5083_v22 = vld [vmem:[#allocation7 + $0x414] sm:$0xf]  ;;  %v3507_v30 = vld [vmem:[#allocation7 + $0x258] sm:$0xf0]  ;;  %v3646_v31 = vor.u32 %v5061_v18, %v3643_v21  ;;  %v5081_v41 = vld [vmem:[#allocation7 + $0x404] sm:$0xf]  ;;  %p5513_p8 = pneg %p5512_p3  ;;  %p5516_p11 = scmp.lt.s32.totalorder %s5514_s7, %s5510_s30 }
  0x62   : > { %960 = vmatpush.bf16.msrb.mxu2 %v3606_v23  ;;  %v5849_v20 = vor.u32 %v510_v5, %v506_v4  ;;  %v3731_v23 = vld [vmem:[#allocation7 + $0x418] sm:$0xf0]  ;;  %v5059_v37 = vld [vmem:[#allocation7 + $0x354] sm:$0xf]  ;;  %v3723_v45 = vld [vmem:[#allocation7 + $0x408] sm:$0xf0] }
  0x63   : > { %973 = vmatpush.bf16.msrb.mxu3 %v3670_v35  ;;  %v3734_v33 = vor.u32 %v5083_v22, %v3731_v23  ;;  %v5043_v35 = vld [vmem:[#allocation7 + $0x2d4] sm:$0xf]  ;;  %v3571_v36 = vld [vmem:[#allocation7 + $0x2d8] sm:$0xf0]  ;;  %v5025_v48 = vld [vmem:[#allocation7 + $0x244] sm:$0xf]  ;;  %v3726_v54 = vor.u32 %v5081_v41, %v3723_v45  ;;  %p5517_p12 = por %p5516_p11, %p5515_p10 }
  0x64   : > { %939 = vmatpush.bf16.msrb.mxu0 %v3754_v46  ;;  %v3635_v38 = vld [vmem:[#allocation7 + $0x358] sm:$0xf0]  ;;  %v3510_v46 = vor.u32 %v5027_v27, %v3507_v30  ;;  %v3574_v47 = vor.u32 %v5043_v35, %v3571_v36  ;;  %v3563_v55 = vld [vmem:[#allocation7 + $0x2c8] sm:$0xf0]  ;;  %v5079_v59 = vld [vmem:[#allocation7 + $0x3f4] sm:$0xf] }
  0x65   : > { %948 = vmatpush.bf16.msrb.mxu1 %v3534_v50  ;;  %v3499_v50 = vld [vmem:[#allocation7 + $0x248] sm:$0xf0]  ;;  %v3638_v53 = vor.u32 %v5059_v37, %v3635_v38  ;;  %v3715_v61 = vld [vmem:[#allocation7 + $0x3f8] sm:$0xf0]  ;;  %v5095_v0 = vld [vmem:[#allocation7 + $0x474] sm:$0xf]  ;;  %p5518_p13 = pnand %p5517_p12, %p5513_p8 }
  0x66   : > { %961 = vmatpush.bf16.msrb.mxu2 %v3598_v52  ;;  %v5041_v52 = vld [vmem:[#allocation7 + $0x2c4] sm:$0xf]  ;;  %v3779_v3 = vld [vmem:[#allocation7 + $0x478] sm:$0xf0]  ;;  %v3843_v5 = vld [vmem:[#allocation7 + $0x70] sm:$0xf]  ;;  %v3718_v16 = vor.u32 %v5079_v59, %v3715_v61 }
  0x67   : > { %974 = vmatpush.bf16.msrb.mxu3 %v3662_v56  ;;  %3783 = vmatmul.msk.bf16.vlgmr.msrb.gmra.mxu0 %vm876_vm0, %v5849_v20  ;;  %v5057_v56 = vld [vmem:[#allocation7 + $0x344] sm:$0xf]  ;;  %v3566_v8 = vor.u32 %v5041_v52, %v3563_v55  ;;  %v3907_v9 = vld [vmem:[#allocation7 + $0xf0] sm:$0xf]  ;;  %v3782_v17 = vor.u32 %v5095_v0, %v3779_v3  ;;  %v3707_v22 = vld [vmem:[#allocation7 + $0x3e8] sm:$0xf0] }
  0x68   : > { %984 = vmatpush.bf16.msra.mxu0 %v3750_v57  ;;  %v3627_v57 = vld [vmem:[#allocation7 + $0x348] sm:$0xf0]  ;;  %v5077_v21 = vld [vmem:[#allocation7 + $0x3e4] sm:$0xf]  ;;  %v3835_v27 = vld [vmem:[#allocation7 + $0x60] sm:$0xf] }
  0x69   : > { %949 = vmatpush.bf16.msrb.mxu1 %v3526_v6  ;;  %v4968_v6 = vld [vmem:[#allocation7 + $0x74] sm:$0xf0]  ;;  %v5093_v23 = vld [vmem:[#allocation7 + $0x464] sm:$0xf]  ;;  %v4966_v30 = vld [vmem:[#allocation7 + $0x64] sm:$0xf0]  ;;  %v3710_v35 = vor.u32 %v5077_v21, %v3707_v22 }
  0x6a   : > { %962 = vmatpush.bf16.msrb.mxu2 %v3590_v7  ;;  %v3502_v7 = vor.u32 %v5025_v48, %v3499_v50  ;;  %v3844_v18 = vor.u32 %v4968_v6, %v3843_v5  ;;  %v3836_v37 = vor.u32 %v4966_v30, %v3835_v27  ;;  %v5075_v38 = vld [vmem:[#allocation7 + $0x3d4] sm:$0xf]  ;;  %v3699_v41 = vld [vmem:[#allocation7 + $0x3d8] sm:$0xf0]  ;;  %v3827_v48 = vld [vmem:[#allocation7 + $0x50] sm:$0xf] }
  0x6b   : > { %975 = vmatpush.bf16.msrb.mxu3 %v3654_v14  ;;  %v4984_v14 = vld [vmem:[#allocation7 + $0xf4] sm:$0xf0]  ;;  %v5091_v45 = vld [vmem:[#allocation7 + $0x454] sm:$0xf]  ;;  %v3891_v52 = vld [vmem:[#allocation7 + $0xd0] sm:$0xf] }
  0x6c   : > { %985 = vmatpush.bf16.msra.mxu0 %v3742_v15  ;;  %v3630_v15 = vor.u32 %v5057_v56, %v3627_v57  ;;  %v4964_v50 = vld [vmem:[#allocation7 + $0x54] sm:$0xf0]  ;;  %v5073_v55 = vld [vmem:[#allocation7 + $0x3c4] sm:$0xf]  ;;  %v3691_v59 = vld [vmem:[#allocation7 + $0x3c8] sm:$0xf0] }
  0x6d   : > { %950 = vmatpush.bf16.msrb.mxu1 %v3518_v24  ;;  %v3908_v24 = vor.u32 %v4984_v14, %v3907_v9  ;;  %v3828_v57 = vor.u32 %v4964_v50, %v3827_v48  ;;  %v5089_v61 = vld [vmem:[#allocation7 + $0x444] sm:$0xf]  ;;  %v3819_v3 = vld [vmem:[#allocation7 + $0x40] sm:$0xf]  ;;  %v4962_v5 = vld [vmem:[#allocation7 + $0x44] sm:$0xf0] }
  0x6e   : > { %963 = vmatpush.bf16.msrb.mxu2 %v3582_v25  ;;  %v3771_v25 = vld [vmem:[#allocation7 + $0x468] sm:$0xf0]  ;;  %v3883_v6 = vld [vmem:[#allocation7 + $0xc0] sm:$0xf]  ;;  %v4035_v9 = vld [vmem:[#allocation7 + $0x1f0] sm:$0xf] }
  0x6f   : > { %976 = vmatpush.bf16.msrb.mxu3 %v3646_v31  ;;  %v3899_v31 = vld [vmem:[#allocation7 + $0xe0] sm:$0xf]  ;;  %v3774_v36 = vor.u32 %v5093_v23, %v3771_v25  ;;  %v5016_v14 = vld [vmem:[#allocation7 + $0x1f4] sm:$0xf0]  ;;  %v3811_v21 = vld [vmem:[#allocation7 + $0x30] sm:$0xf] }
  0x70   : > { %986 = vmatpush.bf16.msra.mxu0 %v3734_v33  ;;  %v4982_v33 = vld [vmem:[#allocation7 + $0xe4] sm:$0xf0]  ;;  %v4960_v22 = vld [vmem:[#allocation7 + $0x34] sm:$0xf0]  ;;  %v3875_v23 = vld [vmem:[#allocation7 + $0xb0] sm:$0xf] }
  0x71   : > { %951 = vmatpush.bf16.msrb.mxu1 %v3510_v46  ;;  %v3900_v46 = vor.u32 %v4982_v33, %v3899_v31  ;;  %v4976_v25 = vld [vmem:[#allocation7 + $0xb4] sm:$0xf0]  ;;  %v3963_v27 = vld [vmem:[#allocation7 + $0x160] sm:$0xf]  ;;  %v4998_v30 = vld [vmem:[#allocation7 + $0x164] sm:$0xf0] }
  0x72   : > { %964 = vmatpush.bf16.msrb.mxu2 %v3574_v47  ;;  %v3763_v47 = vld [vmem:[#allocation7 + $0x458] sm:$0xf0]  ;;  %v4027_v31 = vld [vmem:[#allocation7 + $0x1e0] sm:$0xf]  ;;  %v5014_v33 = vld [vmem:[#allocation7 + $0x1e4] sm:$0xf0] }
  0x73   : > { %977 = vmatpush.bf16.msrb.mxu3 %v3638_v53  ;;  %v4980_v53 = vld [vmem:[#allocation7 + $0xd4] sm:$0xf0]  ;;  %v3766_v56 = vor.u32 %v5091_v45, %v3763_v47  ;;  %v3867_v45 = vld [vmem:[#allocation7 + $0xa0] sm:$0xf]  ;;  %v4974_v47 = vld [vmem:[#allocation7 + $0xa4] sm:$0xf0] }
  0x74   : > { %987 = vmatpush.bf16.msra.mxu0 %v3726_v54  ;;  %v3702_v54 = vor.u32 %v5075_v38, %v3699_v41  ;;  %v3892_v0 = vor.u32 %v4980_v53, %v3891_v52  ;;  %v3803_v38 = vld [vmem:[#allocation7 + $0x20] sm:$0xf]  ;;  %v4958_v41 = vld [vmem:[#allocation7 + $0x24] sm:$0xf0]  ;;  %v3955_v48 = vld [vmem:[#allocation7 + $0x150] sm:$0xf] }
  0x75   : > { %952 = vmatpush.bf16.msrb.mxu1 %v3502_v7  ;;  %v3971_v7 = vld [vmem:[#allocation7 + $0x170] sm:$0xf]  ;;  %v4996_v50 = vld [vmem:[#allocation7 + $0x154] sm:$0xf0] }
  0x76   : > { %965 = vmatpush.bf16.msrb.mxu2 %v3566_v8  ;;  %v5000_v8 = vld [vmem:[#allocation7 + $0x174] sm:$0xf0]  ;;  %v4019_v52 = vld [vmem:[#allocation7 + $0x1d0] sm:$0xf] }
  0x77   : > { %978 = vmatpush.bf16.msrb.mxu3 %v3630_v15  ;;  %v5012_v53 = vld [vmem:[#allocation7 + $0x1d4] sm:$0xf0] }
  0x78   : > { %988 = vmatpush.bf16.msra.mxu0 %v3718_v16  ;;  %953 = vmatmul.bf16.vlgmr.msrb.gmra.mxu1 %v5788_v58  ;;  %v3755_v58 = vld [vmem:[#allocation7 + $0x448] sm:$0xf0]  ;;  %v3820_v16 = vor.u32 %v4962_v5, %v3819_v3  ;;  %v3947_v3 = vld [vmem:[#allocation7 + $0x140] sm:$0xf] }
  0x79   : > { %1001 = vmatpush.bf16.msra.mxu1 %v3782_v17  ;;  %966 = vmatmul.bf16.vlgmr.msrb.gmra.mxu2 %v5841_v63  ;;  %v4978_v63 = vld [vmem:[#allocation7 + $0xc4] sm:$0xf0]  ;;  %v3758_v15 = vor.u32 %v5089_v61, %v3755_v58  ;;  %v3859_v61 = vld [vmem:[#allocation7 + $0x90] sm:$0xf]  ;;  %v4020_v58 = vor.u32 %v5012_v53, %v4019_v52  ;;  %v4011_v5 = vld [vmem:[#allocation7 + $0x1c0] sm:$0xf] }
  0x7a   : > { %1373 = vmatpush.bf16.msra.mxu2 %v3844_v18  ;;  %979 = vmatmul.bf16.vlgmr.msrb.gmra.mxu3 %v5816_v28  ;;  %v3694_v28 = vor.u32 %v5073_v55, %v3691_v59  ;;  %v3884_v17 = vor.u32 %v4978_v63, %v3883_v6  ;;  %v3972_v18 = vor.u32 %v5000_v8, %v3971_v7  ;;  %v4956_v59 = vld [vmem:[#allocation7 + $0x14] sm:$0xf0]  ;;  %v5010_v6 = vld [vmem:[#allocation7 + $0x1c4] sm:$0xf0]  ;;  %v3787_v7 = vld [vmem:[#allocation7] sm:$0xf] }
  0x7b   : > { %1386 = vmatpush.bf16.msra.mxu3 %v3908_v24  ;;  %v4036_v24 = vor.u32 %v5016_v14, %v4035_v9  ;;  %v3868_v55 = vor.u32 %v4974_v47, %v3867_v45  ;;  %v4954_v9 = vld [vmem:[#allocation7 + $0x4] sm:$0xf0]  ;;  %v3851_v14 = vld [vmem:[#allocation7 + $0x80] sm:$0xf]  ;;  %v5861_v45 = vpack.c.bf16 %v5773_v26, %v5773_v26  ;;  %v4965_v52 = vld [vmem:[#allocation7 + $0x64] sm:$0xf] }
  0x7c   : > { %989 = vmatpush.bf16.msra.mxu0 %v3710_v35  ;;  %v3812_v35 = vor.u32 %v4960_v22, %v3811_v21  ;;  %v4003_v21 = vld [vmem:[#allocation7 + $0x1b0] sm:$0xf]  ;;  %v5008_v22 = vld [vmem:[#allocation7 + $0x1b4] sm:$0xf0]  ;;  %v4059_v47 = vld [vmem:[#allocation7 + $0x220] sm:$0xf] }
  0x7d   : > { %1002 = vmatpush.bf16.msra.mxu1 %v3774_v36  ;;  %v3876_v36 = vor.u32 %v4976_v25, %v3875_v23  ;;  %v4067_v23 = vld [vmem:[#allocation7 + $0x230] sm:$0xf]  ;;  %v4967_v25 = vld [vmem:[#allocation7 + $0x74] sm:$0xf]  ;;  %v3837_v53 = vld [vmem:[#allocation7 + $0x68] sm:$0xf0] }
  0x7e   : > { %1374 = vmatpush.bf16.msra.mxu2 %v3836_v37  ;;  %v3964_v37 = vor.u32 %v4998_v30, %v3963_v27  ;;  %v3845_v27 = vld [vmem:[#allocation7 + $0x78] sm:$0xf0]  ;;  %v4988_v26 = vld [vmem:[#allocation7 + $0x114] sm:$0xf0] }
  0x7f   : > { %1387 = vmatpush.bf16.msra.mxu3 %v3900_v46  ;;  %v4028_v46 = vor.u32 %v5014_v33, %v4027_v31  ;;  %v4004_v33 = vor.u32 %v5008_v22, %v4003_v21  ;;  %v4983_v21 = vld [vmem:[#allocation7 + $0xf4] sm:$0xf]  ;;  %v3909_v22 = vld [vmem:[#allocation7 + $0xf8] sm:$0xf0] }
  0x80   : > { %990 = vmatpush.bf16.msra.mxu0 %v3702_v54  ;;  %v3804_v54 = vor.u32 %v4958_v41, %v3803_v38  ;;  %v3995_v38 = vld [vmem:[#allocation7 + $0x1a0] sm:$0xf]  ;;  %v3848_v41 = vor.u32 %v4967_v25, %v3845_v27  ;;  %v5015_v25 = vld [vmem:[#allocation7 + $0x1f4] sm:$0xf]  ;;  %v4037_v27 = vld [vmem:[#allocation7 + $0x1f8] sm:$0xf0] }
  0x81   : > { %1003 = vmatpush.bf16.msra.mxu1 %v3766_v56  ;;  %v3956_v56 = vor.u32 %v4996_v50, %v3955_v48  ;;  %v5022_v48 = vld [vmem:[#allocation7 + $0x224] sm:$0xf0]  ;;  %v5865_v50 = vpack.c.bf16 %v5811_v19, %v5811_v19  ;;  %v5020_v19 = vld [vmem:[#allocation7 + $0x214] sm:$0xf0] }
  0x82   : > { %1375 = vmatpush.bf16.msra.mxu2 %v3828_v57  ;;  %v3795_v57 = vld [vmem:[#allocation7 + $0x10] sm:$0xf] }
  0x83   : > { %1388 = vmatpush.bf16.msra.mxu3 %v3892_v0  ;;  %v4972_v0 = vld [vmem:[#allocation7 + $0x94] sm:$0xf0]  ;;  %v3796_v63 = vor.u32 %v4956_v59, %v3795_v57  ;;  %v3923_v57 = vld [vmem:[#allocation7 + $0x110] sm:$0xf] }
  0x84   : > { %991 = vmatpush.bf16.msra.mxu0 %v3694_v28  ;;  %v3860_v8 = vor.u32 %v4972_v0, %v3859_v61  ;;  %v3987_v59 = vld [vmem:[#allocation7 + $0x190] sm:$0xf]  ;;  %v3840_v61 = vor.u32 %v4965_v52, %v3837_v53  ;;  %v5871_v52 = vpack.c.bf16 %v5784_v51, %v5784_v51  ;;  %v5875_v53 = vpack.c.bf16 %v5792_v60, %v5792_v60 }
  0x85   : > { %1004 = vmatpush.bf16.msra.mxu1 %v3758_v15  ;;  %v4970_v15 = vld [vmem:[#allocation7 + $0x84] sm:$0xf0]  ;;  %v4051_v0 = vld [vmem:[#allocation7 + $0x210] sm:$0xf]  ;;  %v5881_v60 = vpack.c.bf16 %v5830_v44, %v5830_v44  ;;  %v3949_v44 = vld [vmem:[#allocation7 + $0x148] sm:$0xf0] }
  0x86   : > { %1376 = vmatpush.bf16.msra.mxu2 %v3820_v16  ;;  %v4012_v16 = vor.u32 %v5010_v6, %v4011_v5  ;;  %v3852_v30 = vor.u32 %v4970_v15, %v3851_v14  ;;  %v3924_v5 = vor.u32 %v4988_v26, %v3923_v57  ;;  %v3915_v6 = vld [vmem:[#allocation7 + $0x100] sm:$0xf] }
  0x87   : > { %1389 = vmatpush.bf16.msra.mxu3 %v3884_v17  ;;  %992 = vmatmul.bf16.vlgmr.msra.gmra.mxu0 %v5820_v29  ;;  %v4994_v29 = vld [vmem:[#allocation7 + $0x144] sm:$0xf0]  ;;  %v3939_v17 = vld [vmem:[#allocation7 + $0x130] sm:$0xf]  ;;  %v4043_v14 = vld [vmem:[#allocation7 + $0x200] sm:$0xf] }
  0x88   : > { %1399 = vmatpush.bf16.msrb.mxu0 %v3972_v18  ;;  %3784 = vmatmul.msk.bf16.vlgmr.msra.gmra.mxu1 %vm876_vm0, %v5849_v20  ;;  %v3948_v28 = vor.u32 %v4994_v29, %v3947_v3  ;;  %v4992_v18 = vld [vmem:[#allocation7 + $0x134] sm:$0xf0]  ;;  %v4963_v3 = vld [vmem:[#allocation7 + $0x54] sm:$0xf]  ;;  %v3829_v29 = vld [vmem:[#allocation7 + $0x58] sm:$0xf0] }
  0x89   : > { %1412 = vmatpush.bf16.msrb.mxu1 %v4036_v24  ;;  %v5024_v20 = vld [vmem:[#allocation7 + $0x234] sm:$0xf0]  ;;  %v3788_v24 = vor.u32 %v4954_v9, %v3787_v7  ;;  %v3940_v31 = vor.u32 %v4992_v18, %v3939_v17  ;;  %v5002_v9 = vld [vmem:[#allocation7 + $0x184] sm:$0xf0]  ;;  %v3832_v15 = vor.u32 %v4963_v3, %v3829_v29  ;;  %v4961_v17 = vld [vmem:[#allocation7 + $0x44] sm:$0xf] }
  0x8a   : > { %1377 = vmatpush.bf16.msra.mxu2 %v3812_v35  ;;  %v4068_v35 = vor.u32 %v5024_v20, %v4067_v23  ;;  %v3821_v18 = vld [vmem:[#allocation7 + $0x48] sm:$0xf0]  ;;  %v4999_v23 = vld [vmem:[#allocation7 + $0x174] sm:$0xf]  ;;  %v3957_v29 = vld [vmem:[#allocation7 + $0x158] sm:$0xf0] }
  0x8b   : > { %1390 = vmatpush.bf16.msra.mxu3 %v3876_v36  ;;  %v3931_v36 = vld [vmem:[#allocation7 + $0x120] sm:$0xf]  ;;  %v4995_v3 = vld [vmem:[#allocation7 + $0x154] sm:$0xf] }
  0x8c   : > { %1400 = vmatpush.bf16.msrb.mxu0 %v3964_v37  ;;  %v4990_v37 = vld [vmem:[#allocation7 + $0x124] sm:$0xf0] }
  0x8d   : > { %1413 = vmatpush.bf16.msrb.mxu1 %v4028_v46  ;;  %v5006_v46 = vld [vmem:[#allocation7 + $0x1a4] sm:$0xf0] }
  0x8e   : > { %1378 = vmatpush.bf16.msra.mxu2 %v3804_v54  ;;  %v3932_v54 = vor.u32 %v4990_v37, %v3931_v36  ;;  %v4959_v36 = vld [vmem:[#allocation7 + $0x34] sm:$0xf]  ;;  %v3813_v37 = vld [vmem:[#allocation7 + $0x38] sm:$0xf0] }
  0x8f   : > { %1391 = vmatpush.bf16.msra.mxu3 %v3868_v55  ;;  %v3996_v55 = vor.u32 %v5006_v46, %v3995_v38  ;;  %v4981_v46 = vld [vmem:[#allocation7 + $0xe4] sm:$0xf]  ;;  %v3816_v57 = vor.u32 %v4959_v36, %v3813_v37  ;;  %v5007_v36 = vld [vmem:[#allocation7 + $0x1b4] sm:$0xf]  ;;  %v4005_v37 = vld [vmem:[#allocation7 + $0x1b8] sm:$0xf0] }
  0x90   : > { %1401 = vmatpush.bf16.msrb.mxu0 %v3956_v56  ;;  %v4060_v56 = vor.u32 %v5022_v48, %v4059_v47  ;;  %v3901_v47 = vld [vmem:[#allocation7 + $0xe8] sm:$0xf0]  ;;  %v4997_v48 = vld [vmem:[#allocation7 + $0x164] sm:$0xf] }
  0x91   : > { %1414 = vmatpush.bf16.msrb.mxu1 %v4020_v58  ;;  %v5004_v58 = vld [vmem:[#allocation7 + $0x194] sm:$0xf0]  ;;  %v3904_v26 = vor.u32 %v4981_v46, %v3901_v47 }
  0x92   : > { %1379 = vmatpush.bf16.msra.mxu2 %v3796_v63  ;;  %v4986_v63 = vld [vmem:[#allocation7 + $0x104] sm:$0xf0]  ;;  %v3988_v7 = vor.u32 %v5004_v58, %v3987_v59  ;;  %v4957_v59 = vld [vmem:[#allocation7 + $0x24] sm:$0xf] }
  0x93   : > { %1392 = vmatpush.bf16.msra.mxu3 %v3860_v8  ;;  %v4052_v8 = vor.u32 %v5020_v19, %v4051_v0  ;;  %v3916_v20 = vor.u32 %v4986_v63, %v3915_v6  ;;  %v4979_v0 = vld [vmem:[#allocation7 + $0xd4] sm:$0xf]  ;;  %v3893_v19 = vld [vmem:[#allocation7 + $0xd8] sm:$0xf0] }
  0x94   : > { %1402 = vmatpush.bf16.msrb.mxu0 %v3948_v28  ;;  %v3979_v28 = vld [vmem:[#allocation7 + $0x180] sm:$0xf]  ;;  %v4021_v6 = vld [vmem:[#allocation7 + $0x1d8] sm:$0xf0] }
  0x95   : > { %1415 = vmatpush.bf16.msrb.mxu1 %v4012_v16  ;;  %v5018_v16 = vld [vmem:[#allocation7 + $0x204] sm:$0xf0] }
  0x96   : > { %1380 = vmatpush.bf16.msra.mxu2 %v3788_v24  ;;  %v3973_v24 = vld [vmem:[#allocation7 + $0x178] sm:$0xf0] }
  0x97   : > { %1393 = vmatpush.bf16.msra.mxu3 %v3852_v30  ;;  %v3980_v30 = vor.u32 %v5002_v9, %v3979_v28  ;;  %v3976_v38 = vor.u32 %v4999_v23, %v3973_v24  ;;  %v3797_v28 = vld [vmem:[#allocation7 + $0x18] sm:$0xf0]  ;;  %v3960_v9 = vor.u32 %v4995_v3, %v3957_v29  ;;  %v3789_v24 = vld [vmem:[#allocation7 + $0x8] sm:$0xf0] }
  0x98   : > { %1403 = vmatpush.bf16.msrb.mxu0 %v3940_v31  ;;  %v4044_v31 = vor.u32 %v5018_v16, %v4043_v14  ;;  %v3885_v16 = vld [vmem:[#allocation7 + $0xc8] sm:$0xf0] }
  0x99   : > { %1416 = vmatpush.bf16.msrb.mxu1 %v4004_v33  ;;  %1381 = vmatmul.bf16.vlgmr.msra.gmra.mxu2 %v5861_v45  ;;  %v3824_v33 = vor.u32 %v4961_v17, %v3821_v18  ;;  %v4993_v17 = vld [vmem:[#allocation7 + $0x144] sm:$0xf] }
  0x9a   : > { %1429 = vmatpush.bf16.msrb.mxu2 %v4068_v35  ;;  %1394 = vmatmul.bf16.vlgmr.msra.gmra.mxu3 %v5865_v50  ;;  %v3912_v35 = vor.u32 %v4983_v21, %v3909_v22  ;;  %v5009_v18 = vld [vmem:[#allocation7 + $0x1c4] sm:$0xf]  ;;  %v4013_v21 = vld [vmem:[#allocation7 + $0x1c8] sm:$0xf0] }
  0x9b   : > { %1438 = vmatpush.bf16.msrb.mxu3 %v3848_v41  ;;  %v4040_v41 = vor.u32 %v5015_v25, %v4037_v27  ;;  %v3952_v25 = vor.u32 %v4993_v17, %v3949_v44  ;;  %v4016_v27 = vor.u32 %v5009_v18, %v4013_v21  ;;  %v4969_v17 = vld [vmem:[#allocation7 + $0x84] sm:$0xf]  ;;  %v3853_v44 = vld [vmem:[#allocation7 + $0x88] sm:$0xf0] }
  0x9c   : > { %1404 = vmatpush.bf16.msrb.mxu0 %v3932_v54  ;;  %v3965_v54 = vld [vmem:[#allocation7 + $0x168] sm:$0xf0] }
  0x9d   : > { %1417 = vmatpush.bf16.msrb.mxu1 %v3996_v55  ;;  %v5013_v55 = vld [vmem:[#allocation7 + $0x1e4] sm:$0xf]  ;;  %v3968_v58 = vor.u32 %v4997_v48, %v3965_v54  ;;  %v4008_v54 = vor.u32 %v5007_v36, %v4005_v37  ;;  %v5128_v36 = vld [vmem:[#allocation7 + $0x574] sm:$0xf0]  ;;  %v4261_v37 = vld [vmem:[#allocation7 + $0x5f0] sm:$0xf] }
  0x9e   : > { %1430 = vmatpush.bf16.msrb.mxu2 %v4060_v56  ;;  %v4029_v56 = vld [vmem:[#allocation7 + $0x1e8] sm:$0xf0] }
  0x9f   : > { %1439 = vmatpush.bf16.msrb.mxu3 %v3840_v61  ;;  %v3805_v61 = vld [vmem:[#allocation7 + $0x28] sm:$0xf0]  ;;  %v4032_v51 = vor.u32 %v5013_v55, %v4029_v56  ;;  %v4973_v55 = vld [vmem:[#allocation7 + $0xa4] sm:$0xf] }
  0xa0   : > { %1405 = vmatpush.bf16.msrb.mxu0 %v3924_v5  ;;  %v5011_v5 = vld [vmem:[#allocation7 + $0x1d4] sm:$0xf]  ;;  %v3808_v63 = vor.u32 %v4957_v59, %v3805_v61  ;;  %v3869_v56 = vld [vmem:[#allocation7 + $0xa8] sm:$0xf0]  ;;  %v5005_v61 = vld [vmem:[#allocation7 + $0x1a4] sm:$0xf] }
  0xa1   : > { %1418 = vmatpush.bf16.msrb.mxu1 %v3988_v7  ;;  %v3896_v7 = vor.u32 %v4979_v0, %v3893_v19  ;;  %v4024_v14 = vor.u32 %v5011_v5, %v4021_v6  ;;  %v3933_v59 = vld [vmem:[#allocation7 + $0x128] sm:$0xf0]  ;;  %v3872_v19 = vor.u32 %v4973_v55, %v3869_v56  ;;  %v4971_v5 = vld [vmem:[#allocation7 + $0x94] sm:$0xf]  ;;  %v3861_v6 = vld [vmem:[#allocation7 + $0x98] sm:$0xf0] }
  0xa2   : > { %1431 = vmatpush.bf16.msrb.mxu2 %v4052_v8  ;;  %v4955_v8 = vld [vmem:[#allocation7 + $0x14] sm:$0xf]  ;;  %v4061_v0 = vld [vmem:[#allocation7 + $0x228] sm:$0xf0] }
  0xa3   : > { %1440 = vmatpush.bf16.msrb.mxu3 %v3832_v15  ;;  %v4977_v15 = vld [vmem:[#allocation7 + $0xc4] sm:$0xf]  ;;  %v3800_v22 = vor.u32 %v4955_v8, %v3797_v28  ;;  %v3925_v8 = vld [vmem:[#allocation7 + $0x118] sm:$0xf0]  ;;  %v5003_v28 = vld [vmem:[#allocation7 + $0x194] sm:$0xf] }
  0xa4   : > { %1406 = vmatpush.bf16.msrb.mxu0 %v3916_v20  ;;  %v3888_v23 = vor.u32 %v4977_v15, %v3885_v16  ;;  %v4953_v20 = vld [vmem:[#allocation7 + $0x4] sm:$0xf]  ;;  %v4053_v15 = vld [vmem:[#allocation7 + $0x218] sm:$0xf0]  ;;  %v3864_v16 = vor.u32 %v4971_v5, %v3861_v6 }
  0xa5   : > { %1419 = vmatpush.bf16.msrb.mxu1 %v3980_v30  ;;  %v4975_v30 = vld [vmem:[#allocation7 + $0xb4] sm:$0xf]  ;;  %v3792_v46 = vor.u32 %v4953_v20, %v3789_v24  ;;  %v5001_v20 = vld [vmem:[#allocation7 + $0x184] sm:$0xf] }
  0xa6   : > { %1432 = vmatpush.bf16.msrb.mxu2 %v4044_v31  ;;  %v3877_v31 = vld [vmem:[#allocation7 + $0xb8] sm:$0xf0] }
  0xa7   : > { %1441 = vmatpush.bf16.msrb.mxu3 %v3824_v33  ;;  %1407 = vmatmul.bf16.vlgmr.msrb.gmra.mxu0 %v5871_v52  ;;  %v4991_v33 = vld [vmem:[#allocation7 + $0x134] sm:$0xf]  ;;  %v3880_v47 = vor.u32 %v4975_v30, %v3877_v31  ;;  %v4045_v30 = vld [vmem:[#allocation7 + $0x208] sm:$0xf0]  ;;  %v4133_v31 = vld [vmem:[#allocation7 + $0x4f0] sm:$0xf] }
  0xa8   : > { %1451 = vmatpush.bf16.msra.mxu0 %v3912_v35  ;;  %1420 = vmatmul.bf16.vlgmr.msrb.gmra.mxu1 %v5875_v53  ;;  %v3941_v35 = vld [vmem:[#allocation7 + $0x138] sm:$0xf0] }
  0xa9   : > { %1464 = vmatpush.bf16.msra.mxu1 %v3976_v38  ;;  %4073 = vmatmul.msk.bf16.vlgmr.msrb.gmra.mxu2 %vm876_vm0, %v5881_v60  ;;  %v5023_v38 = vld [vmem:[#allocation7 + $0x234] sm:$0xf]  ;;  %v3944_v48 = vor.u32 %v4991_v33, %v3941_v35  ;;  %v4197_v33 = vld [vmem:[#allocation7 + $0x570] sm:$0xf]  ;;  %v3856_v35 = vor.u32 %v4969_v17, %v3853_v44  ;;  %v5156_v44 = vld [vmem:[#allocation7 + $0x654] sm:$0xf0] }
  0xaa   : > { %1477 = vmatpush.bf16.msra.mxu2 %v4040_v41  ;;  %v4069_v41 = vld [vmem:[#allocation7 + $0x238] sm:$0xf0]  ;;  %v4198_v56 = vor.u32 %v5128_v36, %v4197_v33  ;;  %v4309_v17 = vld [vmem:[#allocation7 + $0x650] sm:$0xf]  ;;  %v5104_v36 = vld [vmem:[#allocation7 + $0x4b4] sm:$0xf0] }
  0xab   : > { %1442 = vmatpush.bf16.msrb.mxu3 %v3816_v57  ;;  %v4989_v57 = vld [vmem:[#allocation7 + $0x124] sm:$0xf] }
  0xac   : > { %1452 = vmatpush.bf16.msra.mxu0 %v3904_v26  ;;  %v4072_v26 = vor.u32 %v5023_v38, %v4069_v41  ;;  %v3936_v3 = vor.u32 %v4989_v57, %v3933_v59  ;;  %v5144_v38 = vld [vmem:[#allocation7 + $0x5f4] sm:$0xf0]  ;;  %v5110_v59 = vld [vmem:[#allocation7 + $0x4e4] sm:$0xf0] }
  0xad   : > { %1465 = vmatpush.bf16.msra.mxu1 %v3968_v58  ;;  %v3997_v58 = vld [vmem:[#allocation7 + $0x1a8] sm:$0xf0]  ;;  %v4262_v57 = vor.u32 %v5144_v38, %v4261_v37  ;;  %v4165_v37 = vld [vmem:[#allocation7 + $0x530] sm:$0xf] }
  0xae   : > { %1478 = vmatpush.bf16.msra.mxu2 %v4032_v51  ;;  %v5021_v51 = vld [vmem:[#allocation7 + $0x224] sm:$0xf]  ;;  %v4000_v29 = vor.u32 %v5005_v61, %v3997_v58  ;;  %v4189_v61 = vld [vmem:[#allocation7 + $0x560] sm:$0xf] }
  0xaf   : > { %1443 = vmatpush.bf16.msrb.mxu3 %v3808_v63  ;;  %v4987_v63 = vld [vmem:[#allocation7 + $0x114] sm:$0xf] }
  0xb0   : > { %1453 = vmatpush.bf16.msra.mxu0 %v3896_v7  ;;  %v4064_v7 = vor.u32 %v5021_v51, %v4061_v0  ;;  %v3928_v18 = vor.u32 %v4987_v63, %v3925_v8  ;;  %v5126_v51 = vld [vmem:[#allocation7 + $0x564] sm:$0xf0]  ;;  %v4253_v0 = vld [vmem:[#allocation7 + $0x5e0] sm:$0xf]  ;;  %v5108_v8 = vld [vmem:[#allocation7 + $0x4d4] sm:$0xf0] }
  0xb1   : > { %1466 = vmatpush.bf16.msra.mxu1 %v3960_v9  ;;  %v3989_v9 = vld [vmem:[#allocation7 + $0x198] sm:$0xf0]  ;;  %v4190_v6 = vor.u32 %v5126_v51, %v4189_v61  ;;  %v4221_v51 = vld [vmem:[#allocation7 + $0x5a0] sm:$0xf] }
  0xb2   : > { %1479 = vmatpush.bf16.msra.mxu2 %v4024_v14  ;;  %v5019_v14 = vld [vmem:[#allocation7 + $0x214] sm:$0xf]  ;;  %v3992_v21 = vor.u32 %v5003_v28, %v3989_v9  ;;  %v4181_v28 = vld [vmem:[#allocation7 + $0x550] sm:$0xf] }
  0xb3   : > { %1444 = vmatpush.bf16.msrb.mxu3 %v3800_v22  ;;  %v4985_v22 = vld [vmem:[#allocation7 + $0x104] sm:$0xf]  ;;  %v4056_v24 = vor.u32 %v5019_v14, %v4053_v15  ;;  %v5124_v14 = vld [vmem:[#allocation7 + $0x554] sm:$0xf0]  ;;  %v4245_v15 = vld [vmem:[#allocation7 + $0x5d0] sm:$0xf] }
  0xb4   : > { %1454 = vmatpush.bf16.msra.mxu0 %v3888_v23  ;;  %v3917_v23 = vld [vmem:[#allocation7 + $0x108] sm:$0xf0] }
  0xb5   : > { %1467 = vmatpush.bf16.msra.mxu1 %v3952_v25  ;;  %v3981_v25 = vld [vmem:[#allocation7 + $0x188] sm:$0xf0]  ;;  %v3920_v41 = vor.u32 %v4985_v22, %v3917_v23  ;;  %v4109_v23 = vld [vmem:[#allocation7 + $0x4c0] sm:$0xf] }
  0xb6   : > { %1480 = vmatpush.bf16.msra.mxu2 %v4016_v27  ;;  %v5017_v27 = vld [vmem:[#allocation7 + $0x204] sm:$0xf] }
  0xb7   : > { %1445 = vmatpush.bf16.msrb.mxu3 %v3792_v46  ;;  %v3984_v46 = vor.u32 %v5001_v20, %v3981_v25  ;;  %v5106_v20 = vld [vmem:[#allocation7 + $0x4c4] sm:$0xf0] }
  0xb8   : > { %1455 = vmatpush.bf16.msra.mxu0 %v3880_v47  ;;  %v4325_v47 = vld [vmem:[#allocation7 + $0x670] sm:$0xf]  ;;  %v5122_v25 = vld [vmem:[#allocation7 + $0x544] sm:$0xf0] }
  0xb9   : > { %1468 = vmatpush.bf16.msra.mxu1 %v3944_v48  ;;  %v5160_v48 = vld [vmem:[#allocation7 + $0x674] sm:$0xf0] }
  0xba   : > { %1481 = vmatpush.bf16.msra.mxu2 %v4008_v54  ;;  %1446 = vmatmul.bf16.vlgmr.msrb.gmra.mxu3 %v5861_v45  ;;  %v5112_v45 = vld [vmem:[#allocation7 + $0x4f4] sm:$0xf0]  ;;  %v4048_v54 = vor.u32 %v5017_v27, %v4045_v30  ;;  %v4326_v58 = vor.u32 %v5160_v48, %v4325_v47  ;;  %v4237_v27 = vld [vmem:[#allocation7 + $0x5c0] sm:$0xf]  ;;  %v5138_v30 = vld [vmem:[#allocation7 + $0x5c4] sm:$0xf0] }
  0xbb   : > { %1494 = vmatpush.bf16.msra.mxu3 %v4072_v26  ;;  %v4134_v55 = vor.u32 %v5112_v45, %v4133_v31  ;;  %v4125_v26 = vld [vmem:[#allocation7 + $0x4e0] sm:$0xf]  ;;  %v4110_v31 = vor.u32 %v5106_v20, %v4109_v23  ;;  %v4238_v33 = vor.u32 %v5138_v30, %v4237_v27  ;;  %v5136_v47 = vld [vmem:[#allocation7 + $0x5b4] sm:$0xf0]  ;;  %v4293_v48 = vld [vmem:[#allocation7 + $0x630] sm:$0xf] }
  0xbc   : > { %1456 = vmatpush.bf16.msra.mxu0 %v3872_v19  ;;  %v5142_v19 = vld [vmem:[#allocation7 + $0x5e4] sm:$0xf0]  ;;  %v4126_v5 = vor.u32 %v5110_v59, %v4125_v26  ;;  %v4157_v59 = vld [vmem:[#allocation7 + $0x520] sm:$0xf] }
  0xbd   : > { %1469 = vmatpush.bf16.msra.mxu1 %v3936_v3  ;;  %v4317_v3 = vld [vmem:[#allocation7 + $0x660] sm:$0xf]  ;;  %v4254_v63 = vor.u32 %v5142_v19, %v4253_v0  ;;  %v5102_v26 = vld [vmem:[#allocation7 + $0x4a4] sm:$0xf0] }
  0xbe   : > { %1482 = vmatpush.bf16.msra.mxu2 %v4000_v29  ;;  %v5158_v29 = vld [vmem:[#allocation7 + $0x664] sm:$0xf0]  ;;  %v4285_v19 = vld [vmem:[#allocation7 + $0x620] sm:$0xf] }
  0xbf   : > { %1495 = vmatpush.bf16.msra.mxu3 %v4064_v7  ;;  %v4117_v7 = vld [vmem:[#allocation7 + $0x4d0] sm:$0xf]  ;;  %v4318_v9 = vor.u32 %v5158_v29, %v4317_v3  ;;  %v5134_v0 = vld [vmem:[#allocation7 + $0x5a4] sm:$0xf0]  ;;  %v4141_v20 = vld [vmem:[#allocation7 + $0x500] sm:$0xf] }
  0xc0   : > { %1457 = vmatpush.bf16.msra.mxu0 %v3864_v16  ;;  %v5140_v16 = vld [vmem:[#allocation7 + $0x5d4] sm:$0xf0]  ;;  %v5150_v3 = vld [vmem:[#allocation7 + $0x624] sm:$0xf0]  ;;  %v4269_v30 = vld [vmem:[#allocation7 + $0x600] sm:$0xf] }
  0xc1   : > { %1470 = vmatpush.bf16.msra.mxu1 %v3928_v18  ;;  %v4118_v18 = vor.u32 %v5108_v8, %v4117_v7  ;;  %v4246_v22 = vor.u32 %v5140_v16, %v4245_v15  ;;  %v5100_v7 = vld [vmem:[#allocation7 + $0x494] sm:$0xf0]  ;;  %v4149_v8 = vld [vmem:[#allocation7 + $0x510] sm:$0xf]  ;;  %v5130_v27 = vld [vmem:[#allocation7 + $0x584] sm:$0xf0] }
  0xc2   : > { %1483 = vmatpush.bf16.msra.mxu2 %v3992_v21  ;;  %v4182_v21 = vor.u32 %v5124_v14, %v4181_v28  ;;  %v4286_v28 = vor.u32 %v5150_v3, %v4285_v19  ;;  %v4213_v14 = vld [vmem:[#allocation7 + $0x590] sm:$0xf]  ;;  %v5132_v15 = vld [vmem:[#allocation7 + $0x594] sm:$0xf0]  ;;  %v4191_v19 = vld [vmem:[#allocation7 + $0x568] sm:$0xf0] }
  0xc3   : > { %1496 = vmatpush.bf16.msra.mxu3 %v4056_v24  ;;  %v4173_v24 = vld [vmem:[#allocation7 + $0x540] sm:$0xf]  ;;  %v4277_v16 = vld [vmem:[#allocation7 + $0x610] sm:$0xf]  ;;  %v4214_v23 = vor.u32 %v5132_v15, %v4213_v14  ;;  %v5141_v3 = vld [vmem:[#allocation7 + $0x5e4] sm:$0xf] }
  0xc4   : > { %1458 = vmatpush.bf16.msra.mxu0 %v3856_v35  ;;  %v4174_v45 = vor.u32 %v5122_v25, %v4173_v24  ;;  %v4101_v35 = vld [vmem:[#allocation7 + $0x4b0] sm:$0xf]  ;;  %v5114_v24 = vld [vmem:[#allocation7 + $0x504] sm:$0xf0]  ;;  %v5164_v15 = vld [vmem:[#allocation7 + $0x694] sm:$0xf0] }
  0xc5   : > { %1471 = vmatpush.bf16.msra.mxu1 %v3920_v41  ;;  %v5120_v41 = vld [vmem:[#allocation7 + $0x534] sm:$0xf0]  ;;  %v4341_v14 = vld [vmem:[#allocation7 + $0x690] sm:$0xf] }
  0xc6   : > { %1484 = vmatpush.bf16.msra.mxu2 %v3984_v46  ;;  %v4229_v46 = vld [vmem:[#allocation7 + $0x5b0] sm:$0xf] }
  0xc7   : > { %1497 = vmatpush.bf16.msra.mxu3 %v4048_v54  ;;  %1459 = vmatmul.bf16.vlgmr.msra.gmra.mxu0 %v5865_v50  ;;  %v4310_v50 = vor.u32 %v5156_v44, %v4309_v17  ;;  %v5152_v54 = vld [vmem:[#allocation7 + $0x634] sm:$0xf0] }
  0xc8   : > { %1953 = vmatpush.bf16.msrb.mxu0 %v4134_v55  ;;  %1472 = vmatmul.bf16.vlgmr.msra.gmra.mxu1 %v5871_v52  ;;  %v4301_v52 = vld [vmem:[#allocation7 + $0x640] sm:$0xf]  ;;  %v4166_v55 = vor.u32 %v5120_v41, %v4165_v37  ;;  %v4294_v61 = vor.u32 %v5152_v54, %v4293_v48  ;;  %v5148_v17 = vld [vmem:[#allocation7 + $0x614] sm:$0xf0]  ;;  %v5127_v37 = vld [vmem:[#allocation7 + $0x574] sm:$0xf]  ;;  %v4142_v41 = vor.u32 %v5114_v24, %v4141_v20 }
  0xc9   : > { %1966 = vmatpush.bf16.msrb.mxu1 %v4198_v56  ;;  %1485 = vmatmul.bf16.vlgmr.msra.gmra.mxu2 %v5875_v53  ;;  %v5154_v53 = vld [vmem:[#allocation7 + $0x644] sm:$0xf0]  ;;  %v4230_v56 = vor.u32 %v5136_v47, %v4229_v46  ;;  %v4278_v25 = vor.u32 %v5148_v17, %v4277_v16  ;;  %v5143_v47 = vld [vmem:[#allocation7 + $0x5f4] sm:$0xf]  ;;  %v4263_v48 = vld [vmem:[#allocation7 + $0x5f8] sm:$0xf0]  ;;  %v4342_v20 = vor.u32 %v5164_v15, %v4341_v14 }
  0xca   : > { %1979 = vmatpush.bf16.msrb.mxu2 %v4262_v57  ;;  %4074 = vmatmul.msk.bf16.vlgmr.msra.gmra.mxu3 %vm876_vm0, %v5881_v60  ;;  %v4302_v38 = vor.u32 %v5154_v53, %v4301_v52  ;;  %v4102_v60 = vor.u32 %v5104_v36, %v4101_v35  ;;  %v4093_v57 = vld [vmem:[#allocation7 + $0x4a0] sm:$0xf]  ;;  %v5146_v52 = vld [vmem:[#allocation7 + $0x604] sm:$0xf0]  ;;  %v4135_v36 = vld [vmem:[#allocation7 + $0x4f8] sm:$0xf0] }
  0xcb   : > { %1992 = vmatpush.bf16.msrb.mxu3 %v4326_v58  ;;  %v5118_v58 = vld [vmem:[#allocation7 + $0x524] sm:$0xf0]  ;;  %v4094_v29 = vor.u32 %v5102_v26, %v4093_v57  ;;  %v4270_v54 = vor.u32 %v5146_v52, %v4269_v30  ;;  %v4349_v26 = vld [vmem:[#allocation7 + $0x6a0] sm:$0xf]  ;;  %v5107_v16 = vld [vmem:[#allocation7 + $0x4d4] sm:$0xf] }
  0xcc   : > { %1954 = vmatpush.bf16.msrb.mxu0 %v4126_v5  ;;  %v4158_v5 = vor.u32 %v5118_v58, %v4157_v59  ;;  %v5166_v59 = vld [vmem:[#allocation7 + $0x6a4] sm:$0xf0]  ;;  %v4266_v58 = vor.u32 %v5143_v47, %v4263_v48  ;;  %v5159_v47 = vld [vmem:[#allocation7 + $0x674] sm:$0xf]  ;;  %v4327_v48 = vld [vmem:[#allocation7 + $0x678] sm:$0xf0] }
  0xcd   : > { %1967 = vmatpush.bf16.msrb.mxu1 %v4190_v6  ;;  %v4222_v6 = vor.u32 %v5134_v0, %v4221_v51  ;;  %v4127_v51 = vld [vmem:[#allocation7 + $0x4e8] sm:$0xf0]  ;;  %v5125_v0 = vld [vmem:[#allocation7 + $0x564] sm:$0xf]  ;;  %v5162_v52 = vld [vmem:[#allocation7 + $0x684] sm:$0xf0] }
  0xce   : > { %1980 = vmatpush.bf16.msrb.mxu2 %v4254_v63  ;;  %v4085_v63 = vld [vmem:[#allocation7 + $0x490] sm:$0xf] }
  0xcf   : > { %1993 = vmatpush.bf16.msrb.mxu3 %v4318_v9  ;;  %v5116_v9 = vld [vmem:[#allocation7 + $0x514] sm:$0xf0]  ;;  %v4086_v44 = vor.u32 %v5100_v7, %v4085_v63  ;;  %v4350_v63 = vor.u32 %v5166_v59, %v4349_v26  ;;  %v1582_v7 = vrot.slane %v5823_v34, 1  ;;  %v5103_v26 = vld [vmem:[#allocation7 + $0x4b4] sm:$0xf] }
  0xd0   : > { %1955 = vmatpush.bf16.msrb.mxu0 %v4118_v18  ;;  %v4077_v18 = vld [vmem:[#allocation7 + $0x480] sm:$0xf]  ;;  %v4103_v59 = vld [vmem:[#allocation7 + $0x4b8] sm:$0xf0] }
  0xd1   : > { %1968 = vmatpush.bf16.msrb.mxu1 %v4182_v21  ;;  %v5098_v21 = vld [vmem:[#allocation7 + $0x484] sm:$0xf0]  ;;  %v4106_v15 = vor.u32 %v5103_v26, %v4103_v59  ;;  %v4079_v26 = vld [vmem:[#allocation7 + $0x488] sm:$0xf0]  ;;  %v5113_v59 = vld [vmem:[#allocation7 + $0x504] sm:$0xf] }
  0xd2   : > { %1981 = vmatpush.bf16.msrb.mxu2 %v4246_v22  ;;  %v4150_v22 = vor.u32 %v5116_v9, %v4149_v8  ;;  %v4078_v35 = vor.u32 %v5098_v21, %v4077_v18  ;;  %v5123_v18 = vld [vmem:[#allocation7 + $0x554] sm:$0xf]  ;;  %v4183_v21 = vld [vmem:[#allocation7 + $0x558] sm:$0xf0] }
  0xd3   : > { %1994 = vmatpush.bf16.msrb.mxu3 %v4310_v50  ;;  %v4205_v50 = vld [vmem:[#allocation7 + $0x580] sm:$0xf]  ;;  %v4186_v30 = vor.u32 %v5123_v18, %v4183_v21  ;;  %v4095_v18 = vld [vmem:[#allocation7 + $0x4a8] sm:$0xf0] }
  0xd4   : > { %1956 = vmatpush.bf16.msrb.mxu0 %v4110_v31  ;;  %v5891_v53 = vpop.f32.mrf.mxu0  ;;  %v4357_v31 = vld [vmem:[#allocation7 + $0x6b0] sm:$0xf]  ;;  %v4206_v46 = vor.u32 %v5130_v27, %v4205_v50  ;;  %v4333_v50 = vld [vmem:[#allocation7 + $0x680] sm:$0xf] }
  0xd5   : > { %1969 = vmatpush.bf16.msrb.mxu1 %v4174_v45  ;;  %v5168_v45 = vld [vmem:[#allocation7 + $0x6b4] sm:$0xf0] }
  0xd6   : > { %1982 = vmatpush.bf16.msrb.mxu2 %v4238_v33  ;;  %v5111_v33 = vld [vmem:[#allocation7 + $0x4f4] sm:$0xf] }
  0xd7   : > { %1995 = vmatpush.bf16.msrb.mxu3 %v4302_v38  ;;  %v4199_v38 = vld [vmem:[#allocation7 + $0x578] sm:$0xf0] }
  0xd8   : > { %1957 = vmatpush.bf16.msrb.mxu0 %v4102_v60  ;;  %v4358_v60 = vor.u32 %v5168_v45, %v4357_v31  ;;  %v4202_v57 = vor.u32 %v5127_v37, %v4199_v38  ;;  %v5105_v31 = vld [vmem:[#allocation7 + $0x4c4] sm:$0xf]  ;;  %v4111_v45 = vld [vmem:[#allocation7 + $0x4c8] sm:$0xf0] }
  0xd9   : > { %1970 = vmatpush.bf16.msrb.mxu1 %v4166_v55  ;;  %v1581_v55 = vrot.slane %v5777_v32, 1  ;;  %v4175_v37 = vld [vmem:[#allocation7 + $0x548] sm:$0xf0]  ;;  %v5137_v38 = vld [vmem:[#allocation7 + $0x5c4] sm:$0xf] }
  0xda   : > { %1983 = vmatpush.bf16.msrb.mxu2 %v4230_v56  ;;  %v4138_v56 = vor.u32 %v5111_v33, %v4135_v36  ;;  %v5121_v36 = vld [vmem:[#allocation7 + $0x544] sm:$0xf] }
  0xdb   : > { %1996 = vmatpush.bf16.msrb.mxu3 %v4294_v61  ;;  %v5109_v61 = vld [vmem:[#allocation7 + $0x4e4] sm:$0xf] }
  0xdc   : > { %1958 = vmatpush.bf16.msrb.mxu0 %v4094_v29  ;;  %v4255_v29 = vld [vmem:[#allocation7 + $0x5e8] sm:$0xf0]  ;;  %v4130_v8 = vor.u32 %v5109_v61, %v4127_v51  ;;  %v891_v9 = vpop.f32.mrf.mxu0 }
  0xdd   : > { %1971 = vmatpush.bf16.msrb.mxu1 %v4158_v5  ;;  %v1583_v5 = vrot.slane %v5796_v1, 1  ;;  %v4258_v17 = vor.u32 %v5141_v3, %v4255_v29  ;;  %v5135_v3 = vld [vmem:[#allocation7 + $0x5b4] sm:$0xf]  ;;  %v4231_v29 = vld [vmem:[#allocation7 + $0x5b8] sm:$0xf0] }
  0xde   : > { %1984 = vmatpush.bf16.msrb.mxu2 %v4222_v6  ;;  %v1584_v6 = vrot.slane %v5799_v2, 1  ;;  %v915_v24 = vpop.f32.mrf.mxu2  ;;  %v4234_v21 = vor.u32 %v5135_v3, %v4231_v29  ;;  %v4295_v29 = vld [vmem:[#allocation7 + $0x638] sm:$0xf0] }
  0xdf   : > { %1997 = vmatpush.bf16.msrb.mxu3 %v4286_v28  ;;  %v4194_v28 = vor.u32 %v5125_v0, %v4191_v19  ;;  %v5119_v0 = vld [vmem:[#allocation7 + $0x534] sm:$0xf]  ;;  %v4167_v19 = vld [vmem:[#allocation7 + $0x538] sm:$0xf0] }
  0xe0   : > { %1959 = vmatpush.bf16.msrb.mxu0 %v4086_v44  ;;  %v4119_v44 = vld [vmem:[#allocation7 + $0x4d8] sm:$0xf0] }
  0xe1   : > { %1972 = vmatpush.bf16.msrb.mxu1 %v4150_v22  ;;  %v5139_v22 = vld [vmem:[#allocation7 + $0x5d4] sm:$0xf]  ;;  %v4122_v27 = vor.u32 %v5107_v16, %v4119_v44  ;;  %v4170_v16 = vor.u32 %v5119_v0, %v4167_v19  ;;  %v5101_v44 = vld [vmem:[#allocation7 + $0x4a4] sm:$0xf]  ;;  %v4207_v19 = vld [vmem:[#allocation7 + $0x588] sm:$0xf0] }
  0xe2   : > { %1985 = vmatpush.bf16.msrb.mxu2 %v4214_v23  ;;  %v4247_v23 = vld [vmem:[#allocation7 + $0x5d8] sm:$0xf0]  ;;  %v5129_v0 = vld [vmem:[#allocation7 + $0x584] sm:$0xf] }
  0xe3   : > { %1998 = vmatpush.bf16.msrb.mxu3 %v4278_v25  ;;  %v928_v25 = vpop.f32.mrf.mxu3  ;;  %v4250_v33 = vor.u32 %v5139_v22, %v4247_v23 }
  0xe4   : > { %1960 = vmatpush.bf16.msrb.mxu0 %v4078_v35  ;;  %v902_v35 = vpop.f32.mrf.mxu1  ;;  %v941_v51 = vpop.f32.mrf.mxu0 }
  0xe5   : > { %1973 = vmatpush.bf16.msrb.mxu1 %v4142_v41  ;;  %v903_v41 = vadd.f32 %v902_v35, %v5891_v53 }
  0xe6   : > { %1986 = vmatpush.bf16.msrb.mxu2 %v4206_v46  ;;  %v4239_v46 = vld [vmem:[#allocation7 + $0x5c8] sm:$0xf0] }
  0xe7   : > { %1999 = vmatpush.bf16.msrb.mxu3 %v4270_v54  ;;  %1961 = vmatmul.bf16.vlgmr.msrb.gmra.mxu0 %v1581_v55  ;;  %v4334_v54 = vor.u32 %v5162_v52, %v4333_v50  ;;  %v4242_v61 = vor.u32 %v5137_v38, %v4239_v46  ;;  %v5133_v50 = vld [vmem:[#allocation7 + $0x5a4] sm:$0xf]  ;;  %v4098_v52 = vor.u32 %v5101_v44, %v4095_v18  ;;  %v4151_v38 = vld [vmem:[#allocation7 + $0x518] sm:$0xf0]  ;;  %v4487_v44 = vld [vmem:[#allocation7 + $0x7b0] sm:$0xf] }
  0xe8   : > { %2009 = vmatpush.bf16.msra.mxu0 %v4358_v60  ;;  %1974 = vmatmul.bf16.vlgmr.msrb.gmra.mxu1 %v1582_v7  ;;  %v916_v60 = vadd.f32 %v915_v24, %v903_v41  ;;  %v4159_v24 = vld [vmem:[#allocation7 + $0x528] sm:$0xf0]  ;;  %v5131_v41 = vld [vmem:[#allocation7 + $0x594] sm:$0xf]  ;;  %v5200_v18 = vld [vmem:[#allocation7 + $0x7b4] sm:$0xf0] }
  0xe9   : > { %2018 = vmatpush.bf16.msra.mxu1 %v4138_v56  ;;  %1987 = vmatmul.bf16.vlgmr.msrb.gmra.mxu2 %v1583_v5  ;;  %v4114_v56 = vor.u32 %v5105_v31, %v4111_v45  ;;  %v5099_v45 = vld [vmem:[#allocation7 + $0x494] sm:$0xf] }
  0xea   : > { %2031 = vmatpush.bf16.msra.mxu2 %v4202_v57  ;;  %2000 = vmatmul.bf16.vlgmr.msrb.gmra.mxu3 %v1584_v6  ;;  %v4178_v57 = vor.u32 %v5121_v36, %v4175_v37  ;;  %v929_v53 = vadd.f32 %v928_v25, %v916_v60  ;;  %v4223_v25 = vld [vmem:[#allocation7 + $0x5a8] sm:$0xf0]  ;;  %v5115_v37 = vld [vmem:[#allocation7 + $0x514] sm:$0xf] }
  0xeb   : > { %2044 = vmatpush.bf16.msra.mxu3 %v4266_v58  ;;  %v4330_v58 = vor.u32 %v5159_v47, %v4327_v48  ;;  %v930_v9 = vpop.f32.mrf.mxu3  ;;  %v4226_v35 = vor.u32 %v5133_v50, %v4223_v25  ;;  %v4215_v47 = vld [vmem:[#allocation7 + $0x598] sm:$0xf0]  ;;  %v5153_v48 = vld [vmem:[#allocation7 + $0x644] sm:$0xf] }
  0xec   : > { %2010 = vmatpush.bf16.msra.mxu0 %v4350_v63  ;;  %v5157_v63 = vld [vmem:[#allocation7 + $0x664] sm:$0xf]  ;;  %v5906_v14 = vadd.f32 %v941_v51, %v929_v53  ;;  %v904_v23 = vpop.f32.mrf.mxu1  ;;  %v943_v46 = vpop.f32.mrf.mxu0  ;;  %v4143_v51 = vld [vmem:[#allocation7 + $0x508] sm:$0xf0]  ;;  %v5151_v53 = vld [vmem:[#allocation7 + $0x634] sm:$0xf] }
  0xed   : > { %2019 = vmatpush.bf16.msra.mxu1 %v4130_v8  ;;  %v4319_v8 = vld [vmem:[#allocation7 + $0x668] sm:$0xf0]  ;;  %v5184_v9 = vld [vmem:[#allocation7 + $0x734] sm:$0xf0]  ;;  %v4210_v23 = vor.u32 %v5129_v0, %v4207_v19  ;;  %v5149_v25 = vld [vmem:[#allocation7 + $0x624] sm:$0xf] }
  0xee   : > { %2032 = vmatpush.bf16.msra.mxu2 %v4194_v28  ;;  %v917_v28 = vpop.f32.mrf.mxu2  ;;  %v4322_v22 = vor.u32 %v5157_v63, %v4319_v8  ;;  %v5167_v63 = vld [vmem:[#allocation7 + $0x6b4] sm:$0xf]  ;;  %v4359_v8 = vld [vmem:[#allocation7 + $0x6b8] sm:$0xf0]  ;;  %v2161_v19 = vrot.slane %v485_v42, 1 }
  0xef   : > { %2045 = vmatpush.bf16.msra.mxu3 %v4258_v17  ;;  %v1585_v17 = vrot.slane %v5834_v49, 1  ;;  %v4423_v28 = vld [vmem:[#allocation7 + $0x730] sm:$0xf]  ;;  %v5194_v42 = vld [vmem:[#allocation7 + $0x784] sm:$0xf0] }
  0xf0   : > { %2011 = vmatpush.bf16.msra.mxu0 %v4342_v20  ;;  %v5117_v20 = vld [vmem:[#allocation7 + $0x524] sm:$0xf]  ;;  %v4424_v50 = vor.u32 %v5184_v9, %v4423_v28  ;;  %v4335_v28 = vld [vmem:[#allocation7 + $0x688] sm:$0xf0]  ;;  %v4399_v9 = vld [vmem:[#allocation7 + $0x700] sm:$0xf] }
  0xf1   : > { %2020 = vmatpush.bf16.msra.mxu1 %v4122_v27  ;;  %v5155_v27 = vld [vmem:[#allocation7 + $0x654] sm:$0xf]  ;;  %v4162_v31 = vor.u32 %v5117_v20, %v4159_v24  ;;  %v4298_v20 = vor.u32 %v5151_v53, %v4295_v29  ;;  %v4362_v24 = vor.u32 %v5167_v63, %v4359_v8  ;;  %v5145_v53 = vld [vmem:[#allocation7 + $0x604] sm:$0xf] }
  0xf2   : > { %2033 = vmatpush.bf16.msra.mxu2 %v4186_v30  ;;  %v4311_v30 = vld [vmem:[#allocation7 + $0x658] sm:$0xf0]  ;;  %v5161_v8 = vld [vmem:[#allocation7 + $0x684] sm:$0xf] }
  0xf3   : > { %2046 = vmatpush.bf16.msra.mxu3 %v4250_v33  ;;  %v4087_v33 = vld [vmem:[#allocation7 + $0x498] sm:$0xf0]  ;;  %v4314_v36 = vor.u32 %v5155_v27, %v4311_v30  ;;  %v4287_v27 = vld [vmem:[#allocation7 + $0x628] sm:$0xf0]  ;;  %v5165_v30 = vld [vmem:[#allocation7 + $0x6a4] sm:$0xf] }
  0xf4   : > { %2012 = vmatpush.bf16.msra.mxu0 %v4334_v54  ;;  %v4303_v54 = vld [vmem:[#allocation7 + $0x648] sm:$0xf0]  ;;  %v4090_v60 = vor.u32 %v5099_v45, %v4087_v33  ;;  %v4415_v45 = vld [vmem:[#allocation7 + $0x720] sm:$0xf]  ;;  %v5182_v33 = vld [vmem:[#allocation7 + $0x724] sm:$0xf0] }
  0xf5   : > { %2021 = vmatpush.bf16.msra.mxu1 %v4114_v56  ;;  %v4154_v56 = vor.u32 %v5115_v37, %v4151_v38  ;;  %v954_v3 = vpop.f32.mrf.mxu1  ;;  %v4416_v46 = vor.u32 %v5182_v33, %v4415_v45  ;;  %v4391_v45 = vld [vmem:[#allocation7 + $0x6f0] sm:$0xf]  ;;  %v5176_v33 = vld [vmem:[#allocation7 + $0x6f4] sm:$0xf0] }
  0xf6   : > { %2034 = vmatpush.bf16.msra.mxu2 %v4178_v57  ;;  %v5097_v57 = vld [vmem:[#allocation7 + $0x484] sm:$0xf] }
  0xf7   : > { %2047 = vmatpush.bf16.msra.mxu3 %v4242_v61  ;;  %4363 = vmatmul.msk.bf16.vlgmr.msra.gmra.mxu0 %vm876_vm0, %v1585_v17  ;;  %v4218_v61 = vor.u32 %v5131_v41, %v4215_v47 }
  0xf8   : > { %2057 = vmatpush.bf16.msrb.mxu0 %v4330_v58  ;;  %v4306_v58 = vor.u32 %v5153_v48, %v4303_v54  ;;  %v5147_v48 = vld [vmem:[#allocation7 + $0x614] sm:$0xf]  ;;  %v4279_v54 = vld [vmem:[#allocation7 + $0x618] sm:$0xf0] }
  0xf9   : > { %2022 = vmatpush.bf16.msra.mxu1 %v4106_v15  ;;  %v4082_v15 = vor.u32 %v5097_v57, %v4079_v26  ;;  %v4343_v26 = vld [vmem:[#allocation7 + $0x698] sm:$0xf0] }
  0xfa   : > { %2035 = vmatpush.bf16.msra.mxu2 %v4170_v16  ;;  %v4146_v16 = vor.u32 %v5113_v59, %v4143_v51  ;;  %v4407_v59 = vld [vmem:[#allocation7 + $0x710] sm:$0xf]  ;;  %v5196_v51 = vld [vmem:[#allocation7 + $0x794] sm:$0xf0] }
  0xfb   : > { %2048 = vmatpush.bf16.msra.mxu3 %v4234_v21  ;;  %v2158_v21 = vrot.slane %v478_v39, 1  ;;  %v5198_v39 = vld [vmem:[#allocation7 + $0x7a4] sm:$0xf0] }
  0xfc   : > { %2058 = vmatpush.bf16.msrb.mxu0 %v4322_v22  ;;  %v2159_v22 = vrot.slane %v480_v40, 2  ;;  %v4290_v40 = vor.u32 %v5149_v25, %v4287_v27  ;;  %v4338_v27 = vor.u32 %v5161_v8, %v4335_v28  ;;  %v4375_v28 = vld [vmem:[#allocation7 + $0x6d0] sm:$0xf] }
  0xfd   : > { %2023 = vmatpush.bf16.msra.mxu1 %v4098_v52  ;;  %v4488_v52 = vor.u32 %v5200_v18, %v4487_v44  ;;  %v980_v37 = vpop.f32.mrf.mxu3  ;;  %v956_v47 = vpop.f32.mrf.mxu1 }
  0xfe   : > { %2036 = vmatpush.bf16.msra.mxu2 %v4162_v31  ;;  %v4351_v31 = vld [vmem:[#allocation7 + $0x6a8] sm:$0xf0]  ;;  %v5916_v38 = vor.u32 %v2159_v22, %v2158_v21  ;;  %v4551_v21 = vld [vmem:[#allocation7 + $0x830] sm:$0xf]  ;;  %v2171_v47 = vrot.slane %v508_v62, 2 }
  0xff   : > { %2049 = vmatpush.bf16.msra.mxu3 %v4226_v35  ;;  %v4479_v35 = vld [vmem:[#allocation7 + $0x7a0] sm:$0xf]  ;;  %v4354_v41 = vor.u32 %v5165_v30, %v4351_v31  ;;  %v5174_v62 = vld [vmem:[#allocation7 + $0x6e4] sm:$0xf0] }
 0x100   : > { %2059 = vmatpush.bf16.msrb.mxu0 %v4314_v36  ;;  %v967_v36 = vpop.f32.mrf.mxu2  ;;  %v4480_v57 = vor.u32 %v5198_v39, %v4479_v35  ;;  %v4455_v35 = vld [vmem:[#allocation7 + $0x770] sm:$0xf] }
 0x101   : > { %2024 = vmatpush.bf16.msra.mxu1 %v4090_v60  ;;  %v5163_v60 = vld [vmem:[#allocation7 + $0x694] sm:$0xf] }
 0x102   : > { %2037 = vmatpush.bf16.msra.mxu2 %v4154_v56  ;;  %v968_v56 = vadd.f32 %v967_v36, %v954_v3  ;;  %v2162_v3 = vrot.slane %v487_v43, 2  ;;  %v4346_v29 = vor.u32 %v5163_v60, %v4343_v26  ;;  %v5216_v43 = vld [vmem:[#allocation7 + $0x834] sm:$0xf0]  ;;  %v5230_v60 = vld [vmem:[#allocation7 + $0x8a4] sm:$0xf0]  ;;  %v4392_v26 = vor.u32 %v5176_v33, %v4391_v45 }
 0x103   : > { %2050 = vmatpush.bf16.msra.mxu3 %v4218_v61  ;;  %v5180_v61 = vld [vmem:[#allocation7 + $0x714] sm:$0xf0]  ;;  %v4552_v31 = vor.u32 %v5216_v43, %v4551_v21  ;;  %v5226_v21 = vld [vmem:[#allocation7 + $0x884] sm:$0xf0]  ;;  %v4583_v33 = vld [vmem:[#allocation7 + $0x870] sm:$0xf] }
 0x104   : > { %2060 = vmatpush.bf16.msrb.mxu0 %v4306_v58  ;;  %v4471_v58 = vld [vmem:[#allocation7 + $0x790] sm:$0xf]  ;;  %v981_v0 = vadd.f32 %v980_v37, %v968_v56  ;;  %v4408_v63 = vor.u32 %v5180_v61, %v4407_v59  ;;  %v993_v44 = vpop.f32.mrf.mxu0  ;;  %v5928_v25 = vor.u32 %v2162_v3, %v2161_v19  ;;  %v5192_v36 = vld [vmem:[#allocation7 + $0x774] sm:$0xf0]  ;;  %v4543_v37 = vld [vmem:[#allocation7 + $0x820] sm:$0xf] }
 0x105   : > { %2025 = vmatpush.bf16.msra.mxu1 %v4082_v15  ;;  %v5178_v15 = vld [vmem:[#allocation7 + $0x704] sm:$0xf0]  ;;  %v2164_v56 = vrot.slane %v492_v10, 1  ;;  %v4383_v61 = vld [vmem:[#allocation7 + $0x6e0] sm:$0xf] }
 0x106   : > { %2038 = vmatpush.bf16.msra.mxu2 %v4146_v16  ;;  %v4463_v16 = vld [vmem:[#allocation7 + $0x780] sm:$0xf]  ;;  %v994_v18 = vadd.f32 %v993_v44, %v981_v0  ;;  %v4400_v30 = vor.u32 %v5178_v15, %v4399_v9  ;;  %v5190_v10 = vld [vmem:[#allocation7 + $0x764] sm:$0xf0]  ;;  %v4535_v19 = vld [vmem:[#allocation7 + $0x810] sm:$0xf] }
 0x107   : > { %2051 = vmatpush.bf16.msra.mxu3 %v4210_v23  ;;  %v4615_v23 = vld [vmem:[#allocation7 + $0x8b0] sm:$0xf]  ;;  %v5212_v3 = vld [vmem:[#allocation7 + $0x814] sm:$0xf0]  ;;  %v4527_v44 = vld [vmem:[#allocation7 + $0x800] sm:$0xf] }
 0x108   : > { %2061 = vmatpush.bf16.msrb.mxu0 %v4298_v20  ;;  %2026 = vmatmul.bf16.vlgmr.msra.gmra.mxu1 %v1581_v55  ;;  %v4282_v55 = vor.u32 %v5147_v48, %v4279_v54  ;;  %v5232_v20 = vld [vmem:[#allocation7 + $0x8b4] sm:$0xf0]  ;;  %v4607_v54 = vld [vmem:[#allocation7 + $0x8a0] sm:$0xf]  ;;  %v4439_v9 = vld [vmem:[#allocation7 + $0x750] sm:$0xf] }
 0x109   : > { %2074 = vmatpush.bf16.msrb.mxu1 %v4362_v24  ;;  %2039 = vmatmul.bf16.vlgmr.msra.gmra.mxu2 %v1582_v7  ;;  %v4271_v7 = vld [vmem:[#allocation7 + $0x608] sm:$0xf0]  ;;  %v969_v24 = vpop.f32.mrf.mxu2  ;;  %v4616_v39 = vor.u32 %v5232_v20, %v4615_v23  ;;  %v4608_v0 = vor.u32 %v5230_v60, %v4607_v54  ;;  %v4367_v23 = vld [vmem:[#allocation7 + $0x6c0] sm:$0xf]  ;;  %v5208_v45 = vld [vmem:[#allocation7 + $0x7f4] sm:$0xf0] }
 0x10a   : > { %2540 = vmatpush.bf16.msrb.mxu2 %v4424_v50  ;;  %2052 = vmatmul.bf16.vlgmr.msra.gmra.mxu3 %v1583_v5  ;;  %v4472_v5 = vor.u32 %v5196_v51, %v4471_v58  ;;  %v4274_v22 = vor.u32 %v5145_v53, %v4271_v7  ;;  %v982_v50 = vpop.f32.mrf.mxu3  ;;  %v4447_v58 = vld [vmem:[#allocation7 + $0x760] sm:$0xf]  ;;  %v4599_v53 = vld [vmem:[#allocation7 + $0x890] sm:$0xf]  ;;  %v4384_v7 = vor.u32 %v5174_v62, %v4383_v61  ;;  %v5238_v61 = vld [vmem:[#allocation7 + $0x8e4] sm:$0xf0] }
 0x10b   : > { %2553 = vmatpush.bf16.msrb.mxu3 %v4488_v52  ;;  %v4464_v52 = vor.u32 %v5194_v42, %v4463_v16  ;;  %v4448_v8 = vor.u32 %v5190_v10, %v4447_v58  ;;  %v5188_v16 = vld [vmem:[#allocation7 + $0x754] sm:$0xf0]  ;;  %v5170_v50 = vld [vmem:[#allocation7 + $0x6c4] sm:$0xf0]  ;;  %v4511_v60 = vld [vmem:[#allocation7 + $0x7e0] sm:$0xf] }
 0x10c   : > { %2062 = vmatpush.bf16.msrb.mxu0 %v4290_v40  ;;  %v1006_v40 = vpop.f32.mrf.mxu1  ;;  %v995_v51 = vpop.f32.mrf.mxu0  ;;  %v4440_v20 = vor.u32 %v5188_v16, %v4439_v9  ;;  %v5181_v58 = vld [vmem:[#allocation7 + $0x724] sm:$0xf]  ;;  %v5179_v9 = vld [vmem:[#allocation7 + $0x714] sm:$0xf]  ;;  %v4495_v16 = vld [vmem:[#allocation7 + $0x7c0] sm:$0xf] }
 0x10d   : > { %2075 = vmatpush.bf16.msrb.mxu1 %v4354_v41  ;;  %v5214_v41 = vld [vmem:[#allocation7 + $0x824] sm:$0xf0]  ;;  %v5934_v48 = vadd.f32 %v1006_v40, %v994_v18  ;;  %v4591_v18 = vld [vmem:[#allocation7 + $0x880] sm:$0xf]  ;;  %v4368_v40 = vor.u32 %v5170_v50, %v4367_v23  ;;  %v4417_v51 = vld [vmem:[#allocation7 + $0x728] sm:$0xf0] }
 0x10e   : > { %2541 = vmatpush.bf16.msrb.mxu2 %v4416_v46  ;;  %v2170_v46 = vrot.slane %v506_v4, 1  ;;  %v4456_v4 = vor.u32 %v5192_v36, %v4455_v35  ;;  %v4544_v59 = vor.u32 %v5214_v41, %v4543_v37  ;;  %v4647_v35 = vld [vmem:[#allocation7 + $0x8f0] sm:$0xf]  ;;  %v5183_v36 = vld [vmem:[#allocation7 + $0x734] sm:$0xf] }
 0x10f   : > { %2554 = vmatpush.bf16.msrb.mxu3 %v4480_v57  ;;  %v2165_v57 = vrot.slane %v494_v11, 2  ;;  %v2167_v11 = vrot.slane %v499_v12, 1  ;;  %v4425_v37 = vld [vmem:[#allocation7 + $0x738] sm:$0xf0]  ;;  %v4401_v50 = vld [vmem:[#allocation7 + $0x708] sm:$0xf0] }
 0x110   : > { %2063 = vmatpush.bf16.msrb.mxu0 %v4282_v55  ;;  %v2168_v55 = vrot.slane %v501_v13, 2  ;;  %v5210_v13 = vld [vmem:[#allocation7 + $0x804] sm:$0xf0] }
 0x111   : > { %2076 = vmatpush.bf16.msrb.mxu1 %v4346_v29  ;;  %v5228_v29 = vld [vmem:[#allocation7 + $0x894] sm:$0xf0]  ;;  %v5948_v15 = vor.u32 %v2165_v57, %v2164_v56  ;;  %v4528_v24 = vor.u32 %v5210_v13, %v4527_v44  ;;  %v5206_v56 = vld [vmem:[#allocation7 + $0x7e4] sm:$0xf0]  ;;  %v4575_v57 = vld [vmem:[#allocation7 + $0x860] sm:$0xf] }
 0x112   : > { %2542 = vmatpush.bf16.msrb.mxu2 %v4408_v63  ;;  %v5946_v63 = vor.u32 %v2171_v47, %v2170_v46  ;;  %v4600_v12 = vor.u32 %v5228_v29, %v4599_v53  ;;  %v5953_v43 = vor.u32 %v2168_v55, %v2167_v11  ;;  %v4512_v10 = vor.u32 %v5206_v56, %v4511_v60  ;;  %v4503_v55 = vld [vmem:[#allocation7 + $0x7d0] sm:$0xf]  ;;  %v5204_v53 = vld [vmem:[#allocation7 + $0x7d4] sm:$0xf0]  ;;  %v5202_v44 = vld [vmem:[#allocation7 + $0x7c4] sm:$0xf0] }
 0x113   : > { %2555 = vmatpush.bf16.msrb.mxu3 %v4472_v5  ;;  %v5172_v5 = vld [vmem:[#allocation7 + $0x6d4] sm:$0xf0]  ;;  %v4567_v29 = vld [vmem:[#allocation7 + $0x850] sm:$0xf]  ;;  %v5175_v56 = vld [vmem:[#allocation7 + $0x6f4] sm:$0xf] }
 0x114   : > { %2064 = vmatpush.bf16.msrb.mxu0 %v4274_v22  ;;  %v1008_v42 = vpop.f32.mrf.mxu1  ;;  %v4376_v22 = vor.u32 %v5172_v5, %v4375_v28  ;;  %v4631_v28 = vld [vmem:[#allocation7 + $0x8d0] sm:$0xf]  ;;  %v5236_v5 = vld [vmem:[#allocation7 + $0x8d4] sm:$0xf0] }
 0x115   : > { %2077 = vmatpush.bf16.msrb.mxu1 %v4338_v27  ;;  %v4431_v27 = vld [vmem:[#allocation7 + $0x740] sm:$0xf]  ;;  %v4632_v42 = vor.u32 %v5236_v5, %v4631_v28  ;;  %v4537_v28 = vld [vmem:[#allocation7 + $0x818] sm:$0xf0]  ;;  %v5227_v5 = vld [vmem:[#allocation7 + $0x894] sm:$0xf] }
 0x116   : > { %2543 = vmatpush.bf16.msrb.mxu2 %v4400_v30  ;;  %v5186_v30 = vld [vmem:[#allocation7 + $0x744] sm:$0xf0] }
 0x117   : > { %2556 = vmatpush.bf16.msrb.mxu3 %v4464_v52  ;;  %2065 = vmatmul.bf16.vlgmr.msrb.gmra.mxu0 %v1584_v6  ;;  %v4536_v6 = vor.u32 %v5212_v3, %v4535_v19  ;;  %v4592_v52 = vor.u32 %v5226_v21, %v4591_v18  ;;  %v4432_v41 = vor.u32 %v5186_v30, %v4431_v27  ;;  %v4559_v18 = vld [vmem:[#allocation7 + $0x840] sm:$0xf]  ;;  %v5218_v21 = vld [vmem:[#allocation7 + $0x844] sm:$0xf0] }
 0x118   : > { %2566 = vmatpush.bf16.msra.mxu0 %v4552_v31  ;;  %4364 = vmatmul.msk.bf16.vlgmr.msrb.gmra.mxu1 %vm876_vm0, %v1585_v17  ;;  %v4519_v31 = vld [vmem:[#allocation7 + $0x7f0] sm:$0xf]  ;;  %v5224_v17 = vld [vmem:[#allocation7 + $0x874] sm:$0xf0] }
 0x119   : > { %2579 = vmatpush.bf16.msra.mxu1 %v4616_v39  ;;  %v5240_v39 = vld [vmem:[#allocation7 + $0x8f4] sm:$0xf0]  ;;  %v4520_v46 = vor.u32 %v5208_v45, %v4519_v31  ;;  %v4584_v47 = vor.u32 %v5224_v17, %v4583_v33  ;;  %v4489_v31 = vld [vmem:[#allocation7 + $0x7b8] sm:$0xf0]  ;;  %v5215_v45 = vld [vmem:[#allocation7 + $0x834] sm:$0xf]  ;;  %v4496_v17 = vor.u32 %v5202_v44, %v4495_v16 }
 0x11a   : > { %2544 = vmatpush.bf16.msrb.mxu2 %v4392_v26  ;;  %v4648_v54 = vor.u32 %v5240_v39, %v4647_v35  ;;  %v4428_v26 = vor.u32 %v5183_v36, %v4425_v37  ;;  %v4553_v39 = vld [vmem:[#allocation7 + $0x838] sm:$0xf0] }
 0x11b   : > { %2557 = vmatpush.bf16.msrb.mxu3 %v4456_v4  ;;  %v5222_v4 = vld [vmem:[#allocation7 + $0x864] sm:$0xf0]  ;;  %v4617_v36 = vld [vmem:[#allocation7 + $0x8b8] sm:$0xf0] }
 0x11c   : > { %2567 = vmatpush.bf16.msra.mxu0 %v4544_v59  ;;  %v4639_v59 = vld [vmem:[#allocation7 + $0x8e0] sm:$0xf]  ;;  %v1382_v62 = vpop.f32.mrf.mxu2  ;;  %v4576_v3 = vor.u32 %v5222_v4, %v4575_v57  ;;  %v4393_v57 = vld [vmem:[#allocation7 + $0x6f8] sm:$0xf0] }
 0x11d   : > { %2580 = vmatpush.bf16.msra.mxu1 %v4608_v0  ;;  %v1383_v0 = vadd.f32 %v1382_v62, %v5906_v14  ;;  %v1395_v19 = vpop.f32.mrf.mxu3  ;;  %v4640_v11 = vor.u32 %v5238_v61, %v4639_v59  ;;  %v4504_v14 = vor.u32 %v5204_v53, %v4503_v55  ;;  %v5197_v59 = vld [vmem:[#allocation7 + $0x7a4] sm:$0xf]  ;;  %v4481_v61 = vld [vmem:[#allocation7 + $0x7a8] sm:$0xf0] }
 0x11e   : > { %2545 = vmatpush.bf16.msrb.mxu2 %v4384_v7  ;;  %v4420_v7 = vor.u32 %v5181_v58, %v4417_v51  ;;  %v5213_v62 = vld [vmem:[#allocation7 + $0x824] sm:$0xf]  ;;  %v4545_v58 = vld [vmem:[#allocation7 + $0x828] sm:$0xf0] }
 0x11f   : > { %2558 = vmatpush.bf16.msrb.mxu3 %v4448_v8  ;;  %v1396_v8 = vadd.f32 %v1395_v19, %v1383_v0  ;;  %v5229_v51 = vld [vmem:[#allocation7 + $0x8a4] sm:$0xf]  ;;  %v4609_v0 = vld [vmem:[#allocation7 + $0x8a8] sm:$0xf0]  ;;  %v4484_v19 = vor.u32 %v5197_v59, %v4481_v61  ;;  %v4548_v55 = vor.u32 %v5213_v62, %v4545_v58 }
 0x120   : > { %2568 = vmatpush.bf16.msra.mxu0 %v4536_v6  ;;  %v5220_v6 = vld [vmem:[#allocation7 + $0x854] sm:$0xf0]  ;;  %v4612_v53 = vor.u32 %v5229_v51, %v4609_v0  ;;  %v5189_v59 = vld [vmem:[#allocation7 + $0x764] sm:$0xf]  ;;  %v4449_v61 = vld [vmem:[#allocation7 + $0x768] sm:$0xf0] }
 0x121   : > { %2581 = vmatpush.bf16.msra.mxu1 %v4600_v12  ;;  %v4409_v12 = vld [vmem:[#allocation7 + $0x718] sm:$0xf0]  ;;  %v4568_v13 = vor.u32 %v5220_v6, %v4567_v29  ;;  %v5195_v29 = vld [vmem:[#allocation7 + $0x794] sm:$0xf]  ;;  %v5205_v62 = vld [vmem:[#allocation7 + $0x7e4] sm:$0xf] }
 0x122   : > { %2546 = vmatpush.bf16.msrb.mxu2 %v4376_v22  ;;  %v4623_v22 = vld [vmem:[#allocation7 + $0x8c0] sm:$0xf]  ;;  %v4412_v23 = vor.u32 %v5179_v9, %v4409_v12  ;;  %v4601_v9 = vld [vmem:[#allocation7 + $0x898] sm:$0xf0]  ;;  %v4513_v51 = vld [vmem:[#allocation7 + $0x7e8] sm:$0xf0] }
 0x123   : > { %2559 = vmatpush.bf16.msrb.mxu3 %v4440_v20  ;;  %v5234_v20 = vld [vmem:[#allocation7 + $0x8c4] sm:$0xf0]  ;;  %v5221_v0 = vld [vmem:[#allocation7 + $0x864] sm:$0xf] }
 0x124   : > { %2569 = vmatpush.bf16.msra.mxu0 %v4528_v24  ;;  %v5177_v24 = vld [vmem:[#allocation7 + $0x704] sm:$0xf]  ;;  %v1408_v27 = vpop.f32.mrf.mxu0  ;;  %v1384_v30 = vpop.f32.mrf.mxu2 }
 0x125   : > { %2582 = vmatpush.bf16.msra.mxu1 %v4592_v52  ;;  %v5199_v52 = vld [vmem:[#allocation7 + $0x7b4] sm:$0xf]  ;;  %v1409_v33 = vadd.f32 %v1408_v27, %v1396_v8  ;;  %v1421_v35 = vpop.f32.mrf.mxu1  ;;  %v1397_v37 = vpop.f32.mrf.mxu3  ;;  %v5225_v27 = vld [vmem:[#allocation7 + $0x884] sm:$0xf]  ;;  %v4593_v30 = vld [vmem:[#allocation7 + $0x888] sm:$0xf0] }
 0x126   : > { %2547 = vmatpush.bf16.msrb.mxu2 %v4368_v40  ;;  %v5231_v40 = vld [vmem:[#allocation7 + $0x8b4] sm:$0xf]  ;;  %v4492_v60 = vor.u32 %v5199_v52, %v4489_v31  ;;  %v4521_v37 = vld [vmem:[#allocation7 + $0x7f8] sm:$0xf0] }
 0x127   : > { %2560 = vmatpush.bf16.msrb.mxu3 %v4432_v41  ;;  %v4560_v41 = vor.u32 %v5218_v21, %v4559_v18  ;;  %v4620_v4 = vor.u32 %v5231_v40, %v4617_v36  ;;  %v5211_v8 = vld [vmem:[#allocation7 + $0x814] sm:$0xf]  ;;  %v4377_v18 = vld [vmem:[#allocation7 + $0x6d8] sm:$0xf0] }
 0x128   : > { %2570 = vmatpush.bf16.msra.mxu0 %v4520_v46  ;;  %v4624_v46 = vor.u32 %v5234_v20, %v4623_v22  ;;  %v4540_v21 = vor.u32 %v5211_v8, %v4537_v28  ;;  %v4604_v22 = vor.u32 %v5227_v5, %v4601_v9  ;;  %v4465_v20 = vld [vmem:[#allocation7 + $0x788] sm:$0xf0]  ;;  %v4457_v40 = vld [vmem:[#allocation7 + $0x778] sm:$0xf0]  ;;  %v5207_v36 = vld [vmem:[#allocation7 + $0x7f4] sm:$0xf] }
 0x129   : > { %2583 = vmatpush.bf16.msra.mxu1 %v4584_v47  ;;  %2548 = vmatmul.bf16.vlgmr.msrb.gmra.mxu2 %v5916_v38  ;;  %v4404_v47 = vor.u32 %v5177_v24, %v4401_v50  ;;  %v5209_v24 = vld [vmem:[#allocation7 + $0x804] sm:$0xf]  ;;  %v4529_v50 = vld [vmem:[#allocation7 + $0x808] sm:$0xf0]  ;;  %v5187_v8 = vld [vmem:[#allocation7 + $0x754] sm:$0xf] }
 0x12a   : > { %2596 = vmatpush.bf16.msra.mxu2 %v4648_v54  ;;  %2561 = vmatmul.bf16.vlgmr.msrb.gmra.mxu3 %v5928_v25  ;;  %v1422_v54 = vadd.f32 %v1421_v35, %v1409_v33  ;;  %v4369_v33 = vld [vmem:[#allocation7 + $0x6c8] sm:$0xf0]  ;;  %v4596_v35 = vor.u32 %v5225_v27, %v4593_v30  ;;  %v5203_v28 = vld [vmem:[#allocation7 + $0x7d4] sm:$0xf]  ;;  %v4505_v9 = vld [vmem:[#allocation7 + $0x7d8] sm:$0xf0] }
 0x12b   : > { %2605 = vmatpush.bf16.msra.mxu3 %v4428_v26  ;;  %v4556_v26 = vor.u32 %v5215_v45, %v4553_v39  ;;  %v5169_v45 = vld [vmem:[#allocation7 + $0x6c4] sm:$0xf]  ;;  %v5191_v39 = vld [vmem:[#allocation7 + $0x774] sm:$0xf]  ;;  %v4561_v27 = vld [vmem:[#allocation7 + $0x848] sm:$0xf0] }
 0x12c   : > { %2571 = vmatpush.bf16.msra.mxu0 %v4512_v10  ;;  %v4396_v10 = vor.u32 %v5175_v56, %v4393_v57  ;;  %v1410_v6 = vpop.f32.mrf.mxu0  ;;  %v4372_v56 = vor.u32 %v5169_v45, %v4369_v33  ;;  %v4460_v57 = vor.u32 %v5191_v39, %v4457_v40  ;;  %v5233_v30 = vld [vmem:[#allocation7 + $0x8c4] sm:$0xf]  ;;  %v5256_v45 = vld [vmem:[#allocation7 + $0x974] sm:$0xf0]  ;;  %v4777_v33 = vld [vmem:[#allocation7 + $0x9f0] sm:$0xf] }
 0x12d   : > { %2584 = vmatpush.bf16.msra.mxu1 %v4576_v3  ;;  %v5173_v3 = vld [vmem:[#allocation7 + $0x6e4] sm:$0xf]  ;;  %v1423_v12 = vpop.f32.mrf.mxu1  ;;  %v4441_v6 = vld [vmem:[#allocation7 + $0x758] sm:$0xf0] }
 0x12e   : > { %2597 = vmatpush.bf16.msra.mxu2 %v4640_v11  ;;  %v4385_v11 = vld [vmem:[#allocation7 + $0x6e8] sm:$0xf0]  ;;  %v5219_v12 = vld [vmem:[#allocation7 + $0x854] sm:$0xf] }
 0x12f   : > { %2606 = vmatpush.bf16.msra.mxu3 %v4420_v7  ;;  %v4473_v7 = vld [vmem:[#allocation7 + $0x798] sm:$0xf0]  ;;  %v4388_v44 = vor.u32 %v5173_v3, %v4385_v11  ;;  %v4641_v3 = vld [vmem:[#allocation7 + $0x8e8] sm:$0xf0] }
 0x130   : > { %2572 = vmatpush.bf16.msra.mxu0 %v4504_v14  ;;  %v1434_v14 = vpop.f32.mrf.mxu2 }
 0x131   : > { %2585 = vmatpush.bf16.msra.mxu1 %v4568_v13  ;;  %v5960_v16 = vadd.f32 %v1434_v14, %v1422_v54  ;;  %v4476_v13 = vor.u32 %v5195_v29, %v4473_v7  ;;  %v4649_v54 = vld [vmem:[#allocation7 + $0x8f8] sm:$0xf0]  ;;  %v4516_v29 = vor.u32 %v5205_v62, %v4513_v51  ;;  %v5254_v62 = vld [vmem:[#allocation7 + $0x964] sm:$0xf0] }
 0x132   : > { %2598 = vmatpush.bf16.msra.mxu2 %v4632_v42  ;;  %v5171_v42 = vld [vmem:[#allocation7 + $0x6d4] sm:$0xf]  ;;  %v4569_v14 = vld [vmem:[#allocation7 + $0x858] sm:$0xf0] }
 0x133   : > { %2607 = vmatpush.bf16.msra.mxu3 %v4412_v23  ;;  %v5193_v23 = vld [vmem:[#allocation7 + $0x784] sm:$0xf]  ;;  %v4380_v52 = vor.u32 %v5171_v42, %v4377_v18  ;;  %v4444_v42 = vor.u32 %v5187_v8, %v4441_v6  ;;  %v4697_v6 = vld [vmem:[#allocation7 + $0x950] sm:$0xf] }
 0x134   : > { %2573 = vmatpush.bf16.msra.mxu0 %v4496_v17  ;;  %v4468_v31 = vor.u32 %v5193_v23, %v4465_v20  ;;  %v4532_v17 = vor.u32 %v5209_v24, %v4529_v50  ;;  %v5185_v18 = vld [vmem:[#allocation7 + $0x744] sm:$0xf]  ;;  %v4497_v20 = vld [vmem:[#allocation7 + $0x7c8] sm:$0xf0] }
 0x135   : > { %2586 = vmatpush.bf16.msra.mxu1 %v4560_v41  ;;  %v5223_v41 = vld [vmem:[#allocation7 + $0x874] sm:$0xf]  ;;  %v5201_v23 = vld [vmem:[#allocation7 + $0x7c4] sm:$0xf] }
 0x136   : > { %2599 = vmatpush.bf16.msra.mxu2 %v4624_v46  ;;  %v4585_v46 = vld [vmem:[#allocation7 + $0x878] sm:$0xf0]  ;;  %v5217_v24 = vld [vmem:[#allocation7 + $0x844] sm:$0xf] }
 0x137   : > { %2608 = vmatpush.bf16.msra.mxu3 %v4404_v47  ;;  %2574 = vmatmul.bf16.vlgmr.msra.gmra.mxu0 %v5948_v15  ;;  %v5239_v47 = vld [vmem:[#allocation7 + $0x8f4] sm:$0xf] }
 0x138   : > { %2618 = vmatpush.bf16.msrb.mxu0 %v4492_v60  ;;  %2587 = vmatmul.bf16.vlgmr.msra.gmra.mxu1 %v5953_v43  ;;  %v1436_v60 = vpop.f32.mrf.mxu2  ;;  %v4652_v58 = vor.u32 %v5239_v47, %v4649_v54  ;;  %v4564_v47 = vor.u32 %v5217_v24, %v4561_v27  ;;  %v4905_v54 = vld [vmem:[#allocation7 + $0xaf0] sm:$0xf]  ;;  %v4689_v24 = vld [vmem:[#allocation7 + $0x940] sm:$0xf] }
 0x139   : > { %2631 = vmatpush.bf16.msrb.mxu1 %v4556_v26  ;;  %4653 = vmatmul.msk.bf16.vlgmr.msra.gmra.mxu2 %vm876_vm0, %v5946_v63  ;;  %v4524_v26 = vor.u32 %v5207_v36, %v4521_v37  ;;  %v5272_v36 = vld [vmem:[#allocation7 + $0x9f4] sm:$0xf0]  ;;  %v4841_v37 = vld [vmem:[#allocation7 + $0xa70] sm:$0xf]  ;;  %v4753_v27 = vld [vmem:[#allocation7 + $0x9c0] sm:$0xf] }
 0x13a   : > { %2644 = vmatpush.bf16.msrb.mxu2 %v4620_v4  ;;  %v4588_v4 = vor.u32 %v5223_v41, %v4585_v46  ;;  %v5288_v41 = vld [vmem:[#allocation7 + $0xa74] sm:$0xf0]  ;;  %v4500_v46 = vor.u32 %v5201_v23, %v4497_v20 }
 0x13b   : > { %2609 = vmatpush.bf16.msra.mxu3 %v4396_v10  ;;  %v4577_v10 = vld [vmem:[#allocation7 + $0x868] sm:$0xf0]  ;;  %v5304_v60 = vld [vmem:[#allocation7 + $0xaf4] sm:$0xf0] }
 0x13c   : > { %2619 = vmatpush.bf16.msrb.mxu0 %v4484_v19  ;;  %v5237_v19 = vld [vmem:[#allocation7 + $0x8e4] sm:$0xf]  ;;  %v4580_v7 = vor.u32 %v5221_v0, %v4577_v10  ;;  %v4906_v51 = vor.u32 %v5304_v60, %v4905_v54  ;;  %v5270_v0 = vld [vmem:[#allocation7 + $0x9e4] sm:$0xf0]  ;;  %v4833_v10 = vld [vmem:[#allocation7 + $0xa60] sm:$0xf] }
 0x13d   : > { %2632 = vmatpush.bf16.msrb.mxu1 %v4548_v55  ;;  %v1447_v11 = vpop.f32.mrf.mxu3  ;;  %v4452_v55 = vor.u32 %v5189_v59, %v4449_v61  ;;  %v4644_v5 = vor.u32 %v5237_v19, %v4641_v3  ;;  %v4842_v59 = vor.u32 %v5288_v41, %v4841_v37  ;;  %v4705_v61 = vld [vmem:[#allocation7 + $0x960] sm:$0xf]  ;;  %v5286_v19 = vld [vmem:[#allocation7 + $0xa64] sm:$0xf0]  ;;  %v5264_v41 = vld [vmem:[#allocation7 + $0x9b4] sm:$0xf0] }
 0x13e   : > { %2645 = vmatpush.bf16.msrb.mxu2 %v4612_v53  ;;  %v1448_v53 = vadd.f32 %v1447_v11, %v5934_v48  ;;  %v4508_v48 = vor.u32 %v5203_v28, %v4505_v9  ;;  %v4897_v3 = vld [vmem:[#allocation7 + $0xae0] sm:$0xf]  ;;  %v5302_v11 = vld [vmem:[#allocation7 + $0xae4] sm:$0xf0]  ;;  %v4834_v8 = vor.u32 %v5286_v19, %v4833_v10  ;;  %v5252_v28 = vld [vmem:[#allocation7 + $0x954] sm:$0xf0] }
 0x13f   : > { %2610 = vmatpush.bf16.msra.mxu3 %v4388_v44  ;;  %v5235_v44 = vld [vmem:[#allocation7 + $0x8d4] sm:$0xf]  ;;  %v4873_v54 = vld [vmem:[#allocation7 + $0xab0] sm:$0xf]  ;;  %v5296_v60 = vld [vmem:[#allocation7 + $0xab4] sm:$0xf0] }
 0x140   : > { %2620 = vmatpush.bf16.msrb.mxu0 %v4476_v13  ;;  %v4633_v13 = vld [vmem:[#allocation7 + $0x8d8] sm:$0xf0]  ;;  %v4865_v10 = vld [vmem:[#allocation7 + $0xaa0] sm:$0xf]  ;;  %v5294_v19 = vld [vmem:[#allocation7 + $0xaa4] sm:$0xf0] }
 0x141   : > { %2633 = vmatpush.bf16.msrb.mxu1 %v4540_v21  ;;  %v4433_v21 = vld [vmem:[#allocation7 + $0x748] sm:$0xf0]  ;;  %v4636_v50 = vor.u32 %v5235_v44, %v4633_v13  ;;  %v4825_v44 = vld [vmem:[#allocation7 + $0xa50] sm:$0xf]  ;;  %v5284_v13 = vld [vmem:[#allocation7 + $0xa54] sm:$0xf0] }
 0x142   : > { %2646 = vmatpush.bf16.msrb.mxu2 %v4604_v22  ;;  %v4572_v22 = vor.u32 %v5219_v12, %v4569_v14  ;;  %v4436_v39 = vor.u32 %v5185_v18, %v4433_v21  ;;  %v4898_v12 = vor.u32 %v5302_v11, %v4897_v3  ;;  %v5268_v14 = vld [vmem:[#allocation7 + $0x9d4] sm:$0xf0]  ;;  %v4889_v18 = vld [vmem:[#allocation7 + $0xad0] sm:$0xf] }
 0x143   : > { %2611 = vmatpush.bf16.msra.mxu3 %v4380_v52  ;;  %v4625_v52 = vld [vmem:[#allocation7 + $0x8c8] sm:$0xf0]  ;;  %v5300_v21 = vld [vmem:[#allocation7 + $0xad4] sm:$0xf0] }
 0x144   : > { %2621 = vmatpush.bf16.msrb.mxu0 %v4468_v31  ;;  %v1460_v31 = vpop.f32.mrf.mxu0 }
 0x145   : > { %2634 = vmatpush.bf16.msrb.mxu1 %v4532_v17  ;;  %v1461_v17 = vadd.f32 %v1460_v31, %v1448_v53  ;;  %v1473_v40 = vpop.f32.mrf.mxu1  ;;  %v4706_v53 = vor.u32 %v5254_v62, %v4705_v61  ;;  %v5282_v31 = vld [vmem:[#allocation7 + $0xa44] sm:$0xf0]  ;;  %v4737_v61 = vld [vmem:[#allocation7 + $0x9a0] sm:$0xf]  ;;  %v4874_v62 = vor.u32 %v5296_v60, %v4873_v54 }
 0x146   : > { %2647 = vmatpush.bf16.msrb.mxu2 %v4596_v35  ;;  %v1449_v35 = vpop.f32.mrf.mxu3  ;;  %v4929_v60 = vld [vmem:[#allocation7 + $0xb20] sm:$0xf] }
 0x147   : > { %2612 = vmatpush.bf16.msra.mxu3 %v4372_v56  ;;  %v4628_v56 = vor.u32 %v5233_v30, %v4625_v52  ;;  %v4890_v30 = vor.u32 %v5300_v21, %v4889_v18  ;;  %v5266_v52 = vld [vmem:[#allocation7 + $0x9c4] sm:$0xf0]  ;;  %v4721_v21 = vld [vmem:[#allocation7 + $0x980] sm:$0xf] }
 0x148   : > { %2622 = vmatpush.bf16.msrb.mxu0 %v4460_v57  ;;  %v1474_v57 = vadd.f32 %v1473_v40, %v1461_v17  ;;  %v4754_v17 = vor.u32 %v5266_v52, %v4753_v27  ;;  %v5248_v40 = vld [vmem:[#allocation7 + $0x934] sm:$0xf0] }
 0x149   : > { %2635 = vmatpush.bf16.msrb.mxu1 %v4524_v26  ;;  %v5312_v52 = vld [vmem:[#allocation7 + $0xb34] sm:$0xf0] }
 0x14a   : > { %2648 = vmatpush.bf16.msrb.mxu2 %v4588_v4  ;;  %2613 = vmatmul.bf16.vlgmr.msra.gmra.mxu3 %v5916_v38  ;;  %v4713_v38 = vld [vmem:[#allocation7 + $0x970] sm:$0xf]  ;;  %v4778_v4 = vor.u32 %v5272_v36, %v4777_v33 }
 0x14b   : > { %2661 = vmatpush.bf16.msrb.mxu3 %v4652_v58  ;;  %v4714_v26 = vor.u32 %v5256_v45, %v4713_v38  ;;  %v4769_v58 = vld [vmem:[#allocation7 + $0x9e0] sm:$0xf]  ;;  %v5298_v38 = vld [vmem:[#allocation7 + $0xac4] sm:$0xf0]  ;;  %v4745_v36 = vld [vmem:[#allocation7 + $0x9b0] sm:$0xf] }
 0x14c   : > { %2623 = vmatpush.bf16.msrb.mxu0 %v4452_v55  ;;  %v1486_v55 = vpop.f32.mrf.mxu2  ;;  %v1462_v9 = vpop.f32.mrf.mxu0 }
 0x14d   : > { %2636 = vmatpush.bf16.msrb.mxu1 %v4516_v29  ;;  %v1487_v29 = vadd.f32 %v1486_v55, %v1474_v57  ;;  %v4746_v57 = vor.u32 %v5264_v41, %v4745_v36  ;;  %v4857_v9 = vld [vmem:[#allocation7 + $0xa90] sm:$0xf]  ;;  %v2745_v41 = vrot.slane %v5777_v32, 2 }
 0x14e   : > { %2649 = vmatpush.bf16.msrb.mxu2 %v4580_v7  ;;  %v4770_v7 = vor.u32 %v5270_v0, %v4769_v58  ;;  %v5262_v58 = vld [vmem:[#allocation7 + $0x9a4] sm:$0xf0] }
 0x14f   : > { %2662 = vmatpush.bf16.msrb.mxu3 %v4644_v5  ;;  %v4761_v5 = vld [vmem:[#allocation7 + $0x9d0] sm:$0xf]  ;;  %v5278_v0 = vld [vmem:[#allocation7 + $0xa24] sm:$0xf0]  ;;  %v4738_v11 = vor.u32 %v5262_v58, %v4737_v61  ;;  %v5285_v61 = vld [vmem:[#allocation7 + $0xa64] sm:$0xf] }
 0x150   : > { %2624 = vmatpush.bf16.msrb.mxu0 %v4444_v42  ;;  %v1475_v42 = vpop.f32.mrf.mxu1  ;;  %v4762_v20 = vor.u32 %v5268_v14, %v4761_v5  ;;  %v5276_v5 = vld [vmem:[#allocation7 + $0xa14] sm:$0xf0]  ;;  %v2746_v58 = vrot.slane %v5823_v34, 2 }
 0x151   : > { %2637 = vmatpush.bf16.msrb.mxu1 %v4508_v48  ;;  %v1499_v48 = vpop.f32.mrf.mxu3 }
 0x152   : > { %2650 = vmatpush.bf16.msrb.mxu2 %v4572_v22  ;;  %v4698_v22 = vor.u32 %v5252_v28, %v4697_v6  ;;  %v5969_v23 = vadd.f32 %v1499_v48, %v1487_v29  ;;  %v5244_v29 = vld [vmem:[#allocation7 + $0x914] sm:$0xf0]  ;;  %v4793_v28 = vld [vmem:[#allocation7 + $0xa10] sm:$0xf]  ;;  %v5258_v48 = vld [vmem:[#allocation7 + $0x984] sm:$0xf0] }
 0x153   : > { %2663 = vmatpush.bf16.msrb.mxu3 %v4636_v50  ;;  %v5250_v50 = vld [vmem:[#allocation7 + $0x944] sm:$0xf0]  ;;  %v5260_v6 = vld [vmem:[#allocation7 + $0x994] sm:$0xf0]  ;;  %v4794_v18 = vor.u32 %v5276_v5, %v4793_v28  ;;  %v4699_v5 = vld [vmem:[#allocation7 + $0x958] sm:$0xf0] }
 0x154   : > { %2625 = vmatpush.bf16.msrb.mxu0 %v4436_v39  ;;  %v4690_v45 = vor.u32 %v5250_v50, %v4689_v24  ;;  %v1488_v33 = vpop.f32.mrf.mxu2  ;;  %v4681_v39 = vld [vmem:[#allocation7 + $0x930] sm:$0xf]  ;;  %v4849_v24 = vld [vmem:[#allocation7 + $0xa80] sm:$0xf]  ;;  %v5290_v50 = vld [vmem:[#allocation7 + $0xa84] sm:$0xf0] }
 0x155   : > { %2638 = vmatpush.bf16.msrb.mxu1 %v4500_v46  ;;  %v4809_v46 = vld [vmem:[#allocation7 + $0xa30] sm:$0xf]  ;;  %v4722_v33 = vor.u32 %v5258_v48, %v4721_v21  ;;  %v4850_v36 = vor.u32 %v5290_v50, %v4849_v24  ;;  %v4913_v21 = vld [vmem:[#allocation7 + $0xb00] sm:$0xf]  ;;  %v4691_v24 = vld [vmem:[#allocation7 + $0x948] sm:$0xf0] }
 0x156   : > { %2651 = vmatpush.bf16.msrb.mxu2 %v4564_v47  ;;  %v5280_v47 = vld [vmem:[#allocation7 + $0xa34] sm:$0xf0] }
 0x157   : > { %2664 = vmatpush.bf16.msrb.mxu3 %v4628_v56  ;;  %2626 = vmatmul.bf16.vlgmr.msrb.gmra.mxu0 %v5928_v25  ;;  %v4817_v25 = vld [vmem:[#allocation7 + $0xa40] sm:$0xf] }
 0x158   : > { %3117 = vmatpush.bf16.msra.mxu0 %v4714_v26  ;;  %2639 = vmatmul.bf16.vlgmr.msrb.gmra.mxu1 %v5948_v15  ;;  %v4881_v15 = vld [vmem:[#allocation7 + $0xac0] sm:$0xf]  ;;  %v4818_v35 = vor.u32 %v5282_v31, %v4817_v25  ;;  %v4810_v26 = vor.u32 %v5280_v47, %v4809_v46  ;;  %v5255_v25 = vld [vmem:[#allocation7 + $0x974] sm:$0xf] }
 0x159   : > { %3130 = vmatpush.bf16.msra.mxu1 %v4778_v4  ;;  %2652 = vmatmul.bf16.vlgmr.msrb.gmra.mxu2 %v5953_v43  ;;  %v4826_v43 = vor.u32 %v5284_v13, %v4825_v44  ;;  %v4882_v37 = vor.u32 %v5298_v38, %v4881_v15  ;;  %v1501_v56 = vpop.f32.mrf.mxu3  ;;  %v4673_v4 = vld [vmem:[#allocation7 + $0x920] sm:$0xf]  ;;  %v5242_v13 = vld [vmem:[#allocation7 + $0x904] sm:$0xf0]  ;;  %v4715_v15 = vld [vmem:[#allocation7 + $0x978] sm:$0xf0] }
 0x15a   : > { %3143 = vmatpush.bf16.msra.mxu2 %v4842_v59  ;;  %4654 = vmatmul.msk.bf16.vlgmr.msrb.gmra.mxu3 %vm876_vm0, %v5946_v63  ;;  %v4682_v63 = vor.u32 %v5248_v40, %v4681_v39  ;;  %v5246_v59 = vld [vmem:[#allocation7 + $0x924] sm:$0xf0]  ;;  %v4657_v44 = vld [vmem:[#allocation7 + $0x900] sm:$0xf]  ;;  %v5271_v38 = vld [vmem:[#allocation7 + $0x9f4] sm:$0xf]  ;;  %v4718_v47 = vor.u32 %v5255_v25, %v4715_v15 }
 0x15b   : > { %3156 = vmatpush.bf16.msra.mxu3 %v4906_v51  ;;  %v4801_v51 = vld [vmem:[#allocation7 + $0xa20] sm:$0xf]  ;;  %v4674_v3 = vor.u32 %v5246_v59, %v4673_v4  ;;  %v4658_v31 = vor.u32 %v5242_v13, %v4657_v44  ;;  %v4843_v39 = vld [vmem:[#allocation7 + $0xa78] sm:$0xf0]  ;;  %v5253_v56 = vld [vmem:[#allocation7 + $0x964] sm:$0xf] }
 0x15c   : > { %3118 = vmatpush.bf16.msra.mxu0 %v4706_v53  ;;  %v4802_v55 = vor.u32 %v5278_v0, %v4801_v51  ;;  %v4665_v53 = vld [vmem:[#allocation7 + $0x910] sm:$0xf]  ;;  %v5269_v4 = vld [vmem:[#allocation7 + $0x9e4] sm:$0xf]  ;;  %v4771_v59 = vld [vmem:[#allocation7 + $0x9e8] sm:$0xf0] }
 0x15d   : > { %3131 = vmatpush.bf16.msra.mxu1 %v4770_v7  ;;  %v4729_v7 = vld [vmem:[#allocation7 + $0x990] sm:$0xf]  ;;  %v4666_v14 = vor.u32 %v5244_v29, %v4665_v53  ;;  %v2747_v51 = vrot.slane %v5796_v1, 2  ;;  %v4827_v44 = vld [vmem:[#allocation7 + $0xa58] sm:$0xf0] }
 0x15e   : > { %3144 = vmatpush.bf16.msra.mxu2 %v4834_v8  ;;  %v4866_v8 = vor.u32 %v5294_v19, %v4865_v10  ;;  %v4730_v42 = vor.u32 %v5260_v6, %v4729_v7  ;;  %v2748_v19 = vrot.slane %v5799_v2, 2  ;;  %v4921_v29 = vld [vmem:[#allocation7 + $0xb10] sm:$0xf]  ;;  %v5308_v7 = vld [vmem:[#allocation7 + $0xb14] sm:$0xf0] }
 0x15f   : > { %3157 = vmatpush.bf16.msra.mxu3 %v4898_v12  ;;  %v5292_v12 = vld [vmem:[#allocation7 + $0xa94] sm:$0xf0]  ;;  %v4819_v25 = vld [vmem:[#allocation7 + $0xa48] sm:$0xf0]  ;;  %v4907_v15 = vld [vmem:[#allocation7 + $0xaf8] sm:$0xf0] }
 0x160   : > { %3119 = vmatpush.bf16.msra.mxu0 %v4698_v22  ;;  %v4785_v22 = vld [vmem:[#allocation7 + $0xa00] sm:$0xf] }
 0x161   : > { %3132 = vmatpush.bf16.msra.mxu1 %v4762_v20  ;;  %v4858_v20 = vor.u32 %v5292_v12, %v4857_v9  ;;  %v5267_v9 = vld [vmem:[#allocation7 + $0x9d4] sm:$0xf]  ;;  %v4763_v12 = vld [vmem:[#allocation7 + $0x9d8] sm:$0xf0] }
 0x162   : > { %3145 = vmatpush.bf16.msra.mxu2 %v4826_v43  ;;  %v5274_v43 = vld [vmem:[#allocation7 + $0xa04] sm:$0xf0] }
 0x163   : > { %3158 = vmatpush.bf16.msra.mxu3 %v4890_v30  ;;  %v4937_v30 = vld [vmem:[#allocation7 + $0xb30] sm:$0xf] }
 0x164   : > { %3120 = vmatpush.bf16.msra.mxu0 %v4690_v45  ;;  %v1962_v27 = vpop.f32.mrf.mxu0  ;;  %v4779_v45 = vld [vmem:[#allocation7 + $0x9f8] sm:$0xf0] }
 0x165   : > { %3133 = vmatpush.bf16.msra.mxu1 %v4754_v17  ;;  %v4786_v17 = vor.u32 %v5274_v43, %v4785_v22  ;;  %v1975_v40 = vpop.f32.mrf.mxu1  ;;  %v4782_v54 = vor.u32 %v5271_v38, %v4779_v45  ;;  %v4766_v22 = vor.u32 %v5267_v9, %v4763_v12  ;;  %v5249_v43 = vld [vmem:[#allocation7 + $0x944] sm:$0xf]  ;;  %v4667_v9 = vld [vmem:[#allocation7 + $0x918] sm:$0xf0] }
 0x166   : > { %3146 = vmatpush.bf16.msra.mxu2 %v4818_v35  ;;  %v5287_v35 = vld [vmem:[#allocation7 + $0xa74] sm:$0xf]  ;;  %v1976_v46 = vadd.f32 %v1975_v40, %v1962_v27  ;;  %v5265_v27 = vld [vmem:[#allocation7 + $0x9c4] sm:$0xf]  ;;  %v4683_v40 = vld [vmem:[#allocation7 + $0x938] sm:$0xf0] }
 0x167   : > { %3159 = vmatpush.bf16.msra.mxu3 %v4882_v37  ;;  %v4938_v37 = vor.u32 %v5312_v52, %v4937_v30  ;;  %v4755_v30 = vld [vmem:[#allocation7 + $0x9c8] sm:$0xf0]  ;;  %v5281_v52 = vld [vmem:[#allocation7 + $0xa44] sm:$0xf] }
 0x168   : > { %3121 = vmatpush.bf16.msra.mxu0 %v4682_v63  ;;  %v5310_v63 = vld [vmem:[#allocation7 + $0xb24] sm:$0xf0] }
 0x169   : > { %3134 = vmatpush.bf16.msra.mxu1 %v4746_v57  ;;  %v4846_v57 = vor.u32 %v5287_v35, %v4843_v39  ;;  %v4930_v0 = vor.u32 %v5310_v63, %v4929_v60  ;;  %v4758_v35 = vor.u32 %v5265_v27, %v4755_v30  ;;  %v5247_v39 = vld [vmem:[#allocation7 + $0x934] sm:$0xf] }
 0x16a   : > { %3147 = vmatpush.bf16.msra.mxu2 %v4810_v26  ;;  %v4707_v26 = vld [vmem:[#allocation7 + $0x968] sm:$0xf0]  ;;  %v5279_v60 = vld [vmem:[#allocation7 + $0xa34] sm:$0xf] }
 0x16b   : > { %3160 = vmatpush.bf16.msra.mxu3 %v4874_v62  ;;  %v4835_v62 = vld [vmem:[#allocation7 + $0xa68] sm:$0xf0] }
 0x16c   : > { %3122 = vmatpush.bf16.msra.mxu0 %v4674_v3  ;;  %v1988_v10 = vpop.f32.mrf.mxu2  ;;  %v1964_v53 = vpop.f32.mrf.mxu0  ;;  %v4838_v28 = vor.u32 %v5285_v61, %v4835_v62  ;;  %v2749_v62 = vrot.slane %v5834_v49, 2 }
 0x16d   : > { %3135 = vmatpush.bf16.msra.mxu1 %v4738_v11  ;;  %v2001_v3 = vpop.f32.mrf.mxu3  ;;  %v4710_v11 = vor.u32 %v5253_v56, %v4707_v26  ;;  %v1989_v6 = vadd.f32 %v1988_v10, %v1976_v46  ;;  %v4811_v56 = vld [vmem:[#allocation7 + $0xa38] sm:$0xf0]  ;;  %v4899_v26 = vld [vmem:[#allocation7 + $0xae8] sm:$0xf0] }
 0x16e   : > { %3148 = vmatpush.bf16.msra.mxu2 %v4802_v55  ;;  %v4774_v55 = vor.u32 %v5269_v4, %v4771_v59  ;;  %v4686_v59 = vor.u32 %v5247_v39, %v4683_v40  ;;  %v4675_v10 = vld [vmem:[#allocation7 + $0x928] sm:$0xf0] }
 0x16f   : > { %3161 = vmatpush.bf16.msra.mxu3 %v4866_v8  ;;  %v5251_v8 = vld [vmem:[#allocation7 + $0x954] sm:$0xf]  ;;  %v2002_v13 = vadd.f32 %v2001_v3, %v1989_v6  ;;  %v4814_v3 = vor.u32 %v5279_v60, %v4811_v56  ;;  %v4739_v53 = vld [vmem:[#allocation7 + $0x9a8] sm:$0xf0]  ;;  %v4891_v6 = vld [vmem:[#allocation7 + $0xad8] sm:$0xf0] }
 0x170   : > { %3123 = vmatpush.bf16.msra.mxu0 %v4666_v14  ;;  %v5283_v14 = vld [vmem:[#allocation7 + $0xa54] sm:$0xf]  ;;  %v4702_v48 = vor.u32 %v5251_v8, %v4699_v5  ;;  %v5309_v60 = vld [vmem:[#allocation7 + $0xb24] sm:$0xf] }
 0x171   : > { %3136 = vmatpush.bf16.msra.mxu1 %v4730_v42  ;;  %v1977_v42 = vpop.f32.mrf.mxu1  ;;  %v4830_v50 = vor.u32 %v5283_v14, %v4827_v44  ;;  %v5299_v8 = vld [vmem:[#allocation7 + $0xad4] sm:$0xf] }
 0x172   : > { %3149 = vmatpush.bf16.msra.mxu2 %v4794_v18  ;;  %v4922_v18 = vor.u32 %v5308_v7, %v4921_v29  ;;  %v5277_v29 = vld [vmem:[#allocation7 + $0xa24] sm:$0xf]  ;;  %v4803_v7 = vld [vmem:[#allocation7 + $0xa28] sm:$0xf0]  ;;  %v5243_v5 = vld [vmem:[#allocation7 + $0x914] sm:$0xf]  ;;  %v4894_v14 = vor.u32 %v5299_v8, %v4891_v6 }
 0x173   : > { %3162 = vmatpush.bf16.msra.mxu3 %v4858_v20  ;;  %v5306_v20 = vld [vmem:[#allocation7 + $0xb04] sm:$0xf0]  ;;  %v4806_v12 = vor.u32 %v5277_v29, %v4803_v7  ;;  %v5259_v44 = vld [vmem:[#allocation7 + $0x994] sm:$0xf]  ;;  %v5289_v8 = vld [vmem:[#allocation7 + $0xa84] sm:$0xf] }
 0x174   : > { %3124 = vmatpush.bf16.msra.mxu0 %v4658_v31  ;;  %v5303_v31 = vld [vmem:[#allocation7 + $0xaf4] sm:$0xf]  ;;  %v4914_v38 = vor.u32 %v5306_v20, %v4913_v21  ;;  %v1990_v45 = vpop.f32.mrf.mxu2  ;;  %v2014_v46 = vpop.f32.mrf.mxu0  ;;  %v4795_v21 = vld [vmem:[#allocation7 + $0xa18] sm:$0xf0]  ;;  %v4670_v20 = vor.u32 %v5243_v5, %v4667_v9  ;;  %v4851_v6 = vld [vmem:[#allocation7 + $0xa88] sm:$0xf0] }
 0x175   : > { %3137 = vmatpush.bf16.msra.mxu1 %v4722_v33  ;;  %v2003_v33 = vpop.f32.mrf.mxu3  ;;  %v2015_v63 = vadd.f32 %v2014_v46, %v2002_v13  ;;  %v4731_v13 = vld [vmem:[#allocation7 + $0x998] sm:$0xf0]  ;;  %v5275_v42 = vld [vmem:[#allocation7 + $0xa14] sm:$0xf]  ;;  %v4915_v5 = vld [vmem:[#allocation7 + $0xb08] sm:$0xf0] }
 0x176   : > { %3150 = vmatpush.bf16.msra.mxu2 %v4786_v17  ;;  %v4694_v17 = vor.u32 %v5249_v43, %v4691_v24  ;;  %v4734_v43 = vor.u32 %v5259_v44, %v4731_v13  ;;  %v5241_v24 = vld [vmem:[#allocation7 + $0x904] sm:$0xf]  ;;  %v4798_v27 = vor.u32 %v5275_v42, %v4795_v21  ;;  %v5295_v45 = vld [vmem:[#allocation7 + $0xab4] sm:$0xf]  ;;  %v4875_v33 = vld [vmem:[#allocation7 + $0xab8] sm:$0xf0] }
 0x177   : > { %3163 = vmatpush.bf16.msra.mxu3 %v4850_v36  ;;  %3125 = vmatmul.bf16.vlgmr.msra.gmra.mxu0 %v2745_v41  ;;  %v4822_v36 = vor.u32 %v5281_v52, %v4819_v25  ;;  %v5986_v4 = vadd.f32 %v2015_v63, %v5960_v16  ;;  %v5257_v52 = vld [vmem:[#allocation7 + $0x984] sm:$0xf]  ;;  %v4723_v25 = vld [vmem:[#allocation7 + $0x988] sm:$0xf0] }
 0x178   : > { %3173 = vmatpush.bf16.msrb.mxu0 %v4938_v37  ;;  %3138 = vmatmul.bf16.vlgmr.msra.gmra.mxu1 %v2746_v58  ;;  %v4910_v37 = vor.u32 %v5303_v31, %v4907_v15  ;;  %v5273_v31 = vld [vmem:[#allocation7 + $0xa04] sm:$0xf]  ;;  %v4726_v40 = vor.u32 %v5257_v52, %v4723_v25  ;;  %v4931_v63 = vld [vmem:[#allocation7 + $0xb28] sm:$0xf0] }
 0x179   : > { %3182 = vmatpush.bf16.msrb.mxu1 %v4718_v47  ;;  %3151 = vmatmul.bf16.vlgmr.msra.gmra.mxu2 %v2747_v51  ;;  %v5263_v47 = vld [vmem:[#allocation7 + $0x9b4] sm:$0xf] }
 0x17a   : > { %3195 = vmatpush.bf16.msrb.mxu2 %v4782_v54  ;;  %3164 = vmatmul.bf16.vlgmr.msra.gmra.mxu3 %v2748_v19  ;;  %v4747_v54 = vld [vmem:[#allocation7 + $0x9b8] sm:$0xf0] }
 0x17b   : > { %3208 = vmatpush.bf16.msrb.mxu3 %v4846_v57  ;;  %v5301_v57 = vld [vmem:[#allocation7 + $0xae4] sm:$0xf]  ;;  %v4750_v61 = vor.u32 %v5263_v47, %v4747_v54  ;;  %v4867_v54 = vld [vmem:[#allocation7 + $0xaa8] sm:$0xf0] }
 0x17c   : > { %3174 = vmatpush.bf16.msrb.mxu0 %v4930_v0  ;;  %v5245_v0 = vld [vmem:[#allocation7 + $0x924] sm:$0xf] }
 0x17d   : > { %3183 = vmatpush.bf16.msrb.mxu1 %v4710_v11  ;;  %v4902_v11 = vor.u32 %v5301_v57, %v4899_v26  ;;  %v4678_v16 = vor.u32 %v5245_v0, %v4675_v10  ;;  %v5293_v47 = vld [vmem:[#allocation7 + $0xaa4] sm:$0xf]  ;;  %v5291_v10 = vld [vmem:[#allocation7 + $0xa94] sm:$0xf] }
 0x17e   : > { %3196 = vmatpush.bf16.msrb.mxu2 %v4774_v55  ;;  %v5261_v55 = vld [vmem:[#allocation7 + $0x9a4] sm:$0xf]  ;;  %v4870_v56 = vor.u32 %v5293_v47, %v4867_v54 }
 0x17f   : > { %3209 = vmatpush.bf16.msrb.mxu3 %v4838_v28  ;;  %v4742_v28 = vor.u32 %v5261_v55, %v4739_v53  ;;  %v4923_v55 = vld [vmem:[#allocation7 + $0xb18] sm:$0xf0] }
 0x180   : > { %3175 = vmatpush.bf16.msrb.mxu0 %v4922_v18  ;;  %v2016_v18 = vpop.f32.mrf.mxu0 }
 0x181   : > { %3184 = vmatpush.bf16.msrb.mxu1 %v4702_v48  ;;  %v5297_v48 = vld [vmem:[#allocation7 + $0xac4] sm:$0xf] }
 0x182   : > { %3197 = vmatpush.bf16.msrb.mxu2 %v4766_v22  ;;  %v4883_v22 = vld [vmem:[#allocation7 + $0xac8] sm:$0xf0] }
 0x183   : > { %3210 = vmatpush.bf16.msrb.mxu3 %v4830_v50  ;;  %v4659_v50 = vld [vmem:[#allocation7 + $0x908] sm:$0xf0]  ;;  %v4886_v30 = vor.u32 %v5297_v48, %v4883_v22 }
 0x184   : > { %3176 = vmatpush.bf16.msrb.mxu0 %v4914_v38  ;;  %v4787_v38 = vld [vmem:[#allocation7 + $0xa08] sm:$0xf0]  ;;  %v4662_v39 = vor.u32 %v5241_v24, %v4659_v50 }
 0x185   : > { %3185 = vmatpush.bf16.msrb.mxu1 %v4694_v17  ;;  %v2027_v15 = vpop.f32.mrf.mxu1  ;;  %v5311_v17 = vld [vmem:[#allocation7 + $0xb34] sm:$0xf] }
 0x186   : > { %3198 = vmatpush.bf16.msrb.mxu2 %v4758_v35  ;;  %v4939_v35 = vld [vmem:[#allocation7 + $0xb38] sm:$0xf0] }
 0x187   : > { %3211 = vmatpush.bf16.msrb.mxu3 %v4822_v36  ;;  %4943 = vmatmul.msk.bf16.vlgmr.msrb.gmra.mxu0 %vm876_vm0, %v2749_v62  ;;  %v4790_v36 = vor.u32 %v5273_v31, %v4787_v38  ;;  %v4942_v46 = vor.u32 %v5311_v17, %v4939_v35 }
 0x188   : > { %3221 = vmatpush.bf16.msra.mxu0 %v4910_v37  ;;  %v4878_v37 = vor.u32 %v5295_v45, %v4875_v33 }
 0x189   : > { %3186 = vmatpush.bf16.msrb.mxu1 %v4686_v59 }
 0x18a   : > { %3199 = vmatpush.bf16.msrb.mxu2 %v4750_v61  ;;  %v4934_v61 = vor.u32 %v5309_v60, %v4931_v63 }
 0x18b   : > { %3212 = vmatpush.bf16.msrb.mxu3 %v4814_v3  ;;  %v4859_v3 = vld [vmem:[#allocation7 + $0xa98] sm:$0xf0] }
 0x18c   : > { %3222 = vmatpush.bf16.msra.mxu0 %v4902_v11  ;;  %v2040_v57 = vpop.f32.mrf.mxu2  ;;  %v5307_v11 = vld [vmem:[#allocation7 + $0xb14] sm:$0xf]  ;;  %v4862_v29 = vor.u32 %v5291_v10, %v4859_v3 }
 0x18d   : > { %3187 = vmatpush.bf16.msrb.mxu1 %v4678_v16  ;;  %v2053_v26 = vpop.f32.mrf.mxu3  ;;  %v2029_v59 = vpop.f32.mrf.mxu1  ;;  %v2041_v0 = vadd.f32 %v2040_v57, %v2027_v15  ;;  %v4926_v7 = vor.u32 %v5307_v11, %v4923_v55 }
 0x18e   : > { %3200 = vmatpush.bf16.msrb.mxu2 %v4742_v28  ;;  %v5305_v28 = vld [vmem:[#allocation7 + $0xb04] sm:$0xf] }
 0x18f   : > { %3213 = vmatpush.bf16.msrb.mxu3 %v4806_v12  ;;  %v2054_v53 = vadd.f32 %v2053_v26, %v2041_v0  ;;  %v4918_v9 = vor.u32 %v5305_v28, %v4915_v5 }
 0x190   : > { %3223 = vmatpush.bf16.msra.mxu0 %v4894_v14 }
 0x191   : > { %3188 = vmatpush.bf16.msrb.mxu1 %v4670_v20 }
 0x192   : > { %3201 = vmatpush.bf16.msrb.mxu2 %v4734_v43 }
 0x193   : > { %3214 = vmatpush.bf16.msrb.mxu3 %v4798_v27 }
 0x194   : > { %3224 = vmatpush.bf16.msra.mxu0 %v4886_v30  ;;  %v2066_v16 = vpop.f32.mrf.mxu0  ;;  %v2042_v34 = vpop.f32.mrf.mxu2 }
 0x195   : > { %3189 = vmatpush.bf16.msrb.mxu1 %v4662_v39  ;;  %v2067_v32 = vadd.f32 %v2066_v16, %v2054_v53  ;;  %v2079_v12 = vpop.f32.mrf.mxu1 }
 0x196   : > { %3202 = vmatpush.bf16.msrb.mxu2 %v4726_v40 }
 0x197   : > { %3215 = vmatpush.bf16.msrb.mxu3 %v4790_v36  ;;  %v2080_v1 = vadd.f32 %v2079_v12, %v2067_v32 }
 0x198   : > { %3225 = vmatpush.bf16.msra.mxu0 %v4878_v37  ;;  %3190 = vmatmul.bf16.vlgmr.msrb.gmra.mxu1 %v2745_v41  ;;  %v4854_v41 = vor.u32 %v5289_v8, %v4851_v6 }
 0x199   : > { %3238 = vmatpush.bf16.msra.mxu1 %v4942_v46  ;;  %3203 = vmatmul.bf16.vlgmr.msrb.gmra.mxu2 %v2746_v58  ;;  %v2055_v58 = vpop.f32.mrf.mxu3 }
 0x19a   : > { %3216 = vmatmul.bf16.vlgmr.msrb.gmra.mxu3 %v2747_v51  ;;  %v2084_v51 = vadd.f32 %v2080_v1, %v5969_v23 }
 0x19c   : > { %3226 = vmatpush.bf16.msra.mxu0 %v4870_v56  ;;  %v2068_v14 = vpop.f32.mrf.mxu0 }
 0x19d   : > { %3239 = vmatpush.bf16.msra.mxu1 %v4934_v61  ;;  %v2081_v44 = vpop.f32.mrf.mxu1 }
 0x1a0   : > { %3227 = vmatpush.bf16.msra.mxu0 %v4862_v29 }
 0x1a1   : > { %3240 = vmatpush.bf16.msra.mxu1 %v4926_v7 }
 0x1a4   : > { %3228 = vmatpush.bf16.msra.mxu0 %v4854_v41 }
 0x1a5   : > { %3241 = vmatpush.bf16.msra.mxu1 %v4918_v9 }
 0x1a7   : > { %3229 = vmatmul.bf16.vlgmr.msra.gmra.mxu0 %v2748_v19 }
 0x1a8   : > { %4944 = vmatmul.msk.bf16.vlgmr.msra.gmra.mxu1 %vm876_vm0, %v2749_v62 }
 0x1ac   : > { %v2549_v13 = vpop.f32.mrf.mxu2 }
 0x1ad   : > { %v2562_v42 = vpop.f32.mrf.mxu3 }
 0x1ae   : > { %v2563_v18 = vadd.f32 %v2562_v42, %v2549_v13 }
 0x1b4   : > { %v2551_v21 = vpop.f32.mrf.mxu2  ;;  %v2575_v48 = vpop.f32.mrf.mxu0 }
 0x1b5   : > { %v2576_v22 = vadd.f32 %v2575_v48, %v2563_v18  ;;  %v2588_v20 = vpop.f32.mrf.mxu1  ;;  %v2564_v43 = vpop.f32.mrf.mxu3 }
 0x1b7   : > { %v2589_v24 = vadd.f32 %v2588_v20, %v2576_v22 }
 0x1bc   : > { %v2577_v50 = vpop.f32.mrf.mxu0  ;;  %v2601_v27 = vpop.f32.mrf.mxu2 }
 0x1bd   : > { %v2590_v23 = vpop.f32.mrf.mxu1  ;;  %v2602_v30 = vadd.f32 %v2601_v27, %v2589_v24 }
 0x1bf   : > { %v2670_v2 = vadd.f32 %v2602_v30, %v5986_v4 }
 0x1c4   : > { %v2603_v19 = vpop.f32.mrf.mxu2 }
 0x1cd   : > { %v2614_v49 = vpop.f32.mrf.mxu3 }
 0x1d4   : > { %v2627_v62 = vpop.f32.mrf.mxu0 }
 0x1d5   : > { %v2616_v52 = vpop.f32.mrf.mxu3  ;;  %v2628_v25 = vadd.f32 %v2627_v62, %v2614_v49  ;;  %v2640_v31 = vpop.f32.mrf.mxu1 }
 0x1d7   : > { %v2641_v15 = vadd.f32 %v2640_v31, %v2628_v25 }
 0x1dc   : > { %v2653_v38 = vpop.f32.mrf.mxu2  ;;  %v2629_v33 = vpop.f32.mrf.mxu0 }
 0x1dd   : > { %v2654_v45 = vadd.f32 %v2653_v38, %v2641_v15  ;;  %v2642_v17 = vpop.f32.mrf.mxu1  ;;  %v2666_v35 = vpop.f32.mrf.mxu3 }
 0x1df   : > { %v2667_v39 = vadd.f32 %v2666_v35, %v2654_v45 }
 0x1e1   : > { %v2671_v40 = vadd.f32 %v2667_v39, %v2084_v51 }
 0x1e4   : > { %v2655_v36 = vpop.f32.mrf.mxu2 }
 0x1e5   : > { %v2668_v37 = vpop.f32.mrf.mxu3 }
 0x1f4   : > { %v3126_v46 = vpop.f32.mrf.mxu0 }
 0x1f5   : > { %v3139_v47 = vpop.f32.mrf.mxu1 }
 0x1f6   : > { %v3140_v4 = vadd.f32 %v3139_v47, %v3126_v46 }
 0x1fc   : > { %v3152_v54 = vpop.f32.mrf.mxu2  ;;  %v3128_v60 = vpop.f32.mrf.mxu0 }
 0x1fd   : > { %v3165_v63 = vpop.f32.mrf.mxu3  ;;  %v3141_v56 = vpop.f32.mrf.mxu1  ;;  %v3153_v57 = vadd.f32 %v3152_v54, %v3140_v4 }
 0x1ff   : > { %v3166_v26 = vadd.f32 %v3165_v63, %v3153_v57 }
 0x204   : > { %v3154_v59 = vpop.f32.mrf.mxu2  ;;  %v3178_v0 = vpop.f32.mrf.mxu0 }
 0x205   : > { %v3167_v61 = vpop.f32.mrf.mxu3  ;;  %v3179_v10 = vadd.f32 %v3178_v0, %v3166_v26 }
 0x207   : > { %v3247_v3 = vadd.f32 %v3179_v10, %v2670_v2 }
 0x209   : > { %3249 = vst [vmem:[%s6006_s25] sm:$0xff] %v3247_v3  ;;  %v3263_v6 = vmul.f32 %v3247_v3, %v3247_v3  ;;  %v3251_v34 = vrot.slane %v3247_v3, 4 }
 0x20b   : > { %v3265_v28 = vrot.slane %v3263_v6, 4  ;;  %v3252_v51 = vadd.f32 %v3251_v34, %v3247_v3 }
 0x20c   : > { %v3180_v11 = vpop.f32.mrf.mxu0 }
 0x20d   : > { %v3266_v12 = vadd.f32 %v3265_v28, %v3263_v6 }
 0x20f   : > { %v3267_v44 = vrot.slane %v3266_v12, 2 }
 0x215   : > { %v3191_v55 = vpop.f32.mrf.mxu1 }
 0x21c   : > { %v3204_v53 = vpop.f32.mrf.mxu2 }
 0x21d   : > { %v3217_v29 = vpop.f32.mrf.mxu3  ;;  %v3205_v7 = vadd.f32 %v3204_v53, %v3191_v55  ;;  %v3193_v8 = vpop.f32.mrf.mxu1 }
 0x21f   : > { %v3218_v16 = vadd.f32 %v3217_v29, %v3205_v7 }
 0x224   : > { %v3230_v5 = vpop.f32.mrf.mxu0  ;;  %v3206_v41 = vpop.f32.mrf.mxu2 }
 0x225   : > { %v3231_v32 = vadd.f32 %v3230_v5, %v3218_v16  ;;  %v3219_v58 = vpop.f32.mrf.mxu3  ;;  %v3243_v9 = vpop.f32.mrf.mxu1 }
 0x227   : > { %v3244_v1 = vadd.f32 %v3243_v9, %v3231_v32 }
 0x229   : > { %v3248_v14 = vadd.f32 %v3244_v1, %v2671_v40 }
 0x22b   : > { %v3257_v13 = vrot.slane %v3248_v14, 4  ;;  %v3264_v42 = vmul.f32 %v3248_v14, %v3248_v14  ;;  %3250 = vst [vmem:[%s6006_s25 + $0x8] sm:$0xff] %v3248_v14 }
 0x22c   : > { %v3232_v18 = vpop.f32.mrf.mxu0 }
 0x22d   : > { %5521 = shalt.err (!%p5518_p13)
}
 0x22e   : > { %5327 = dma.vmem_to_hbm [thread:$0]  (%p5717_p4), %s3309_s24, 256, %s3311_s27, %s3288_s28   ;;  %v3253_v21 = vrot.slane %v3252_v51, 2  ;;  %v3258_v48 = vadd.f32 %v3257_v13, %v3248_v14  ;;  %v3271_v22 = vrot.slane %v3264_v42, 4  ;;  %v3245_v20 = vpop.f32.mrf.mxu1  ;;  %v3268_v43 = vadd.f32 %v3267_v44, %v3266_v12 }
 0x22f   : > { %s3494_s22 = sshll.u32 %s5751_s13, 2  ;;  %s5314_s14 = sshll.u32 %s5608_s18, 2  ;;  %vm3277_vm1 = vcmask 1040384   ;;  %vm3283_vm2 = vcmask 1041408  }
 0x230   : > { %v3259_v24 = vrot.slane %v3258_v48, 2  ;;  %v3272_v50 = vadd.f32 %v3271_v22, %v3264_v42  ;;  %v3254_v23 = vadd.f32 %v3253_v21, %v3252_v51  ;;  %v3269_v2 = vrot.slane %v3268_v43, 1  ;;  %s3323_s20 = scalar_lea.hbm %s6069_s4, %s5314_s14  ;;  %s309_s21 = scalar_lea.vmem [#allocation9], %s3494_s22 }
 0x231   : > { %s3325_s25 = sshll.u32 %s309_s21, 4  ;;  %s3327_s5 = sshll.u32 %s3323_s20, 4  ;;  %s3326_s25 = int_to_ptr.vmem [resolvable:$true] %s3325_s25  ;;  %s3328_s5 = int_to_ptr.hbm [resolvable:$true] %s3327_s5 }
 0x232   : > { %v3260_v27 = vadd.f32 %v3259_v24, %v3258_v48  ;;  %v3273_v30 = vrot.slane %v3272_v50, 2  ;;  %v3255_v52 = vrot.slane %v3254_v23, 1  ;;  %v3270_v15 = vadd.f32 %v3269_v2, %v3268_v43  ;;  %s3293_s18 = scalar_lea.sflag [#allocation10], %s5751_s13  ;;  %s5536_s8 = sshra.s32 %s3328_s5, 4  ;;  %s5537_s8 = int_to_ptr.hbm [resolvable:$true] %s5536_s8 }
 0x233   : > { %s5538_s11 = scalar_lea.hbm %s5537_s8, 4  ;;  %s5542_s27 = scalar_lea.hbm %s6069_s4, 8 }
 0x234   : > { %v3261_v19 = vrot.slane %v3260_v27, 1  ;;  %v3274_v49 = vadd.f32 %v3273_v30, %v3272_v50  ;;  %v3256_v38 = vadd.f32 %v3255_v52, %v3254_v23  ;;  %p5539_p0 = scmp.ne.s32.totalorder %s5537_s8, %s5538_s11  ;;  %p5543_p9 = scmp.lt.s32.totalorder %s5537_s8, %s6069_s4 }
 0x235   : > { %p5544_p1 = scmp.lt.s32.totalorder %s5542_s27, %s5538_s11 }
 0x236   : > { %v3275_v62 = vrot.slane %v3274_v49, 1  ;;  %v3262_v25 = vadd.f32 %v3261_v19, %v3260_v27  ;;  %v3278_v17 = vsel %vm3277_vm1, %v3256_v38, %v3270_v15  ;;  %p5540_p2 = pnand %p5539_p0, %p5717_p4 }
 0x237   : > { %p5545_p3 = por %p5544_p1, %p5543_p9 }
 0x238   : > { %v3276_v31 = vadd.f32 %v3275_v62, %v3274_v49  ;;  %p5541_p5 = pneg %p5540_p2 }
 0x23a   : > { %v3279_v45 = vsel %vm3277_vm1, %v3262_v25, %v3276_v31  ;;  %p5546_p8 = pnand %p5545_p3, %p5541_p5 }
 0x23b   : > { %v3282_v33 = vrot.slane %v3279_v45, 6 }
 0x23d   : > { %v3284_v35 = vsel %vm3283_vm2, %v3278_v17, %v3282_v33 }
 0x23e   : > { %3286 = vst [vmem:[%s309_s21] sm:$0xf] %v3284_v35 }
 0x23f   : > { %5549 = shalt.err (!%p5546_p8)
}
 0x240   : > { %5328 = dma.vmem_to_hbm [thread:$0]  (%p5717_p4), %s3326_s25, 64, %s3328_s5, %s3293_s18  }
 0x241 PF: > { %s6088_s13 = sld [smem:[#allocation18_spill]]  ;;  %s3339_s30 = sand.u32 1, %s5596_s15  }
 0x242   : > { %p5343_p10 = pnand %p3488_p6, %p5725_p7  ;;  %s3340_s6 = scalar_lea.sflag [#allocation4], %s3339_s30 }
 0x244   : > { %p5344_p11 = pneg %p5343_p10 }
 0x246   : > { %5587 = dma.done.wait (%p5344_p11), %s3340_s6, 256  }
 0x247   : > { %5589 = vsyncadd (%p5344_p11), %s3340_s6, 4294967040  ;;  %s3350_s9 = scalar_lea.sflag [#allocation10], %s3339_s30 }
 0x248   : > { %5591 = dma.done.wait (%p5344_p11), %s3350_s9, 64  }
 0x249   : > { %5593 = vsyncadd (%p5344_p11), %s3350_s9, 4294967232  ;;  %s27_s20 = sadd.s32 1, %s6088_s13   ;;  %s6089_s10 = sld [smem:[#allocation16_spill]] }
 0x24a   : > { %p24_p12 = scmp.ge.s32.totalorder %s27_s20, 4   ;;  %s6090_s17 = sld [smem:[#allocation20_spill]] }
 0x24b   : > { %s6091_s18 = sld [smem:[#allocation17_spill]]  ;;  %s6093_s15 = smov %s5600_s16 }
 0x24c   : > { %s6092_s19 = sld [smem:[#allocation19_spill]]  ;;  %26 = sbr.rel (!%p24_p12) target bundleno = 12 (0xc), region = 115 }
 0x24f   : > { %s6094_s16 = smov %s6089_s10 }
 0x251   :  { %3356 = vsyncpa [#allocation3], 1 }
 0x252   :  { %3358 = vsyncpa [#allocation3 + $0x1], 1 }
 0x253   :  { %3359 = vsyncpa [#allocation6], 1 }
 0x254   :  { %3361 = vsyncpa [#allocation6 + $0x1], 1 }
 0x255   :  { %3362 = vsyncpa [#allocation4], 1 }
 0x256   :  { %3364 = vsyncpa [#allocation4 + $0x1], 1 }
 0x257   :  { %3365 = vsyncpa [#allocation10], 1 }
 0x258   :  { %3367 = vsyncpa [#allocation10 + $0x1], 1 }

</bundles_post_ra>
